<compile_context>
chip_gen: v7x
topology: tpu7x:2x2x1
jax: 0.10.0
libtpu: 0.0.40
codegen_flags: <defaults>
</compile_context>

<pallas_src>
import functools

import jax
import jax.numpy as jnp
from jax.experimental import pallas as pl
from jax.experimental.pallas import tpu as pltpu


# ---------------------------------------------------------------------------
# In-kernel GATConv layer (PyG defaults: concat=True, negative_slope=0.2,
# add_self_loops=True, bias=True, attention dropout=0).
# Head-stacked layout: column hd*N + j == (head hd, source node j).
# ---------------------------------------------------------------------------
def _gat_layer(x, w, a_src_exp, a_dst_exp, bias, adj_bias, eye_t, head_ones,
               head_mask, *, heads, apply_relu):
    # x: [N, Fin] @ w: [Fin, H*C] -> h: [N, H*C]   (MXU)
    h = jnp.dot(x, w, preferred_element_type=jnp.float32)

    # Attention logit pieces, head-stacked on the lane axis ([N, H*N]):
    #   dst_e[i, hd*N + j]    = a_dst[hd] . h_i[hd]   (same value for every lane j of block hd)
    #   src_pre[j, hd*N + j'] = a_src[hd] . h_j[hd]
    dst_e = jnp.dot(h, a_dst_exp, preferred_element_type=jnp.float32)
    src_pre = jnp.dot(h, a_src_exp, preferred_element_type=jnp.float32)
    # Move the source term onto the lane axis without an explicit transpose:
    # keep only the diagonal entry of each head block, then sum over rows.
    src_row = jnp.sum(src_pre * eye_t, axis=0, keepdims=True)        # [1, H*N]

    e = dst_e + src_row                      # e[i, hd*N+j] = a_dst.h_i + a_src.h_j
    e = jnp.where(e > 0, e, 0.2 * e)         # LeakyReLU(negative_slope=0.2)
    e = e + adj_bias                         # additive mask: 0 on edge, -1e30 off-edge

    # Softmax over source nodes j, per (target i, head). Subtracting the per-row
    # max (over all heads) is exact: softmax is shift-invariant per head group.
    e = e - jnp.max(e, axis=1, keepdims=True)
    p = jnp.exp(e)                           # masked entries underflow to exactly 0.0
    # Per-head row sums broadcast back across each head's N lanes with one MXU matmul
    # against the block-diagonal all-ones matrix (no lane-segmented reduce).
    denom = jnp.dot(p, head_ones, preferred_element_type=jnp.float32)
    alpha = p * pl.reciprocal(denom, approx=True)   # every row has >=1 edge (self-loops)

    # Aggregation as ONE MXU matmul:
    #   h_big[hd*N + j, hd'*C + c] = h[j, hd'*C + c] * (hd == hd')
    #   (alpha @ h_big)[i, hd*C + c] = sum_j alpha[i, hd, j] * h[j, hd*C + c]
    h_big = jnp.concatenate([h] * heads, axis=0) * head_mask          # [H*N, H*C]
    out = jnp.dot(alpha, h_big, preferred_element_type=jnp.float32) + bias
    if apply_relu:
        out = jnp.maximum(out, 0.0)
    return out


def fused_gat_kernel(x_ref, adjb_ref, eye_ref, ones_ref, hmask_ref,
                     w1_ref, a1s_ref, a1d_ref, b1_ref,
                     w2_ref, a2s_ref, a2d_ref, b2_ref,
                     wl_ref, wscale_ref, bl_ref, o_ref, h_scratch,
                     *, heads, cache_h, int8_wl):
    """One grid step = one column tile of the final Linear.

    cache_h=True  (single-TC chips, grid axis "arbitrary"): h (post-conv2) is
      computed once at program_id==0 into a VMEM scratch and reused afterwards.
    cache_h=False (v7x, grid axis "parallel"): the tiny GAT path is recomputed
      per tile so the two TensorCores stay independent; recompute is hidden
      under the pipelined wl DMA.  h never round-trips through HBM either way.
    """
    def compute_h():
        adj_bias = adjb_ref[...]
        eye_t = eye_ref[...]
        head_ones = ones_ref[...]
        head_mask = hmask_ref[...]
        h1 = _gat_layer(x_ref[...], w1_ref[...], a1s_ref[...], a1d_ref[...],
                        b1_ref[...], adj_bias, eye_t, head_ones, head_mask,
                        heads=heads, apply_relu=True)
        # TODO(synk): F.dropout(p=0.5, training=True) not reproduced; identity at inference.
        return _gat_layer(h1, w2_ref[...], a2s_ref[...], a2d_ref[...],
                          b2_ref[...], adj_bias, eye_t, head_ones, head_mask,
                          heads=heads, apply_relu=False)

    if cache_h:
        @pl.when(pl.program_id(0) == 0)
        def _():
            h_scratch[...] = compute_h()
        h = h_scratch[...]
    else:
        h = compute_h()

    # Linear tile: bf16 operands on the MXU (int8 wl is dequantized by a cast; the
    # per-column scale is applied once on the f32 accumulator), one lane-dense store.
    wl = wl_ref[...].astype(jnp.bfloat16)
    acc = jnp.dot(h.astype(jnp.bfloat16), wl, preferred_element_type=jnp.float32)
    if int8_wl:
        acc = acc * wscale_ref[...]
    o_ref[...] = (acc + bl_ref[...]).astype(o_ref.dtype)


# ---------------------------------------------------------------------------
# Host-side preparation (runs once) + fused forward wrapper (single pallas_call)
# ---------------------------------------------------------------------------
def _expand_att(a, n):
    """[H, C] attention vector -> [H*C, H*n] block matrix M with
    M[hd*C + c, hd*n + j] = a[hd, c] (zero off the head-diagonal blocks)."""
    heads, c = a.shape
    row_head = jnp.repeat(jnp.arange(heads), c)
    col_head = jnp.repeat(jnp.arange(heads), n)
    mask = (row_head[:, None] == col_head[None, :]).astype(a.dtype)
    return mask * a.reshape(heads * c)[:, None]


def prepare_gat(params, adj, *, wl_dtype="bf16", d_pad=4352):
    """One-time preprocessing so the hot path is a single pallas_call.

    wl_dtype: "bf16" (v7x — no int8 MXU path) or "int8" (v5e/v6e — halves the
    dominant HBM stream; per-output-column max-abs scales, f32 accumulation).
    """
    heads, out_ch = params["heads"], params["out_ch"]
    n = adj.shape[0]
    hc = heads * out_ch
    hn = heads * n

    adj_t = jnp.tile(adj, (1, heads))                                    # [N, H*N]
    adj_bias = jnp.where(adj_t > 0, 0.0, -1e30).astype(jnp.float32)      # additive mask
    eye_t = jnp.tile(jnp.eye(n, dtype=jnp.float32), (1, heads))          # [N, H*N]
    idx_n = jnp.arange(hn) // n
    head_ones = (idx_n[:, None] == idx_n[None, :]).astype(jnp.float32)   # [H*N, H*N]
    idx_c = jnp.arange(hc) // out_ch
    head_mask = (idx_n[:, None] == idx_c[None, :]).astype(jnp.float32)   # [H*N, H*C]

    # Pad the Linear to d_pad (= 34*128 = 17*256) columns; padded columns stay exactly 0.
    wl_f32 = params["wl"]
    d_out = wl_f32.shape[1]
    assert d_pad >= d_out and d_pad % 128 == 0
    wl_p = jnp.zeros((hc, d_pad), jnp.float32).at[:, :d_out].set(wl_f32)
    bl_p = jnp.zeros((1, d_pad), jnp.float32).at[:, :d_out].set(
        params["bl"].reshape(1, d_out))

    if wl_dtype == "int8":
        scale = jnp.max(jnp.abs(wl_p), axis=0, keepdims=True) / 127.0    # [1, d_pad]
        scale = jnp.where(scale == 0.0, 1.0, scale)                      # padded cols
        wl_q = jnp.clip(jnp.round(wl_p / scale), -127, 127).astype(jnp.int8)
        wscale = scale.astype(jnp.float32)
        int8_wl = True
    else:
        wl_q = wl_p.astype(jnp.bfloat16)
        wscale = jnp.ones((1, d_pad), jnp.float32)
        int8_wl = False

    return {
        "heads": heads, "out_ch": out_ch, "n": n, "d_pad": d_pad, "d_out": d_out,
        "int8_wl": int8_wl,
        "adj_bias": adj_bias, "eye_t": eye_t,
        "head_ones": head_ones, "head_mask": head_mask,
        "w1": params["w1"], "b1": params["b1"],
        "w2": params["w2"], "b2": params["b2"],
        "a1s": _expand_att(params["a_src1"], n),
        "a1d": _expand_att(params["a_dst1"], n),
        "a2s": _expand_att(params["a_src2"], n),
        "a2d": _expand_att(params["a_dst2"], n),
        "wl": wl_q, "wscale": wscale, "bl": bl_p,
    }


def gat_forward(x, prep, *, col_tile=2176, megacore=False, out_dtype=jnp.float32):
    """Fused forward: conv1 + ReLU + (dropout=identity) + conv2 + Linear.

    Returns the lane-padded [N, d_pad] result (d_pad = 4352 = 34*128). The logical
    output is out[:, :4223]; the padded tail is exactly zero because the padded
    wl/bl columns are zero. Returning padded avoids a post-kernel slice/copy.
    out_dtype=jnp.bfloat16 is available if the consumer tolerates it (cuts the
    output HBM stream in half); default f32 preserves the PyTorch semantics.
    """
    n, fin = x.shape
    heads, out_ch = prep["heads"], prep["out_ch"]
    hc = heads * out_ch
    hn = heads * n
    d_pad = prep["d_pad"]
    assert d_pad % col_tile == 0 and col_tile % 128 == 0
    num_tiles = d_pad // col_tile

    cache_h = not megacore
    sem = ("parallel",) if megacore else ("arbitrary",)

    const = lambda shape: pl.BlockSpec(shape, lambda j: (0, 0))   # loaded once, reused
    col = lambda shape: pl.BlockSpec(shape, lambda j: (0, j))     # pipelined over tiles

    kernel = functools.partial(fused_gat_kernel, heads=heads,
                               cache_h=cache_h, int8_wl=prep["int8_wl"])

    return pl.pallas_call(
        kernel,
        out_shape=jax.ShapeDtypeStruct((n, d_pad), out_dtype),
        grid_spec=pltpu.PrefetchScalarGridSpec(
            num_scalar_prefetch=0,
            grid=(num_tiles,),
            in_specs=[
                const((n, fin)),        # x
                const((n, hn)),         # adj_bias (additive mask)
                const((n, hn)),         # eye_t
                const((hn, hn)),        # head_ones
                const((hn, hc)),        # head_mask (aggregation block mask)
                const((fin, hc)),       # w1
                const((hc, hn)),        # a1 src expand
                const((hc, hn)),        # a1 dst expand
                const((1, hc)),         # b1
                const((hc, hc)),        # w2
                const((hc, hn)),        # a2 src expand
                const((hc, hn)),        # a2 dst expand
                const((1, hc)),         # b2
                col((hc, col_tile)),    # wl (bf16 or int8) — DMA pipelined across tiles
                col((1, col_tile)),     # per-column dequant scale (ones if bf16)
                col((1, col_tile)),     # bl
            ],
            out_specs=col((n, col_tile)),
            scratch_shapes=[pltpu.VMEM((n, hc), jnp.float32)],   # cached h (single-TC path)
        ),
        compiler_params=pltpu.CompilerParams(dimension_semantics=sem),
    )(x, prep["adj_bias"], prep["eye_t"], prep["head_ones"], prep["head_mask"],
      prep["w1"], prep["a1s"], prep["a1d"], prep["b1"],
      prep["w2"], prep["a2s"], prep["a2d"], prep["b2"],
      prep["wl"], prep["wscale"], prep["bl"])


# ---------------------------------------------------------------------------
# Pure-JAX f32 reference (same math, unfused, no low-precision tricks)
# ---------------------------------------------------------------------------
def reference_forward(x, adj, params):
    hi = jax.lax.Precision.HIGHEST

    def conv(xin, w, a_src, a_dst, b):
        n = xin.shape[0]
        heads, c = a_src.shape
        h = jnp.dot(xin, w, precision=hi)                        # [N, H*C]
        h3 = h.reshape(n, heads, c)
        asrc = jnp.einsum("nhc,hc->nh", h3, a_src, precision=hi)
        adst = jnp.einsum("nhc,hc->nh", h3, a_dst, precision=hi)
        e = adst[:, None, :] + asrc[None, :, :]                  # [i, j, h]
        e = jnp.where(e > 0, e, 0.2 * e)
        mask = (adj > 0)[:, :, None]
        e = jnp.where(mask, e, -jnp.inf)
        alpha = jax.nn.softmax(e, axis=1)
        out = jnp.einsum("ijh,jhc->ihc", alpha, h3, precision=hi).reshape(n, heads * c)
        return out + b

    h = jax.nn.relu(conv(x, params["w1"], params["a_src1"], params["a_dst1"], params["b1"]))
    h = conv(h, params["w2"], params["a_src2"], params["a_dst2"], params["b2"])
    return jnp.dot(h, params["wl"], precision=hi) + params["bl"].reshape(1, -1)


if __name__ == "__main__":
    key = jax.random.PRNGKey(0)
    ks = jax.random.split(key, 12)

    # Small synthetic road-network graph.
    N = 32
    in_ch, out_ch, heads = 16, 32, 4        # heads*out_ch = 128 (matches Linear(128, 4223))
    d_out, d_pad = 4223, 4352               # 4352 = 34*128 = 17*256 (even 2-tile split)

    x = jax.random.normal(ks[0], (N, in_ch), jnp.float32)

    # Dense adjacency adj[i, j] = 1 iff edge j -> i, with self-loops added.
    adj = (jax.random.uniform(ks[1], (N, N)) < 0.2).astype(jnp.float32)
    adj = jnp.maximum(adj, jnp.eye(N, dtype=jnp.float32))

    params = dict(
        heads=heads, out_ch=out_ch,
        # GATConv 1: in_ch -> out_ch per head
        w1=jax.random.normal(ks[2], (in_ch, heads * out_ch), jnp.float32) * 0.1,
        a_src1=jax.random.normal(ks[3], (heads, out_ch), jnp.float32) * 0.1,
        a_dst1=jax.random.normal(ks[4], (heads, out_ch), jnp.float32) * 0.1,
        b1=jax.random.normal(ks[5], (1, heads * out_ch), jnp.float32) * 0.01,
        # GATConv 2: heads*out_ch -> out_ch per head
        w2=jax.random.normal(ks[6], (heads * out_ch, heads * out_ch), jnp.float32) * 0.05,
        a_src2=jax.random.normal(ks[7], (heads, out_ch), jnp.float32) * 0.1,
        a_dst2=jax.random.normal(ks[8], (heads, out_ch), jnp.float32) * 0.1,
        b2=jax.random.normal(ks[9], (1, heads * out_ch), jnp.float32) * 0.01,
        # Linear(128, 4223): unpadded here; prepare_gat lane-pads to d_pad.
        wl=jax.random.normal(ks[10], (heads * out_ch, d_out), jnp.float32) * 0.05,
        bl=jax.random.normal(ks[11], (d_out,), jnp.float32) * 0.01,
    )

    # Per-generation config: v7x -> parallel megacore split + bf16 wl;
    # v5e/v6e (single TC) -> arbitrary grid + cached-h scratch + int8 wl.
    try:
        kind = jax.devices()[0].device_kind.lower()
    except Exception:
        kind = ""
    is_v7 = "7" in kind

    prep = prepare_gat(params, adj,
                       wl_dtype=("bf16" if is_v7 else "int8"), d_pad=d_pad)
    out = jax.block_until_ready(gat_forward(x, prep, col_tile=2176, megacore=is_v7))

    assert out.shape == (N, d_pad) and out.dtype == jnp.float32
    # Padded tail columns come from zero weights/bias -> exactly zero.
    assert bool(jnp.all(out[:, d_out:] == 0.0))
    # Correctness check vs. an unmodified pure-f32 reference of the same forward pass.
    ref = reference_forward(x, adj, params)
    max_err = float(jnp.max(jnp.abs(out[:, :d_out] - ref)))
    assert bool(jnp.allclose(out[:, :d_out], ref, atol=1e-2, rtol=5e-2)), max_err
    print("KERNEL_OK")
</pallas_src>

<mosaic_0001>
module attributes {stable_mosaic.version = 11 : i64} {
  func.func @fused_gat_kernel(%arg0: i32, %arg1: memref<32x16xf32, #tpu.memory_space<vmem>>, %arg2: memref<32x128xf32, #tpu.memory_space<vmem>>, %arg3: memref<32x128xf32, #tpu.memory_space<vmem>>, %arg4: memref<128x128xf32, #tpu.memory_space<vmem>>, %arg5: memref<128x128xf32, #tpu.memory_space<vmem>>, %arg6: memref<16x128xf32, #tpu.memory_space<vmem>>, %arg7: memref<128x128xf32, #tpu.memory_space<vmem>>, %arg8: memref<128x128xf32, #tpu.memory_space<vmem>>, %arg9: memref<1x128xf32, #tpu.memory_space<vmem>>, %arg10: memref<128x128xf32, #tpu.memory_space<vmem>>, %arg11: memref<128x128xf32, #tpu.memory_space<vmem>>, %arg12: memref<128x128xf32, #tpu.memory_space<vmem>>, %arg13: memref<1x128xf32, #tpu.memory_space<vmem>>, %arg14: memref<128x2176xi8, #tpu.memory_space<vmem>>, %arg15: memref<1x2176xf32, #tpu.memory_space<vmem>>, %arg16: memref<1x2176xf32, #tpu.memory_space<vmem>>, %arg17: memref<32x2176xf32, #tpu.memory_space<vmem>>, %arg18: memref<32x128xf32, #tpu.memory_space<vmem>>) attributes {dimension_semantics = [#tpu.dimension_semantics<arbitrary>], iteration_bounds = array<i64: 2>, scalar_prefetch = 0 : i64, scratch_operands = 1 : i64, tpu.core_type = #tpu.core_type<tc>, window_params = [{pipeline_mode = #tpu.pipeline_mode<synchronous>, transform_indices = @transform_0, window_bounds = array<i64: 32, 16>}, {pipeline_mode = #tpu.pipeline_mode<synchronous>, transform_indices = @transform_1, window_bounds = array<i64: 32, 128>}, {pipeline_mode = #tpu.pipeline_mode<synchronous>, transform_indices = @transform_2, window_bounds = array<i64: 32, 128>}, {pipeline_mode = #tpu.pipeline_mode<synchronous>, transform_indices = @transform_3, window_bounds = array<i64: 128, 128>}, {pipeline_mode = #tpu.pipeline_mode<synchronous>, transform_indices = @transform_4, window_bounds = array<i64: 128, 128>}, {pipeline_mode = #tpu.pipeline_mode<synchronous>, transform_indices = @transform_5, window_bounds = array<i64: 16, 128>}, {pipeline_mode = #tpu.pipeline_mode<synchronous>, transform_indices = @transform_6, window_bounds = array<i64: 128, 128>}, {pipeline_mode = #tpu.pipeline_mode<synchronous>, transform_indices = @transform_7, window_bounds = array<i64: 128, 128>}, {pipeline_mode = #tpu.pipeline_mode<synchronous>, transform_indices = @transform_8, window_bounds = array<i64: 1, 128>}, {pipeline_mode = #tpu.pipeline_mode<synchronous>, transform_indices = @transform_9, window_bounds = array<i64: 128, 128>}, {pipeline_mode = #tpu.pipeline_mode<synchronous>, transform_indices = @transform_10, window_bounds = array<i64: 128, 128>}, {pipeline_mode = #tpu.pipeline_mode<synchronous>, transform_indices = @transform_11, window_bounds = array<i64: 128, 128>}, {pipeline_mode = #tpu.pipeline_mode<synchronous>, transform_indices = @transform_12, window_bounds = array<i64: 1, 128>}, {transform_indices = @transform_13, window_bounds = array<i64: 128, 2176>}, {transform_indices = @transform_14, window_bounds = array<i64: 1, 2176>}, {transform_indices = @transform_15, window_bounds = array<i64: 1, 2176>}, {transform_indices = @transform_16, window_bounds = array<i64: 32, 2176>}]} {
    %c0_i32 = arith.constant 0 : i32
    %0 = arith.cmpi eq, %arg0, %c0_i32 : i32
    %1 = arith.extui %0 : i1 to i32
    %c0_i32_0 = arith.constant 0 : i32
    %2 = arith.cmpi ne, %1, %c0_i32_0 : i32
    scf.if %2 {
      %c0_10 = arith.constant 0 : index
      %c0_11 = arith.constant 0 : index
      %15 = vector.load %arg2[%c0_10, %c0_11] : memref<32x128xf32, #tpu.memory_space<vmem>>, vector<32x128xf32>
      %c0_12 = arith.constant 0 : index
      %c0_13 = arith.constant 0 : index
      %16 = vector.load %arg3[%c0_12, %c0_13] : memref<32x128xf32, #tpu.memory_space<vmem>>, vector<32x128xf32>
      %c0_14 = arith.constant 0 : index
      %c0_15 = arith.constant 0 : index
      %17 = vector.load %arg4[%c0_14, %c0_15] : memref<128x128xf32, #tpu.memory_space<vmem>>, vector<128x128xf32>
      %c0_16 = arith.constant 0 : index
      %c0_17 = arith.constant 0 : index
      %18 = vector.load %arg5[%c0_16, %c0_17] : memref<128x128xf32, #tpu.memory_space<vmem>>, vector<128x128xf32>
      %c0_18 = arith.constant 0 : index
      %c0_19 = arith.constant 0 : index
      %19 = vector.load %arg1[%c0_18, %c0_19] : memref<32x16xf32, #tpu.memory_space<vmem>>, vector<32x16xf32>
      %c0_20 = arith.constant 0 : index
      %c0_21 = arith.constant 0 : index
      %20 = vector.load %arg6[%c0_20, %c0_21] : memref<16x128xf32, #tpu.memory_space<vmem>>, vector<16x128xf32>
      %c0_22 = arith.constant 0 : index
      %c0_23 = arith.constant 0 : index
      %21 = vector.load %arg7[%c0_22, %c0_23] : memref<128x128xf32, #tpu.memory_space<vmem>>, vector<128x128xf32>
      %c0_24 = arith.constant 0 : index
      %c0_25 = arith.constant 0 : index
      %22 = vector.load %arg8[%c0_24, %c0_25] : memref<128x128xf32, #tpu.memory_space<vmem>>, vector<128x128xf32>
      %c0_26 = arith.constant 0 : index
      %c0_27 = arith.constant 0 : index
      %23 = vector.load %arg9[%c0_26, %c0_27] : memref<1x128xf32, #tpu.memory_space<vmem>>, vector<1x128xf32>
      %cst_28 = arith.constant dense<0.000000e+00> : vector<32x128xf32>
      %24 = tpu.matmul %19, %20, %cst_28 {dimension_numbers = #tpu.dot_dimension_numbers<[1], [0], [0], [1], [0, 0, 1, 1], [], []>} : vector<32x16xf32>, vector<16x128xf32>, vector<32x128xf32> -> vector<32x128xf32>
      %cst_29 = arith.constant dense<0.000000e+00> : vector<32x128xf32>
      %25 = tpu.matmul %24, %22, %cst_29 {dimension_numbers = #tpu.dot_dimension_numbers<[1], [0], [0], [1], [0, 0, 1, 1], [], []>} : vector<32x128xf32>, vector<128x128xf32>, vector<32x128xf32> -> vector<32x128xf32>
      %cst_30 = arith.constant dense<0.000000e+00> : vector<32x128xf32>
      %26 = tpu.matmul %24, %21, %cst_30 {dimension_numbers = #tpu.dot_dimension_numbers<[1], [0], [0], [1], [0, 0, 1, 1], [], []>} : vector<32x128xf32>, vector<128x128xf32>, vector<32x128xf32> -> vector<32x128xf32>
      %27 = arith.mulf %26, %16 : vector<32x128xf32>
      %cst_31 = arith.constant dense<0.000000e+00> : vector<128xf32>
      %28 = vector.multi_reduction <add>, %27, %cst_31 [0] : vector<32x128xf32> to vector<128xf32>
      %29 = vector.shape_cast %28 : vector<128xf32> to vector<1x128xf32>
      %30 = vector.broadcast %29 : vector<1x128xf32> to vector<32x128xf32>
      %31 = arith.addf %25, %30 : vector<32x128xf32>
      %cst_32 = arith.constant 0.000000e+00 : f32
      %32 = vector.broadcast %cst_32 : f32 to vector<32x128xf32>
      %33 = arith.cmpf ogt, %31, %32 : vector<32x128xf32>
      %cst_33 = arith.constant 2.000000e-01 : f32
      %34 = vector.broadcast %cst_33 : f32 to vector<32x128xf32>
      %35 = arith.mulf %34, %31 : vector<32x128xf32>
      %36 = arith.select %33, %31, %35 : vector<32x128xi1>, vector<32x128xf32>
      %37 = arith.addf %36, %15 : vector<32x128xf32>
      %cst_34 = arith.constant dense<0xFF800000> : vector<32xf32>
      %38 = vector.multi_reduction <maximumf>, %37, %cst_34 [1] : vector<32x128xf32> to vector<32xf32>
      %39 = vector.shape_cast %38 : vector<32xf32> to vector<32x1xf32>
      %40 = vector.broadcast %39 : vector<32x1xf32> to vector<32x128xf32>
      %41 = arith.subf %37, %40 : vector<32x128xf32>
      %42 = math.exp %41 : vector<32x128xf32>
      %cst_35 = arith.constant dense<0.000000e+00> : vector<32x128xf32>
      %43 = tpu.matmul %42, %17, %cst_35 {dimension_numbers = #tpu.dot_dimension_numbers<[1], [0], [0], [1], [0, 0, 1, 1], [], []>} : vector<32x128xf32>, vector<128x128xf32>, vector<32x128xf32> -> vector<32x128xf32>
      %44 = tpu.reciprocal %43 {approx = true} : vector<32x128xf32> -> vector<32x128xf32>
      %45 = arith.mulf %42, %44 : vector<32x128xf32>
      %46 = tpu.concatenate %24, %24, %24, %24 in 0 : vector<32x128xf32>, vector<32x128xf32>, vector<32x128xf32>, vector<32x128xf32> -> vector<128x128xf32>
      %47 = arith.mulf %46, %18 : vector<128x128xf32>
      %cst_36 = arith.constant dense<0.000000e+00> : vector<32x128xf32>
      %48 = tpu.matmul %45, %47, %cst_36 {dimension_numbers = #tpu.dot_dimension_numbers<[1], [0], [0], [1], [0, 0, 1, 1], [], []>} : vector<32x128xf32>, vector<128x128xf32>, vector<32x128xf32> -> vector<32x128xf32>
      %49 = vector.broadcast %23 : vector<1x128xf32> to vector<32x128xf32>
      %50 = arith.addf %48, %49 : vector<32x128xf32>
      %cst_37 = arith.constant 0.000000e+00 : f32
      %51 = vector.broadcast %cst_37 : f32 to vector<32x128xf32>
      %52 = arith.maximumf %50, %51 : vector<32x128xf32>
      %c0_38 = arith.constant 0 : index
      %c0_39 = arith.constant 0 : index
      %53 = vector.load %arg10[%c0_38, %c0_39] : memref<128x128xf32, #tpu.memory_space<vmem>>, vector<128x128xf32>
      %c0_40 = arith.constant 0 : index
      %c0_41 = arith.constant 0 : index
      %54 = vector.load %arg11[%c0_40, %c0_41] : memref<128x128xf32, #tpu.memory_space<vmem>>, vector<128x128xf32>
      %c0_42 = arith.constant 0 : index
      %c0_43 = arith.constant 0 : index
      %55 = vector.load %arg12[%c0_42, %c0_43] : memref<128x128xf32, #tpu.memory_space<vmem>>, vector<128x128xf32>
      %c0_44 = arith.constant 0 : index
      %c0_45 = arith.constant 0 : index
      %56 = vector.load %arg13[%c0_44, %c0_45] : memref<1x128xf32, #tpu.memory_space<vmem>>, vector<1x128xf32>
      %cst_46 = arith.constant dense<0.000000e+00> : vector<32x128xf32>
      %57 = tpu.matmul %52, %53, %cst_46 {dimension_numbers = #tpu.dot_dimension_numbers<[1], [0], [0], [1], [0, 0, 1, 1], [], []>} : vector<32x128xf32>, vector<128x128xf32>, vector<32x128xf32> -> vector<32x128xf32>
      %cst_47 = arith.constant dense<0.000000e+00> : vector<32x128xf32>
      %58 = tpu.matmul %57, %55, %cst_47 {dimension_numbers = #tpu.dot_dimension_numbers<[1], [0], [0], [1], [0, 0, 1, 1], [], []>} : vector<32x128xf32>, vector<128x128xf32>, vector<32x128xf32> -> vector<32x128xf32>
      %cst_48 = arith.constant dense<0.000000e+00> : vector<32x128xf32>
      %59 = tpu.matmul %57, %54, %cst_48 {dimension_numbers = #tpu.dot_dimension_numbers<[1], [0], [0], [1], [0, 0, 1, 1], [], []>} : vector<32x128xf32>, vector<128x128xf32>, vector<32x128xf32> -> vector<32x128xf32>
      %60 = arith.mulf %59, %16 : vector<32x128xf32>
      %cst_49 = arith.constant dense<0.000000e+00> : vector<128xf32>
      %61 = vector.multi_reduction <add>, %60, %cst_49 [0] : vector<32x128xf32> to vector<128xf32>
      %62 = vector.shape_cast %61 : vector<128xf32> to vector<1x128xf32>
      %63 = vector.broadcast %62 : vector<1x128xf32> to vector<32x128xf32>
      %64 = arith.addf %58, %63 : vector<32x128xf32>
      %cst_50 = arith.constant 0.000000e+00 : f32
      %65 = vector.broadcast %cst_50 : f32 to vector<32x128xf32>
      %66 = arith.cmpf ogt, %64, %65 : vector<32x128xf32>
      %cst_51 = arith.constant 2.000000e-01 : f32
      %67 = vector.broadcast %cst_51 : f32 to vector<32x128xf32>
      %68 = arith.mulf %67, %64 : vector<32x128xf32>
      %69 = arith.select %66, %64, %68 : vector<32x128xi1>, vector<32x128xf32>
      %70 = arith.addf %69, %15 : vector<32x128xf32>
      %cst_52 = arith.constant dense<0xFF800000> : vector<32xf32>
      %71 = vector.multi_reduction <maximumf>, %70, %cst_52 [1] : vector<32x128xf32> to vector<32xf32>
      %72 = vector.shape_cast %71 : vector<32xf32> to vector<32x1xf32>
      %73 = vector.broadcast %72 : vector<32x1xf32> to vector<32x128xf32>
      %74 = arith.subf %70, %73 : vector<32x128xf32>
      %75 = math.exp %74 : vector<32x128xf32>
      %cst_53 = arith.constant dense<0.000000e+00> : vector<32x128xf32>
      %76 = tpu.matmul %75, %17, %cst_53 {dimension_numbers = #tpu.dot_dimension_numbers<[1], [0], [0], [1], [0, 0, 1, 1], [], []>} : vector<32x128xf32>, vector<128x128xf32>, vector<32x128xf32> -> vector<32x128xf32>
      %77 = tpu.reciprocal %76 {approx = true} : vector<32x128xf32> -> vector<32x128xf32>
      %78 = arith.mulf %75, %77 : vector<32x128xf32>
      %79 = tpu.concatenate %57, %57, %57, %57 in 0 : vector<32x128xf32>, vector<32x128xf32>, vector<32x128xf32>, vector<32x128xf32> -> vector<128x128xf32>
      %80 = arith.mulf %79, %18 : vector<128x128xf32>
      %cst_54 = arith.constant dense<0.000000e+00> : vector<32x128xf32>
      %81 = tpu.matmul %78, %80, %cst_54 {dimension_numbers = #tpu.dot_dimension_numbers<[1], [0], [0], [1], [0, 0, 1, 1], [], []>} : vector<32x128xf32>, vector<128x128xf32>, vector<32x128xf32> -> vector<32x128xf32>
      %82 = vector.broadcast %56 : vector<1x128xf32> to vector<32x128xf32>
      %83 = arith.addf %81, %82 : vector<32x128xf32>
      %c0_55 = arith.constant 0 : index
      %c0_56 = arith.constant 0 : index
      %84 = vector.load %arg18[%c0_55, %c0_56] : memref<32x128xf32, #tpu.memory_space<vmem>>, vector<32x128xf32>
      tpu.vector_store %arg18[%c0_55, %c0_56], %83 {strides = array<i32>} : memref<32x128xf32, #tpu.memory_space<vmem>>, vector<32x128xf32>,
    } else {
    }
    %c0 = arith.constant 0 : index
    %c0_1 = arith.constant 0 : index
    %3 = vector.load %arg18[%c0, %c0_1] : memref<32x128xf32, #tpu.memory_space<vmem>>, vector<32x128xf32>
    %c0_2 = arith.constant 0 : index
    %c0_3 = arith.constant 0 : index
    %4 = vector.load %arg14[%c0_2, %c0_3] : memref<128x2176xi8, #tpu.memory_space<vmem>>, vector<128x2176xi8>
    %5 = arith.sitofp %4 : vector<128x2176xi8> to vector<128x2176xbf16>
    %6 = arith.truncf %3 : vector<32x128xf32> to vector<32x128xbf16>
    %cst = arith.constant dense<0.000000e+00> : vector<32x2176xf32>
    %7 = tpu.matmul %6, %5, %cst {dimension_numbers = #tpu.dot_dimension_numbers<[1], [0], [0], [1], [0, 0, 1, 1], [], []>} : vector<32x128xbf16>, vector<128x2176xbf16>, vector<32x2176xf32> -> vector<32x2176xf32>
    %c0_4 = arith.constant 0 : index
    %c0_5 = arith.constant 0 : index
    %8 = vector.load %arg15[%c0_4, %c0_5] : memref<1x2176xf32, #tpu.memory_space<vmem>>, vector<1x2176xf32>
    %9 = vector.broadcast %8 : vector<1x2176xf32> to vector<32x2176xf32>
    %10 = arith.mulf %7, %9 : vector<32x2176xf32>
    %c0_6 = arith.constant 0 : index
    %c0_7 = arith.constant 0 : index
    %11 = vector.load %arg16[%c0_6, %c0_7] : memref<1x2176xf32, #tpu.memory_space<vmem>>, vector<1x2176xf32>
    %12 = vector.broadcast %11 : vector<1x2176xf32> to vector<32x2176xf32>
    %13 = arith.addf %10, %12 : vector<32x2176xf32>
    %c0_8 = arith.constant 0 : index
    %c0_9 = arith.constant 0 : index
    %14 = vector.load %arg17[%c0_8, %c0_9] : memref<32x2176xf32, #tpu.memory_space<vmem>>, vector<32x2176xf32>
    tpu.vector_store %arg17[%c0_8, %c0_9], %13 {strides = array<i32>} : memref<32x2176xf32, #tpu.memory_space<vmem>>, vector<32x2176xf32>,
    return
  }
  func.func @transform_0(%arg0: i32) -> (i32, i32) {
    %c0_i32 = arith.constant 0 : i32
    %c0_i32_0 = arith.constant 0 : i32
    %c0_i32_1 = arith.constant 0 : i32
    return %c0_i32, %c0_i32_0 : i32, i32
  }
  func.func @transform_1(%arg0: i32) -> (i32, i32) {
    %c0_i32 = arith.constant 0 : i32
    %c0_i32_0 = arith.constant 0 : i32
    %c0_i32_1 = arith.constant 0 : i32
    return %c0_i32, %c0_i32_0 : i32, i32
  }
  func.func @transform_2(%arg0: i32) -> (i32, i32) {
    %c0_i32 = arith.constant 0 : i32
    %c0_i32_0 = arith.constant 0 : i32
    %c0_i32_1 = arith.constant 0 : i32
    return %c0_i32, %c0_i32_0 : i32, i32
  }
  func.func @transform_3(%arg0: i32) -> (i32, i32) {
    %c0_i32 = arith.constant 0 : i32
    %c0_i32_0 = arith.constant 0 : i32
    %c0_i32_1 = arith.constant 0 : i32
    return %c0_i32, %c0_i32_0 : i32, i32
  }
  func.func @transform_4(%arg0: i32) -> (i32, i32) {
    %c0_i32 = arith.constant 0 : i32
    %c0_i32_0 = arith.constant 0 : i32
    %c0_i32_1 = arith.constant 0 : i32
    return %c0_i32, %c0_i32_0 : i32, i32
  }
  func.func @transform_5(%arg0: i32) -> (i32, i32) {
    %c0_i32 = arith.constant 0 : i32
    %c0_i32_0 = arith.constant 0 : i32
    %c0_i32_1 = arith.constant 0 : i32
    return %c0_i32, %c0_i32_0 : i32, i32
  }
  func.func @transform_6(%arg0: i32) -> (i32, i32) {
    %c0_i32 = arith.constant 0 : i32
    %c0_i32_0 = arith.constant 0 : i32
    %c0_i32_1 = arith.constant 0 : i32
    return %c0_i32, %c0_i32_0 : i32, i32
  }
  func.func @transform_7(%arg0: i32) -> (i32, i32) {
    %c0_i32 = arith.constant 0 : i32
    %c0_i32_0 = arith.constant 0 : i32
    %c0_i32_1 = arith.constant 0 : i32
    return %c0_i32, %c0_i32_0 : i32, i32
  }
  func.func @transform_8(%arg0: i32) -> (i32, i32) {
    %c0_i32 = arith.constant 0 : i32
    %c0_i32_0 = arith.constant 0 : i32
    %c0_i32_1 = arith.constant 0 : i32
    return %c0_i32, %c0_i32_0 : i32, i32
  }
  func.func @transform_9(%arg0: i32) -> (i32, i32) {
    %c0_i32 = arith.constant 0 : i32
    %c0_i32_0 = arith.constant 0 : i32
    %c0_i32_1 = arith.constant 0 : i32
    return %c0_i32, %c0_i32_0 : i32, i32
  }
  func.func @transform_10(%arg0: i32) -> (i32, i32) {
    %c0_i32 = arith.constant 0 : i32
    %c0_i32_0 = arith.constant 0 : i32
    %c0_i32_1 = arith.constant 0 : i32
    return %c0_i32, %c0_i32_0 : i32, i32
  }
  func.func @transform_11(%arg0: i32) -> (i32, i32) {
    %c0_i32 = arith.constant 0 : i32
    %c0_i32_0 = arith.constant 0 : i32
    %c0_i32_1 = arith.constant 0 : i32
    return %c0_i32, %c0_i32_0 : i32, i32
  }
  func.func @transform_12(%arg0: i32) -> (i32, i32) {
    %c0_i32 = arith.constant 0 : i32
    %c0_i32_0 = arith.constant 0 : i32
    %c0_i32_1 = arith.constant 0 : i32
    return %c0_i32, %c0_i32_0 : i32, i32
  }
  func.func @transform_13(%arg0: i32) -> (i32, i32) {
    %c0_i32 = arith.constant 0 : i32
    %c0_i32_0 = arith.constant 0 : i32
    return %c0_i32, %arg0 : i32, i32
  }
  func.func @transform_14(%arg0: i32) -> (i32, i32) {
    %c0_i32 = arith.constant 0 : i32
    %c0_i32_0 = arith.constant 0 : i32
    return %c0_i32, %arg0 : i32, i32
  }
  func.func @transform_15(%arg0: i32) -> (i32, i32) {
    %c0_i32 = arith.constant 0 : i32
    %c0_i32_0 = arith.constant 0 : i32
    return %c0_i32, %arg0 : i32, i32
  }
  func.func @transform_16(%arg0: i32) -> (i32, i32) {
    %c0_i32 = arith.constant 0 : i32
    %c0_i32_0 = arith.constant 0 : i32
    return %c0_i32, %arg0 : i32, i32
  }
}

</mosaic_0001>

<bundles_post_ra>
// kernel: tpu_custom_call.1
= control target key start
LH: loop header
LB: loop body
LE: loop exit
PB: predicated region body
PF: predicated region fallthrough
CT: control target
= control target key end

     0   :  { %s5649_s0 = inlined_call_operand.vmem [shape: f32[32,16], index: 0, kind: input, shape index: {}]   ;;  %s5650_s1 = inlined_call_operand.hbm [shape: f32[32,128], index: 1, kind: input, shape index: {}]   ;;  %s5651_s2 = inlined_call_operand.hbm [shape: f32[32,128], index: 2, kind: input, shape index: {}]   ;;  %s5652_s3 = inlined_call_operand.hbm [shape: f32[128,128], index: 3, kind: input, shape index: {}]   ;;  %s5653_s4 = inlined_call_operand.hbm [shape: f32[128,128], index: 4, kind: input, shape index: {}]   ;;  %s5654_s5 = inlined_call_operand.hbm [shape: f32[16,128], index: 5, kind: input, shape index: {}]   ;;  %s5655_s6 = inlined_call_operand.hbm [shape: f32[128,128], index: 6, kind: input, shape index: {}]   ;;  %s5656_s7 = inlined_call_operand.hbm [shape: f32[128,128], index: 7, kind: input, shape index: {}]   ;;  %s5657_s8 = inlined_call_operand.vmem [shape: f32[1,128], index: 8, kind: input, shape index: {}]   ;;  %s5658_s9 = inlined_call_operand.hbm [shape: f32[128,128], index: 9, kind: input, shape index: {}]   ;;  %s5659_s10 = inlined_call_operand.hbm [shape: f32[128,128], index: 10, kind: input, shape index: {}]   ;;  %s5660_s11 = inlined_call_operand.hbm [shape: f32[128,128], index: 11, kind: input, shape index: {}]   ;;  %s5661_s12 = inlined_call_operand.vmem [shape: f32[1,128], index: 12, kind: input, shape index: {}]   ;;  %s5662_s13 = inlined_call_operand.hbm [shape: s8[128,4352], index: 13, kind: input, shape index: {}]   ;;  %s5663_s14 = inlined_call_operand.vmem [shape: f32[1,4352], index: 14, kind: input, shape index: {}]   ;;  %s5664_s15 = inlined_call_operand.vmem [shape: f32[1,4352], index: 15, kind: input, shape index: {}]   ;;  %s5665_s16 = inlined_call_operand.hbm [shape: f32[32,4352], index: 16, kind: output, shape index: {}]  }
   0x1   :  { %5674 = sst [smem:[#allocation31_spill]] %s5649_s0 }
   0x2   :  { %5675 = sst [smem:[#allocation32_spill]] %s5650_s1 }
   0x3   :  { %5676 = sst [smem:[#allocation33_spill]] %s5651_s2 }
   0x4   :  { %5677 = sst [smem:[#allocation34_spill]] %s5652_s3 }
   0x5   :  { %5678 = sst [smem:[#allocation35_spill]] %s5653_s4 }
   0x6   :  { %5679 = sst [smem:[#allocation36_spill]] %s5657_s8 }
   0x7   :  { %5680 = sst [smem:[#allocation37_spill]] %s5661_s12 }
   0x8   :  { %5681 = sst [smem:[#allocation38_spill]] %s5662_s13 }
   0x9   :  { %5682 = sst [smem:[#allocation39_spill]] %s5663_s14 }
   0xa   :  { %5683 = sst [smem:[#allocation40_spill]] %s5664_s15 }
   0xb   :  { %5684 = sst [smem:[#allocation41_spill]] %s5665_s16 }
   0xc   :  { %21 = vsyncpa [#allocation4], 0 }
   0xd   :  { %22 = vsyncpa [#allocation7], 0 }
   0xe   :  { %23 = vsyncpa [#allocation10], 0 }
   0xf   :  { %24 = vsyncpa [#allocation13], 0 }
  0x10   :  { %25 = vsyncpa [#allocation16], 0 }
  0x11   :  { %26 = vsyncpa [#allocation19], 0 }
  0x12   :  { %27 = vsyncpa [#allocation5], 0 }
  0x13   :  { %29 = vsyncpa [#allocation5 + $0x1], 0  ;;  %s4751_s21 = smov 0   ;;  %s4753_s22 = smov 0  }
  0x14   :  { %s4755_s23 = smov 0   ;;  %s4757_s24 = smov 0  }
  0x15 LB: > { %s4645_s25 = smov [#allocation3]   ;;  %s4772_s27 = sadd.s32 4294967295, %s4643_s24   ;;  %s4643_s24 = sphi %s4757_s24, %s5727_s24   ;;  %s4639_s23 = sphi %s4755_s23, %s5726_s23   ;;  %s4635_s22 = sphi %s4753_s22, %s5725_s22   ;;  %s4631_s21 = sphi %s4751_s21, %s5724_s21  }
  0x16   : > { %s432_s26 = sshll.u32 %s4645_s25, 4  ;;  %p3155_p0 = scmp.ge.s32.totalorder %s4643_s24, 1  ;;  %s4778_s26 = int_to_ptr.vmem [resolvable:$true] %s432_s26 }
  0x17   : > { %p5670_p1 = scmp.eq.s32.totalorder %s4772_s27, 0  ;;  %p417_p2 = scmp.lt.s32.totalorder %s4643_s24, 3 }
  0x18   : > { %s4646_s29 = smov [#allocation6]   ;;  %s4647_s17 = smov [#allocation9]  }
  0x19   : > { %p4780_p4 = pnand %p3155_p0, %p417_p2  ;;  %s445_s30 = sshll.u32 %s4646_s29, 4  ;;  %s4793_s30 = int_to_ptr.vmem [resolvable:$true] %s445_s30 }
  0x1a   : > { %s471_s18 = sshll.u32 %s4647_s17, 4  ;;  %s5688_s1 = sld [smem:[#allocation32_spill]]  ;;  %s4795_s18 = int_to_ptr.vmem [resolvable:$true] %s471_s18 }
  0x1b   : > { %s5685_s28 = scalar_select %p4780_p4, 1, 0 }
  0x1c   : > { %p4099_p6 = pneg %p4780_p4 }
  0x1d   : > { %5686 = sst [smem:[#allocation30_spill]] %s5685_s28 }
  0x1e   : > { %p4789_p7 = pnand %p4099_p6, %p5670_p1 }
  0x20   : > { %s4243_s25 = scalar_lea.hbm %s5688_s1, 512  ;;  %p4805_p9 = pneg %p4789_p7 }
  0x21   : > { %p4244_p8 = scmp.ne.s32.totalorder %s5688_s1, %s4243_s25  ;;  %p4250_p12 = scmp.lt.u32.totalorder %s4243_s25, %s5688_s1 }
  0x23   : > { %p4246_p10 = pnand %p4805_p9, %p4244_p8 }
  0x25   : > { %p4247_p11 = pneg %p4246_p10 }
  0x27   : > { %p4252_p13 = pnand %p4250_p12, %p4247_p11 }
  0x29   : > { %4255 = shalt.err (!%p4252_p13)
}
  0x2a   : > { %s4256_s12 = scalar_lea.vmem %s4778_s26, 512  ;;  %p4264_p5 = scmp.lt.s32.totalorder %s4778_s26, %s4778_s26 }
  0x2b   : > { %p4257_p0 = scmp.ne.s32.totalorder %s4778_s26, %s4256_s12  ;;  %p4265_p3 = scmp.lt.s32.totalorder %s4256_s12, %s4256_s12 }
  0x2d   : > { %p4259_p2 = pnand %p4257_p0, %p4805_p9  ;;  %p4266_p8 = por %p4265_p3, %p4264_p5 }
  0x2f   : > { %p4260_p6 = pneg %p4259_p2 }
  0x31   : > { %p4267_p10 = pnand %p4266_p8, %p4260_p6 }
  0x33   : > { %4270 = shalt.err (!%p4267_p10)
}
  0x34   : > { %s4648_s16 = smov 128   ;;  %s4649_s8 = smov 8  }
  0x35   : > { %4102 = dma.hbm_to_vmem [thread:$0]  (!%p4789_p7), %s5688_s1, 512, %s4778_s26, [#allocation4], %s4648_s16, %s4648_s16, %s4649_s8  }
  0x36   : > { %s5690_s2 = sld [smem:[#allocation33_spill]] }
  0x3c   : > { %s4271_s12 = scalar_lea.hbm %s5690_s2, 512 }
  0x3d   : > { %p4272_p3 = scmp.ne.s32.totalorder %s5690_s2, %s4271_s12  ;;  %p4278_p12 = scmp.lt.u32.totalorder %s4271_s12, %s5690_s2 }
  0x3f   : > { %p4274_p5 = pnand %p4272_p3, %p4805_p9 }
  0x41   : > { %p4275_p11 = pneg %p4274_p5 }
  0x43   : > { %p4280_p13 = pnand %p4278_p12, %p4275_p11 }
  0x45   : > { %4283 = shalt.err (!%p4280_p13)
}
  0x46   : > { %s4284_s26 = scalar_lea.vmem %s4793_s30, 512  ;;  %p4292_p8 = scmp.lt.s32.totalorder %s4793_s30, %s4793_s30 }
  0x47   : > { %p4285_p0 = scmp.ne.s32.totalorder %s4793_s30, %s4284_s26  ;;  %p4293_p10 = scmp.lt.s32.totalorder %s4284_s26, %s4284_s26 }
  0x49   : > { %p4287_p2 = pnand %p4285_p0, %p4805_p9  ;;  %p4294_p3 = por %p4293_p10, %p4292_p8 }
  0x4b   : > { %p4288_p6 = pneg %p4287_p2 }
  0x4d   : > { %p4295_p5 = pnand %p4294_p3, %p4288_p6 }
  0x4f   : > { %4298 = shalt.err (!%p4295_p5)
}
  0x50   : > { %4105 = dma.hbm_to_vmem [thread:$0]  (!%p4789_p7), %s5690_s2, 512, %s4793_s30, [#allocation7], %s4648_s16, %s4648_s16, %s4649_s8  }
  0x51   : > { %s5691_s4 = sld [smem:[#allocation35_spill]] }
  0x57   : > { %s4299_s19 = scalar_lea.hbm %s5691_s4, 2048 }
  0x58   : > { %p4300_p11 = scmp.ne.s32.totalorder %s5691_s4, %s4299_s19  ;;  %p4306_p0 = scmp.lt.u32.totalorder %s4299_s19, %s5691_s4 }
  0x5a   : > { %p4302_p12 = pnand %p4300_p11, %p4805_p9 }
  0x5c   : > { %p4303_p13 = pneg %p4302_p12 }
  0x5e   : > { %p4308_p2 = pnand %p4306_p0, %p4303_p13 }
  0x60   : > { %4311 = shalt.err (!%p4308_p2)
}
  0x61   : > { %s4312_s30 = scalar_lea.vmem %s4795_s18, 2048  ;;  %p4320_p3 = scmp.lt.s32.totalorder %s4795_s18, %s4795_s18 }
  0x62   : > { %p4313_p6 = scmp.ne.s32.totalorder %s4795_s18, %s4312_s30  ;;  %p4321_p5 = scmp.lt.s32.totalorder %s4312_s30, %s4312_s30 }
  0x64   : > { %p4315_p8 = pnand %p4313_p6, %p4805_p9  ;;  %p4322_p11 = por %p4321_p5, %p4320_p3 }
  0x66   : > { %p4316_p10 = pneg %p4315_p8 }
  0x68   : > { %p4323_p12 = pnand %p4322_p11, %p4316_p10 }
  0x6a   : > { %4326 = shalt.err (!%p4323_p12)
}
  0x6b   : > { %4111 = dma.hbm_to_vmem [thread:$0]  (!%p4789_p7), %s5691_s4, 2048, %s4795_s18, [#allocation10], %s4648_s16, %s4648_s16, %s4649_s8  }
  0x6c   : > { %s4650_s14 = smov [#allocation12]   ;;  %s4651_s28 = smov [#allocation15]  }
  0x6d   : > { %s497_s15 = sshll.u32 %s4650_s14, 4  ;;  %s526_s19 = sshll.u32 %s4651_s28, 4  ;;  %s498_s15 = int_to_ptr.vmem [resolvable:$true] %s497_s15  ;;  %s527_s19 = int_to_ptr.vmem [resolvable:$true] %s526_s19 }
  0x6e   : > { %s4327_s17 = scalar_lea.hbm %s5655_s6, 2048 }
  0x6f   : > { %p4328_p13 = scmp.ne.s32.totalorder %s5655_s6, %s4327_s17  ;;  %p4334_p6 = scmp.lt.u32.totalorder %s4327_s17, %s5655_s6 }
  0x71   : > { %p4330_p0 = pnand %p4328_p13, %p4805_p9 }
  0x73   : > { %p4331_p2 = pneg %p4330_p0 }
  0x75   : > { %p4336_p8 = pnand %p4334_p6, %p4331_p2 }
  0x77   : > { %4339 = shalt.err (!%p4336_p8)
}
  0x78   : > { %s4340_s18 = scalar_lea.vmem %s498_s15, 2048  ;;  %p4348_p11 = scmp.lt.s32.totalorder %s498_s15, %s498_s15 }
  0x79   : > { %p4341_p10 = scmp.ne.s32.totalorder %s498_s15, %s4340_s18  ;;  %p4349_p12 = scmp.lt.s32.totalorder %s4340_s18, %s4340_s18 }
  0x7b   : > { %p4343_p3 = pnand %p4341_p10, %p4805_p9  ;;  %p4350_p1 = por %p4349_p12, %p4348_p11 }
  0x7d   : > { %p4344_p5 = pneg %p4343_p3 }
  0x7f   : > { %p4351_p4 = pnand %p4350_p1, %p4344_p5 }
  0x81   : > { %4354 = shalt.err (!%p4351_p4)
}
  0x82   : > { %4117 = dma.hbm_to_vmem [thread:$0]  (!%p4789_p7), %s5655_s6, 2048, %s498_s15, [#allocation13], %s4648_s16, %s4648_s16, %s4649_s8  }
  0x83   : > { %s4355_s20 = scalar_lea.hbm %s5658_s9, 2048 }
  0x84   : > { %p4356_p1 = scmp.ne.s32.totalorder %s5658_s9, %s4355_s20  ;;  %p4362_p0 = scmp.lt.u32.totalorder %s4355_s20, %s5658_s9 }
  0x86   : > { %p4358_p4 = pnand %p4356_p1, %p4805_p9 }
  0x88   : > { %p4359_p13 = pneg %p4358_p4 }
  0x8a   : > { %p4364_p2 = pnand %p4362_p0, %p4359_p13 }
  0x8c   : > { %4367 = shalt.err (!%p4364_p2)
}
  0x8d   : > { %s4368_s26 = scalar_lea.vmem %s527_s19, 2048  ;;  %p4376_p3 = scmp.lt.s32.totalorder %s527_s19, %s527_s19 }
  0x8e   : > { %p4369_p6 = scmp.ne.s32.totalorder %s527_s19, %s4368_s26  ;;  %p4377_p5 = scmp.lt.s32.totalorder %s4368_s26, %s4368_s26 }
  0x90   : > { %p4371_p8 = pnand %p4369_p6, %p4805_p9  ;;  %p4378_p11 = por %p4377_p5, %p4376_p3 }
  0x92   : > { %p4372_p10 = pneg %p4371_p8 }
  0x94   : > { %p4379_p12 = pnand %p4378_p11, %p4372_p10 }
  0x96   : > { %4382 = shalt.err (!%p4379_p12)
}
  0x97   : > { %4123 = dma.hbm_to_vmem [thread:$0]  (!%p4789_p7), %s5658_s9, 2048, %s527_s19, [#allocation16], %s4648_s16, %s4648_s16, %s4649_s8  }
  0x98   : > { %s4652_s1 = smov [#allocation8]   ;;  %s4653_s14 = smov [#allocation11]  }
  0x99   : > { %s458_s13 = sshll.u32 %s4652_s1, 4  ;;  %s484_s28 = sshll.u32 %s4653_s14, 4  ;;  %s459_s13 = int_to_ptr.vmem [resolvable:$true] %s458_s13  ;;  %s485_s28 = int_to_ptr.vmem [resolvable:$true] %s484_s28 }
  0x9a   : > { %s5692_s3 = sld [smem:[#allocation34_spill]] }
  0xa0   : > { %s4383_s17 = scalar_lea.hbm %s5692_s3, 2048 }
  0xa1   : > { %p4384_p1 = scmp.ne.s32.totalorder %s5692_s3, %s4383_s17  ;;  %p4390_p0 = scmp.lt.u32.totalorder %s4383_s17, %s5692_s3 }
  0xa3   : > { %p4386_p4 = pnand %p4384_p1, %p4805_p9 }
  0xa5   : > { %p4387_p13 = pneg %p4386_p4 }
  0xa7   : > { %p4392_p2 = pnand %p4390_p0, %p4387_p13 }
  0xa9   : > { %4395 = shalt.err (!%p4392_p2)
}
  0xaa   : > { %s4396_s19 = scalar_lea.vmem %s459_s13, 2048  ;;  %p4404_p3 = scmp.lt.s32.totalorder %s459_s13, %s459_s13 }
  0xab   : > { %p4397_p6 = scmp.ne.s32.totalorder %s459_s13, %s4396_s19  ;;  %p4405_p5 = scmp.lt.s32.totalorder %s4396_s19, %s4396_s19 }
  0xad   : > { %p4399_p8 = pnand %p4397_p6, %p4805_p9  ;;  %p4406_p11 = por %p4405_p5, %p4404_p3 }
  0xaf   : > { %p4400_p10 = pneg %p4399_p8 }
  0xb1   : > { %p4407_p12 = pnand %p4406_p11, %p4400_p10 }
  0xb3   : > { %4410 = shalt.err (!%p4407_p12)
}
  0xb4   : > { %4108 = dma.hbm_to_vmem [thread:$0]  (!%p4789_p7), %s5692_s3, 2048, %s459_s13, [#allocation7], %s4648_s16, %s4648_s16, %s4649_s8  }
  0xb5   : > { %s4411_s25 = scalar_lea.hbm %s5654_s5, 256 }
  0xb6   : > { %p4412_p1 = scmp.ne.s32.totalorder %s5654_s5, %s4411_s25  ;;  %p4418_p0 = scmp.lt.u32.totalorder %s4411_s25, %s5654_s5 }
  0xb8   : > { %p4414_p4 = pnand %p4412_p1, %p4805_p9 }
  0xba   : > { %p4415_p13 = pneg %p4414_p4 }
  0xbc   : > { %p4420_p2 = pnand %p4418_p0, %p4415_p13 }
  0xbe   : > { %4423 = shalt.err (!%p4420_p2)
}
  0xbf   : > { %s4424_s15 = scalar_lea.vmem %s485_s28, 256  ;;  %p4432_p3 = scmp.lt.s32.totalorder %s485_s28, %s485_s28 }
  0xc0   : > { %p4425_p6 = scmp.ne.s32.totalorder %s485_s28, %s4424_s15  ;;  %p4433_p5 = scmp.lt.s32.totalorder %s4424_s15, %s4424_s15 }
  0xc2   : > { %p4427_p8 = pnand %p4425_p6, %p4805_p9  ;;  %p4434_p11 = por %p4433_p5, %p4432_p3 }
  0xc4   : > { %p4428_p10 = pneg %p4427_p8 }
  0xc6   : > { %p4435_p12 = pnand %p4434_p11, %p4428_p10 }
  0xc8   : > { %4438 = shalt.err (!%p4435_p12)
}
  0xc9   : > { %4114 = dma.hbm_to_vmem [thread:$0]  (!%p4789_p7), %s5654_s5, 256, %s485_s28, [#allocation10], %s4648_s16, %s4648_s16, %s4649_s8  }
  0xca   : > { %s4654_s18 = smov [#allocation14]   ;;  %s4655_s14 = smov [#allocation17]  }
  0xcb   : > { %s510_s1 = sshll.u32 %s4654_s18, 4  ;;  %s539_s20 = sshll.u32 %s4655_s14, 4  ;;  %s511_s1 = int_to_ptr.vmem [resolvable:$true] %s510_s1  ;;  %s540_s20 = int_to_ptr.vmem [resolvable:$true] %s539_s20 }
  0xcc   : > { %s4439_s12 = scalar_lea.hbm %s5656_s7, 2048 }
  0xcd   : > { %p4440_p1 = scmp.ne.s32.totalorder %s5656_s7, %s4439_s12  ;;  %p4446_p0 = scmp.lt.u32.totalorder %s4439_s12, %s5656_s7 }
  0xcf   : > { %p4442_p4 = pnand %p4440_p1, %p4805_p9 }
  0xd1   : > { %p4443_p13 = pneg %p4442_p4 }
  0xd3   : > { %p4448_p2 = pnand %p4446_p0, %p4443_p13 }
  0xd5   : > { %4451 = shalt.err (!%p4448_p2)
}
  0xd6   : > { %s4452_s28 = scalar_lea.vmem %s511_s1, 2048  ;;  %p4460_p3 = scmp.lt.s32.totalorder %s511_s1, %s511_s1 }
  0xd7   : > { %p4453_p6 = scmp.ne.s32.totalorder %s511_s1, %s4452_s28  ;;  %p4461_p5 = scmp.lt.s32.totalorder %s4452_s28, %s4452_s28 }
  0xd9   : > { %p4455_p8 = pnand %p4453_p6, %p4805_p9  ;;  %p4462_p11 = por %p4461_p5, %p4460_p3 }
  0xdb   : > { %p4456_p10 = pneg %p4455_p8 }
  0xdd   : > { %p4463_p12 = pnand %p4462_p11, %p4456_p10 }
  0xdf   : > { %4466 = shalt.err (!%p4463_p12)
}
  0xe0   : > { %4120 = dma.hbm_to_vmem [thread:$0]  (!%p4789_p7), %s5656_s7, 2048, %s511_s1, [#allocation13], %s4648_s16, %s4648_s16, %s4649_s8  }
  0xe1   : > { %s4467_s17 = scalar_lea.hbm %s5659_s10, 2048 }
  0xe2   : > { %p4468_p1 = scmp.ne.s32.totalorder %s5659_s10, %s4467_s17  ;;  %p4474_p0 = scmp.lt.u32.totalorder %s4467_s17, %s5659_s10 }
  0xe4   : > { %p4470_p4 = pnand %p4468_p1, %p4805_p9 }
  0xe6   : > { %p4471_p13 = pneg %p4470_p4 }
  0xe8   : > { %p4476_p2 = pnand %p4474_p0, %p4471_p13 }
  0xea   : > { %4479 = shalt.err (!%p4476_p2)
}
  0xeb   : > { %s4480_s13 = scalar_lea.vmem %s540_s20, 2048  ;;  %p4488_p3 = scmp.lt.s32.totalorder %s540_s20, %s540_s20 }
  0xec   : > { %p4481_p6 = scmp.ne.s32.totalorder %s540_s20, %s4480_s13  ;;  %p4489_p5 = scmp.lt.s32.totalorder %s4480_s13, %s4480_s13 }
  0xee   : > { %p4483_p8 = pnand %p4481_p6, %p4805_p9  ;;  %p4490_p11 = por %p4489_p5, %p4488_p3 }
  0xf0   : > { %p4484_p10 = pneg %p4483_p8 }
  0xf2   : > { %p4491_p12 = pnand %p4490_p11, %p4484_p10 }
  0xf4   : > { %4494 = shalt.err (!%p4491_p12)
}
  0xf5   : > { %4126 = dma.hbm_to_vmem [thread:$0]  (!%p4789_p7), %s5659_s10, 2048, %s540_s20, [#allocation16], %s4648_s16, %s4648_s16, %s4649_s8  }
  0xf6   : > { %s4656_s19 = smov [#allocation18]   ;;  %s4495_s17 = scalar_lea.hbm %s5660_s11, 2048 }
  0xf7   : > { %s552_s18 = sshll.u32 %s4656_s19, 4  ;;  %p4496_p1 = scmp.ne.s32.totalorder %s5660_s11, %s4495_s17  ;;  %s553_s18 = int_to_ptr.vmem [resolvable:$true] %s552_s18 }
  0xf8   : > { %p4502_p0 = scmp.lt.u32.totalorder %s4495_s17, %s5660_s11 }
  0xf9   : > { %p4498_p4 = pnand %p4496_p1, %p4805_p9 }
  0xfb   : > { %p4499_p13 = pneg %p4498_p4 }
  0xfd   : > { %p4504_p2 = pnand %p4502_p0, %p4499_p13 }
  0xff   : > { %4507 = shalt.err (!%p4504_p2)
}
 0x100   : > { %s4508_s20 = scalar_lea.vmem %s553_s18, 2048  ;;  %p4516_p3 = scmp.lt.s32.totalorder %s553_s18, %s553_s18 }
 0x101   : > { %p4509_p6 = scmp.ne.s32.totalorder %s553_s18, %s4508_s20  ;;  %p4517_p5 = scmp.lt.s32.totalorder %s4508_s20, %s4508_s20 }
 0x103   : > { %p4511_p8 = pnand %p4509_p6, %p4805_p9  ;;  %p4518_p11 = por %p4517_p5, %p4516_p3 }
 0x105   : > { %p4512_p10 = pneg %p4511_p8 }
 0x107   : > { %p4519_p12 = pnand %p4518_p11, %p4512_p10 }
 0x109   : > { %4522 = shalt.err (!%p4519_p12)
}
 0x10a   : > { %4129 = dma.hbm_to_vmem [thread:$0]  (!%p4789_p7), %s5660_s11, 2048, %s553_s18, [#allocation19], %s4648_s16, %s4648_s16, %s4649_s8  }
 0x10b   : > { %s3154_s0 = sadd.s32 4294967294, %s4643_s24   ;;  %s5030_s29 = sadd.s32 1, %s4643_s24  }
 0x10c   : > { %s312_s28 = ssub.s32 %s4643_s24, %s5030_s29  ;;  %s315_s19 = sadd.s32 1, %s4639_s23 }
 0x10d   : > { %p313_p9 = scmp.eq.s32.totalorder %s312_s28, 0  ;;  %p322_p1 = scmp.ne.s32.totalorder %s4639_s23, %s4635_s22 }
 0x10e   : > { %p323_p4 = scmp.eq.s32.totalorder %s4643_s24, 0  ;;  %p328_p13 = scmp.ne.s32.totalorder %s4635_s22, %s4631_s21 }
 0x10f   : > { %s5041_s14 = scalar_select %p313_p9, %s4639_s23, %s315_s19  }
 0x110   : > { %p324_p0 = por %p323_p4, %p322_p1  ;;  %p5693_p2 = scmp.eq.s32.totalorder %s4772_s27, 0 }
 0x111   : > { %p404_p7 = scmp.eq.s32.totalorder %s4772_s27, 1  ;;  %p410_p8 = scmp.eq.s32.totalorder %s3154_s0, 1 }
 0x112   : > { %p5045_p6 = por %p5693_p2, %p328_p13  ;;  %p4148_p10 = scmp.lt.s32.totalorder %s4643_s24, 2 }
 0x113   : > { %s569_s16 = sand.u32 1, %s4643_s24   ;;  %p5052_p3 = por %p404_p7, %p322_p1 }
 0x114   : > { %p5056_p5 = por %p410_p8, %p328_p13  ;;  %s571_s17 = sand.u32 1, %s4639_s23  }
 0x115   : > { %s5695_s8 = scalar_select %p5052_p3, 1, 0 }
 0x116   : > { %s5696_s18 = scalar_select %p5056_p5, 1, 0 }
 0x117   : > { %s4053_s12 = smul.u32 544, %s571_s17  ;;  %p5061_p11 = pnand %p4148_p10, %p324_p0 }
 0x118   : > { %s3191_s26 = smul.u32 2176, %s4643_s24  ;;  %s5698_s13 = sld [smem:[#allocation38_spill]] }
 0x119   : > { %s573_s0 = scalar_lea.vmem [#allocation20], %s4053_s12  ;;  %s5073_s19 = scalar_lea.sflag [#allocation4], %s569_s16 }
 0x11a   : > { %s580_s28 = sshll.u32 %s573_s0, 4  ;;  %p4525_p9 = pneg %p5061_p11  ;;  %s5071_s28 = int_to_ptr.vmem [resolvable:$true] %s580_s28 }
 0x11e   : > { %s5069_s1 = scalar_lea.hbm %s5698_s13, %s3191_s26  ;;  %s4528_s20 = scalar_lea.hbm %s5698_s13, 17408 }
 0x11f   : > { %s4523_s17 = scalar_lea.hbm %s5069_s1, 8704  ;;  %p4529_p13 = scmp.lt.u32.totalorder %s5069_s1, %s5698_s13 }
 0x120   : > { %p4524_p12 = scmp.ne.s32.totalorder %s5069_s1, %s4523_s17  ;;  %p4530_p0 = scmp.lt.u32.totalorder %s4528_s20, %s4523_s17 }
 0x121   : > { %p4532_p7 = scmp.lt.u32.totalorder %s4523_s17, %s5069_s1 }
 0x122   : > { %p4526_p1 = pnand %p4525_p9, %p4524_p12  ;;  %p4531_p2 = por %p4530_p0, %p4529_p13 }
 0x124   : > { %p4527_p4 = pneg %p4526_p1  ;;  %p4533_p8 = por %p4532_p7, %p4531_p2 }
 0x126   : > { %p4534_p10 = pnand %p4533_p8, %p4527_p4 }
 0x128   : > { %4537 = shalt.err (!%p4534_p10)
}
 0x129   : > { %s4538_s16 = scalar_lea.vmem %s5071_s28, 8704  ;;  %s4657_s12 = smov [#allocation20]  }
 0x12a   : > { %p4539_p12 = scmp.ne.s32.totalorder %s5071_s28, %s4538_s16  ;;  %s4543_s0 = sshll.u32 %s4657_s12, 4  ;;  %s4544_s0 = int_to_ptr.vmem [resolvable:$false] %s4543_s0 }
 0x12b   : > { %s4545_s2 = scalar_lea.vmem %s4544_s0, 17408  ;;  %p4546_p3 = scmp.lt.s32.totalorder %s5071_s28, %s4544_s0 }
 0x12c   : > { %p4541_p1 = pnand %p4539_p12, %p4525_p9  ;;  %p4547_p13 = scmp.lt.s32.totalorder %s4545_s2, %s4538_s16 }
 0x12e   : > { %p4542_p5 = pneg %p4541_p1  ;;  %p4548_p0 = por %p4547_p13, %p4546_p3 }
 0x130   : > { %p4549_p2 = pnand %p4548_p0, %p4542_p5 }
 0x132   : > { %4552 = shalt.err (!%p4549_p2)
}
 0x133   : > { %s4658_s3 = smov 4352   ;;  %s4659_s17 = smov 2176  }
 0x134   : > { %s4660_s26 = smov 136   ;;  %s5699_s15 = sld [smem:[#allocation30_spill]] }
 0x135   : > { %4133 = dma.hbm_to_vmem [thread:$0]  (!%p5061_p11), %s5069_s1, 8704, %s5071_s28, %s5073_s19, %s4658_s3, %s4659_s17, %s4660_s26  }
 0x13a   : > { %p5700_p9 = scmp.ne.s32.totalorder %s5699_s15, 0 }
 0x13b   : > { %p5701_p4 = scmp.eq.s32.totalorder (!%p5700_p9), %s4772_s27, 0 }
 0x13c   : > { %608 = sbr.rel (%p5700_p9) target bundleno = 2877 (0xb3d), region = 84 }
 0x143   : > { %4598 = dma.done.wait (%p5701_p4), [#allocation4], 512   ;;  %p5702_p7 = pmov %p5701_p4 }
 0x144   : > { %p5703_p3 = pmov %p5701_p4 }
 0x145   : > { %4600 = vsyncadd (%p5702_p7), [#allocation4], 4294966784 }
 0x146   : > { %4602 = dma.done.wait (%p5703_p3), [#allocation7], 2560   ;;  %p5704_p5 = pmov %p5703_p3 }
 0x147   : > { %p5705_p8 = pmov %p5703_p3 }
 0x148   : > { %4604 = vsyncadd (%p5704_p5), [#allocation7], 4294964736 }
 0x149   : > { %4606 = dma.done.wait (%p5705_p8), [#allocation10], 2304   ;;  %p5706_p11 = pmov %p5703_p3 }
 0x14a   : > { %p5707_p10 = pmov %p5703_p3 }
 0x14b   : > { %4608 = vsyncadd (%p5706_p11), [#allocation10], 4294964992 }
 0x14c   : > { %4610 = dma.done.wait (%p5707_p10), [#allocation13], 4096   ;;  %p5708_p12 = pmov %p5703_p3 }
 0x14d   : > { %p5709_p1 = pmov %p5703_p3 }
 0x14e   : > { %4612 = vsyncadd (%p5708_p12), [#allocation13], 4294963200 }
 0x14f   : > { %4614 = dma.done.wait (%p5709_p1), [#allocation16], 4096   ;;  %p5710_p13 = pmov %p5709_p1 }
 0x150   : > { %p5711_p0 = pmov %p5709_p1 }
 0x151   : > { %4616 = vsyncadd (%p5710_p13), [#allocation16], 4294963200 }
 0x152   : > { %4618 = dma.done.wait (%p5711_p0), [#allocation19], 2048   ;;  %p5712_p2 = pmov %p5711_p0 }
 0x153   : > { %s650_s30 = sand.u32 1, %s4772_s27   ;;  %s5673_s1 = sand.u32 1, %s4635_s22  }
 0x154   : > { %4620 = vsyncadd (%p5712_p2), [#allocation19], 4294965248  ;;  %s4054_s28 = smul.u32 544, %s5673_s1  ;;  %s651_s19 = scalar_lea.sflag [#allocation4], %s650_s30 }
 0x156   : > { %s5131_s20 = scalar_lea.vmem [#allocation20], %s4054_s28 }
 0x157   : > { %4622 = dma.done.wait (%p5045_p6), %s651_s19, 8704  }
 0x158   : > { %4624 = vsyncadd (%p5045_p6), %s651_s19, 4294958592  ;;  %s712_s16 = smul.u32 17, %s4772_s27  ;;  %s5713_s2 = sld [smem:[#allocation39_spill]] }
 0x159   : > { %s5714_s15 = sld [smem:[#allocation40_spill]]  ;;  %s5148_s1 = scalar_lea.vmem [#allocation21], %s4054_s28 }
 0x15a   : > { %p713_p9 = scmp.lt.s32.totalorder %s712_s16, 33  ;;  %p5715_p4 = scmp.ne.s32.totalorder %s4772_s27, 0 }
 0x15b   : > { %v772_v0 = vld [vmem:[#allocation11] sm:$0xff] (!%p5715_p4)  ;;  %v773_v1 = vld [vmem:[#allocation11 + $0x8] sm:$0xff] (!%p5715_p4)  ;;  %s5716_s4 = sld [smem:[#allocation31_spill]] (!%p5715_p4)  ;;  %vm807_vm0 = vcmask (!%p5715_p4), 130048   ;;  %v774_v5 = vld [vmem:[#allocation12] sm:$0xff] (!%p5715_p4)  ;;  %s5717_s25 = sld [smem:[#allocation36_spill]] (!%p5715_p4) }
 0x15c   : > { %s5729_s16 = smov (!%p713_p9, %s712_s16), 33  ;;  %727 = sbr.rel (%p5715_p4) target bundleno = 2479 (0x9af), region = 132 }
 0x15d   : > { %v3761_v3 = vpack.c.bf16 (!%p5715_p4), %v773_v1, %v772_v0  ;;  %v775_v6 = vld [vmem:[#allocation12 + $0x8] sm:$0xff] (!%p5715_p4)  ;;  %v790_v7 = vld [vmem:[#allocation14] sm:$0xff] (!%p5715_p4)  ;;  %v776_v10 = vld [vmem:[#allocation12 + $0x10] sm:$0xff] (!%p5715_p4)  ;;  %s5718_s0 = sld [smem:[#allocation37_spill]] (!%p5715_p4) }
 0x15e   : > { %s5141_s3 = scalar_lea.vmem %s5713_s2, %s5729_s16  ;;  %v3765_v8 = vpack.c.bf16 (!%p5715_p4), %v775_v6, %v774_v5  ;;  %v791_v9 = vld [vmem:[#allocation14 + $0x8] sm:$0xff] (!%p5715_p4)  ;;  %v777_v11 = vld [vmem:[#allocation12 + $0x18] sm:$0xff] (!%p5715_p4)  ;;  %v792_v14 = vld [vmem:[#allocation14 + $0x10] sm:$0xff] (!%p5715_p4) }
 0x15f   : > { %s5146_s30 = scalar_lea.vmem %s5714_s15, %s5729_s16  ;;  %3762 = vmatprep.subr.bf16.mxu0 (!%p5715_p4), %v3761_v3  ;;  %v3797_v12 = vpack.c.bf16 (!%p5715_p4), %v791_v9, %v790_v7  ;;  %v3769_v13 = vpack.c.bf16 (!%p5715_p4), %v777_v11, %v776_v10  ;;  %v793_v15 = vld [vmem:[#allocation14 + $0x18] sm:$0xff] (!%p5715_p4)  ;;  %v778_v16 = vld [vmem:[#allocation12 + $0x20] sm:$0xff] (!%p5715_p4)  ;;  %v779_v19 = vld [vmem:[#allocation12 + $0x28] sm:$0xff] (!%p5715_p4) }
 0x160   : > { %3764 = vmatpush3.bf16.msra.mxu0 (!%p5715_p4), %v3761_v3  ;;  %3766 = vmatprep.subr.bf16.mxu1 (!%p5715_p4), %v3765_v8  ;;  %v3801_v18 = vpack.c.bf16 (!%p5715_p4), %v793_v15, %v792_v14  ;;  %v794_v20 = vld [vmem:[#allocation14 + $0x20] sm:$0xff] (!%p5715_p4)  ;;  %v795_v21 = vld [vmem:[#allocation14 + $0x28] sm:$0xff] (!%p5715_p4)  ;;  %v3773_v22 = vpack.c.bf16 (!%p5715_p4), %v779_v19, %v778_v16  ;;  %v780_v24 = vld [vmem:[#allocation12 + $0x30] sm:$0xff] (!%p5715_p4) }
 0x161   : > { %v768_v2 = vld [vmem:[%s5716_s4] sm:$0xff] (!%p5715_p4)  ;;  %v769_v4 = vld [vmem:[%s5716_s4 + $0x8] sm:$0xff] (!%p5715_p4)  ;;  %v770_v17 = vld [vmem:[%s5716_s4 + $0x10] sm:$0xff] (!%p5715_p4)  ;;  %3798 = vmatprep.subr.bf16.mxu0 (!%p5715_p4), %v3797_v12  ;;  %3768 = vmatpush3.bf16.msra.mxu1 (!%p5715_p4), %v3765_v8  ;;  %v3805_v26 = vpack.c.bf16 (!%p5715_p4), %v795_v21, %v794_v20 }
 0x162   : > { %3393 = vmatprep.mubr.msk.f32.mxu0 (!%p5715_p4), %vm807_vm0, %v768_v2  ;;  %3770 = vmatprep.subr.bf16.mxu1 (!%p5715_p4), %v3769_v13  ;;  %v771_v23 = vld [vmem:[%s5716_s4 + $0x18] sm:$0xff] (!%p5715_p4)  ;;  %v796_v27 = vld [vmem:[#allocation14 + $0x30] sm:$0xff] (!%p5715_p4)  ;;  %v782_v30 = vld [vmem:[#allocation12 + $0x40] sm:$0xff] (!%p5715_p4) }
 0x163   : > { %3394 = vmatmul.mubr.msk.f32.vlgmr.msra.gmra.mrb[0].mxu0 %vm807_vm0, %v769_v4  ;;  %v781_v25 = vld [vmem:[#allocation12 + $0x38] sm:$0xff]  ;;  %v783_v31 = vld [vmem:[#allocation12 + $0x48] sm:$0xff]  ;;  %v798_v33 = vld [vmem:[#allocation14 + $0x40] sm:$0xff] }
 0x164   : > { %3396 = vmatprep.mubr.msk.f32.mxu0 %vm807_vm0, %v770_v17  ;;  %3800 = vmatpush3.bf16.msra.mxu0 %v3797_v12  ;;  %v797_v28 = vld [vmem:[#allocation14 + $0x38] sm:$0xff]  ;;  %v3777_v29 = vpack.c.bf16 %v781_v25, %v780_v24  ;;  %v799_v34 = vld [vmem:[#allocation14 + $0x48] sm:$0xff]  ;;  %v3781_v35 = vpack.c.bf16 %v783_v31, %v782_v30  ;;  %v784_v36 = vld [vmem:[#allocation12 + $0x50] sm:$0xff] }
 0x165   : > { %3802 = vmatprep.subr.bf16.mxu0 %v3801_v18  ;;  %3772 = vmatpush3.bf16.msra.mxu1 %v3769_v13  ;;  %v3809_v32 = vpack.c.bf16 %v797_v28, %v796_v27  ;;  %v785_v37 = vld [vmem:[#allocation12 + $0x58] sm:$0xff]  ;;  %v3813_v38 = vpack.c.bf16 %v799_v34, %v798_v33  ;;  %v800_v39 = vld [vmem:[#allocation14 + $0x50] sm:$0xff]  ;;  %v786_v42 = vld [vmem:[#allocation12 + $0x60] sm:$0xff] }
 0x166   : > { %3774 = vmatprep.subr.bf16.mxu1 %v3773_v22  ;;  %v801_v40 = vld [vmem:[#allocation14 + $0x58] sm:$0xff]  ;;  %v3785_v41 = vpack.c.bf16 %v785_v37, %v784_v36  ;;  %v787_v43 = vld [vmem:[#allocation12 + $0x68] sm:$0xff]  ;;  %v802_v45 = vld [vmem:[#allocation14 + $0x60] sm:$0xff] }
 0x167   : > { %3397 = vmatmul.mubr.msk.f32.gmra.mrb[2].mxu0 %vm807_vm0, %v771_v23  ;;  %v3817_v44 = vpack.c.bf16 %v801_v40, %v800_v39  ;;  %v803_v46 = vld [vmem:[#allocation14 + $0x68] sm:$0xff]  ;;  %v3789_v47 = vpack.c.bf16 %v787_v43, %v786_v42  ;;  %v788_v48 = vld [vmem:[#allocation12 + $0x70] sm:$0xff]  ;;  %v789_v49 = vld [vmem:[#allocation12 + $0x78] sm:$0xff] }
 0x168   : > { %3804 = vmatpush3.bf16.msra.mxu0 %v3801_v18  ;;  %v3821_v50 = vpack.c.bf16 %v803_v46, %v802_v45  ;;  %v804_v51 = vld [vmem:[#allocation14 + $0x70] sm:$0xff]  ;;  %v805_v52 = vld [vmem:[#allocation14 + $0x78] sm:$0xff]  ;;  %v3793_v53 = vpack.c.bf16 %v789_v49, %v788_v48  ;;  %v5189_v6 = vld [vmem:[#allocation9 + $0x18] sm:$0xff] }
 0x169   : > { %3806 = vmatprep.subr.bf16.mxu0 %v3805_v26  ;;  %3776 = vmatpush3.bf16.msra.mxu1 %v3773_v22  ;;  %v3825_v54 = vpack.c.bf16 %v805_v52, %v804_v51  ;;  %v5168_v55 = vld [vmem:[#allocation9 + $0x8] sm:$0xff]  ;;  %v5176_v59 = vld [vmem:[#allocation9] sm:$0xff]  ;;  %v5192_v8 = vld [vmem:[#allocation9 + $0x38] sm:$0xff] }
 0x16a   : > { %3778 = vmatprep.subr.bf16.mxu1 %v3777_v29  ;;  %v5170_v56 = vld [vmem:[#allocation9 + $0x28] sm:$0xff]  ;;  %v5178_v60 = vld [vmem:[#allocation9 + $0x20] sm:$0xff]  ;;  %v5195_v10 = vld [vmem:[#allocation9 + $0x58] sm:$0xff] }
 0x16b   : > { %v5172_v57 = vld [vmem:[#allocation9 + $0x48] sm:$0xff]  ;;  %v5180_v61 = vld [vmem:[#allocation9 + $0x40] sm:$0xff]  ;;  %v5197_v11 = vld [vmem:[#allocation9 + $0x10] sm:$0xff] }
 0x16c   : > { %3808 = vmatpush3.bf16.msra.mxu0 %v3805_v26  ;;  %v5174_v58 = vld [vmem:[#allocation9 + $0x68] sm:$0xff]  ;;  %v5182_v63 = vld [vmem:[#allocation9 + $0x60] sm:$0xff]  ;;  %v5199_v12 = vld [vmem:[#allocation9 + $0x30] sm:$0xff] }
 0x16d   : > { %3810 = vmatprep.subr.bf16.mxu0 %v3809_v32  ;;  %3780 = vmatpush3.bf16.msra.mxu1 %v3777_v29  ;;  %v5201_v13 = vld [vmem:[#allocation9 + $0x50] sm:$0xff]  ;;  %v5206_v20 = vld [vmem:[#allocation9 + $0x78] sm:$0xff]  ;;  %v737_v36 = vld [vmem:[#allocation8 + $0x8] sm:$0xff] }
 0x16e   : > { %3782 = vmatprep.subr.bf16.mxu1 %v3781_v35  ;;  %v5204_v19 = vld [vmem:[#allocation9 + $0x70] sm:$0xff]  ;;  %v739_v39 = vld [vmem:[#allocation8 + $0x18] sm:$0xff]  ;;  %v741_v42 = vld [vmem:[#allocation8 + $0x28] sm:$0xff] }
 0x16f   : > { %v738_v37 = vld [vmem:[#allocation8 + $0x10] sm:$0xff]  ;;  %v743_v45 = vld [vmem:[#allocation8 + $0x38] sm:$0xff]  ;;  %v5234_v48 = vld [vmem:[#allocation6] sm:$0xff] }
 0x170   : > { %3812 = vmatpush3.bf16.msra.mxu0 %v3809_v32  ;;  %v5218_v40 = vpack.c.bf16 %v739_v39, %v738_v37  ;;  %v5250_v39 = vld [vmem:[#allocation3 + $0x18] sm:$0xff] }
 0x171   : > { %3814 = vmatprep.subr.bf16.mxu0 %v3813_v38  ;;  %3784 = vmatpush3.bf16.msra.mxu1 %v3781_v35  ;;  %v736_v35 = vld [vmem:[#allocation8] sm:$0xff] }
 0x172   : > { %3786 = vmatprep.subr.bf16.mxu1 %v3785_v41 }
 0x174   : > { %3816 = vmatpush3.bf16.msra.mxu0 %v3813_v38  ;;  %v5216_v38 = vpack.c.bf16 %v737_v36, %v736_v35 }
 0x175   : > { %3818 = vmatprep.subr.bf16.mxu0 %v3817_v44  ;;  %3788 = vmatpush3.bf16.msra.mxu1 %v3785_v41  ;;  %v740_v41 = vld [vmem:[#allocation8 + $0x20] sm:$0xff] }
 0x176   : > { %3790 = vmatprep.subr.bf16.mxu1 %v3789_v47  ;;  %v5223_v43 = vpack.c.bf16 %v741_v42, %v740_v41  ;;  %v5252_v42 = vld [vmem:[#allocation3 + $0x8] sm:$0xff] }
 0x178   : > { %3820 = vmatpush3.bf16.msra.mxu0 %v3817_v44  ;;  %v742_v44 = vld [vmem:[#allocation8 + $0x30] sm:$0xff] }
 0x179   : > { %3822 = vmatprep.subr.bf16.mxu0 %v3821_v50  ;;  %3792 = vmatpush3.bf16.msra.mxu1 %v3789_v47  ;;  %v5227_v46 = vpack.c.bf16 %v743_v45, %v742_v44  ;;  %v5232_v47 = vld [vmem:[#allocation6 + $0x8] sm:$0xff] }
 0x17a   : > { %3794 = vmatprep.subr.bf16.mxu1 %v3793_v53 }
 0x17c   : > { %3824 = vmatpush3.bf16.msra.mxu0 %v3821_v50 }
 0x17d   : > { %3826 = vmatprep.subr.bf16.mxu0 %v3825_v54  ;;  %3796 = vmatpush3.bf16.msra.mxu1 %v3793_v53 }
 0x17e   : > { %3830 = vmatprep.subr.bf16.mxu1 %v5216_v38 }
 0x180   : > { %3828 = vmatpush3.bf16.msra.mxu0 %v3825_v54 }
 0x236   : > { %v3395_v62 = vpop.f32.mrb[0].mxu0 }
 0x237   : > { %v886_v0 = vpop.f32.mrb[1].mxu0  ;;  %v1218_v1 = vmul.f32 %v3395_v62, %v5168_v55  ;;  %v1222_v2 = vmul.f32 %v3395_v62, %v5170_v56  ;;  %v1226_v3 = vmul.f32 %v3395_v62, %v5172_v57  ;;  %v1230_v4 = vmul.f32 %v3395_v62, %v5174_v58 }
 0x238   : > { %3431 = vmatprep.mubr.f32.mxu1 %v886_v0  ;;  %3469 = vmatprep.mubr.f32.mxu0 %v886_v0  ;;  %v1217_v5 = vmul.f32 %v886_v0, %v5176_v59  ;;  %v1221_v7 = vmul.f32 %v886_v0, %v5178_v60  ;;  %v1225_v9 = vmul.f32 %v886_v0, %v5180_v61 }
 0x239   : > { %3432 = vmatmul.mubr.f32.vlgmr.msra.gmra.mrb[0].mxu1 %v3395_v62  ;;  %3470 = vmatmul.mubr.f32.vlgmr.msra.gmra.mrb[4].mxu0 %v3395_v62  ;;  %v1229_v14 = vmul.f32 %v886_v0, %v5182_v63  ;;  %v5238_v62 = vld [vmem:[#allocation6 + $0x10] sm:$0xff] }
 0x23a   : > { %v3398_v15 = vpop.f32.mrb[2].mxu0  ;;  %v3861_v16 = vpack.c.bf16 %v1218_v1, %v1217_v5  ;;  %v3869_v17 = vpack.c.bf16 %v1222_v2, %v1221_v7  ;;  %v3877_v18 = vpack.c.bf16 %v1226_v3, %v1225_v9  ;;  %3832 = vmatpush3.bf16.msra.mxu1 %v5216_v38  ;;  %v5240_v2 = vld [vmem:[#allocation6 + $0x18] sm:$0xff] }
 0x23b   : > { %v896_v21 = vpop.f32.mrb[3].mxu0  ;;  %v1220_v22 = vmul.f32 %v3398_v15, %v5189_v6  ;;  %v1224_v23 = vmul.f32 %v3398_v15, %v5192_v8  ;;  %v1228_v24 = vmul.f32 %v3398_v15, %v5195_v10  ;;  %v3885_v25 = vpack.c.bf16 %v1230_v4, %v1229_v14  ;;  %3834 = vmatprep.subr.bf16.mxu1 %v5218_v40 }
 0x23c   : > { %3434 = vmatprep.mubr.f32.mxu1 %v896_v21  ;;  %3472 = vmatprep.mubr.f32.mxu0 %v896_v21  ;;  %v1219_v26 = vmul.f32 %v896_v21, %v5197_v11  ;;  %v1223_v27 = vmul.f32 %v896_v21, %v5199_v12  ;;  %v1227_v28 = vmul.f32 %v896_v21, %v5201_v13 }
 0x23d   : > { %3862 = vmatprep.subr.bf16.mxu0 %v3861_v16  ;;  %3435 = vmatmul.mubr.f32.gmra.mrb[2].mxu1 %v3398_v15  ;;  %v1231_v29 = vmul.f32 %v896_v21, %v5204_v19  ;;  %v1232_v30 = vmul.f32 %v3398_v15, %v5206_v20 }
 0x23e   : > { %3473 = vmatmul.mubr.f32.gmra.mrb[6].mxu0 %v3398_v15  ;;  %v3865_v31 = vpack.c.bf16 %v1220_v22, %v1219_v26  ;;  %v3873_v32 = vpack.c.bf16 %v1224_v23, %v1223_v27  ;;  %v3881_v33 = vpack.c.bf16 %v1228_v24, %v1227_v28  ;;  %3836 = vmatpush3.bf16.msra.mxu1 %v5218_v40  ;;  %v5244_v28 = vld [vmem:[#allocation3 + $0x10] sm:$0xff] }
 0x23f   : > { %3864 = vmatpush3.bf16.msra.mxu0 %v3861_v16  ;;  %v3889_v34 = vpack.c.bf16 %v1232_v30, %v1231_v29  ;;  %3838 = vmatprep.subr.bf16.mxu1 %v5223_v43  ;;  %v5246_v29 = vld [vmem:[#allocation3] sm:$0xff] }
 0x240   : > { %3866 = vmatprep.subr.bf16.mxu0 %v3865_v31 }
 0x242   : > { %3840 = vmatpush3.bf16.msra.mxu1 %v5223_v43 }
 0x243   : > { %3868 = vmatpush3.bf16.msra.mxu0 %v3865_v31  ;;  %3842 = vmatprep.subr.bf16.mxu1 %v5227_v46 }
 0x244   : > { %3870 = vmatprep.subr.bf16.mxu0 %v3869_v17 }
 0x246   : > { %3844 = vmatpush3.bf16.msra.mxu1 %v5227_v46 }
 0x247   : > { %3872 = vmatpush3.bf16.msra.mxu0 %v3869_v17 }
 0x248   : > { %3874 = vmatprep.subr.bf16.mxu0 %v3873_v32 }
 0x24b   : > { %3876 = vmatpush3.bf16.msra.mxu0 %v3873_v32 }
 0x24c   : > { %3878 = vmatprep.subr.bf16.mxu0 %v3877_v18 }
 0x24f   : > { %3880 = vmatpush3.bf16.msra.mxu0 %v3877_v18 }
 0x250   : > { %3882 = vmatprep.subr.bf16.mxu0 %v3881_v33 }
 0x253   : > { %3884 = vmatpush3.bf16.msra.mxu0 %v3881_v33 }
 0x254   : > { %3886 = vmatprep.subr.bf16.mxu0 %v3885_v25 }
 0x257   : > { %3888 = vmatpush3.bf16.msra.mxu0 %v3885_v25 }
 0x258   : > { %3890 = vmatprep.subr.bf16.mxu0 %v3889_v34 }
 0x25b   : > { %3892 = vmatpush3.bf16.msra.mxu0 %v3889_v34 }
 0x30c   : > { %v3433_v49 = vpop.f32.mrb[0].mxu1  ;;  %v3471_v50 = vpop.f32.mrb[4].mxu0 }
 0x30d   : > { %v991_v51 = vmul.f32 %v3433_v49, %v5232_v47  ;;  %v971_v52 = vpop.f32.mrb[1].mxu1  ;;  %v1069_v53 = vpop.f32.mrb[5].mxu0 }
 0x30e   : > { %v990_v54 = vmul.f32 %v971_v52, %v5234_v48 }
 0x310   : > { %v994_v0 = vadd.f32 %v991_v51, %v990_v54  ;;  %v3436_v1 = vpop.f32.mrb[2].mxu1  ;;  %v745_v51 = vld [vmem:[#allocation8 + $0x48] sm:$0xff]  ;;  %v747_v54 = vld [vmem:[#allocation8 + $0x58] sm:$0xff] }
 0x311   : > { %v3474_v3 = vpop.f32.mrb[6].mxu0  ;;  %v981_v4 = vpop.f32.mrb[3].mxu1  ;;  %v993_v9 = vmul.f32 %v3436_v1, %v5240_v2  ;;  %v748_v1 = vld [vmem:[#allocation8 + $0x60] sm:$0xff] }
 0x312   : > { %v992_v5 = vmul.f32 %v981_v4, %v5238_v62  ;;  %v1079_v7 = vpop.f32.mrb[7].mxu0  ;;  %v750_v4 = vld [vmem:[#allocation8 + $0x70] sm:$0xff] }
 0x314   : > { %v995_v14 = vadd.f32 %v994_v0, %v992_v5 }
 0x316   : > { %v996_v15 = vadd.f32 %v995_v14, %v993_v9 }
 0x318   : > { %v997_v16 = vrot.slane %v996_v15, 4 }
 0x31a   : > { %v998_v17 = vadd.f32 %v997_v16, %v996_v15 }
 0x31c   : > { %v999_v18 = vrot.slane %v998_v17, 2 }
 0x31e   : > { %v1000_v21 = vadd.f32 %v999_v18, %v998_v17 }
 0x320   : > { %v1001_v22 = vrot.slane %v1000_v21, 1 }
 0x322   : > { %v1002_v23 = vadd.f32 %v1001_v22, %v1000_v21 }
 0x324   : > { %v1080_v24 = vadd.f32 %v1079_v7, %v1002_v23  ;;  %v1070_v25 = vadd.f32 %v1069_v53, %v1002_v23  ;;  %v1085_v26 = vadd.f32 %v3474_v3, %v1002_v23  ;;  %v1075_v27 = vadd.f32 %v3471_v50, %v1002_v23  ;;  %v744_v50 = vld [vmem:[#allocation8 + $0x40] sm:$0xff]  ;;  %v746_v53 = vld [vmem:[#allocation8 + $0x50] sm:$0xff]  ;;  %v749_v3 = vld [vmem:[#allocation8 + $0x68] sm:$0xff] }
 0x325   : > { %v5256_v52 = vpack.c.bf16 %v745_v51, %v744_v50  ;;  %v5260_v0 = vpack.c.bf16 %v747_v54, %v746_v53  ;;  %v5264_v5 = vpack.c.bf16 %v749_v3, %v748_v1  ;;  %v751_v7 = vld [vmem:[#allocation8 + $0x78] sm:$0xff]  ;;  %v1334_v51 = vld [vmem:[#allocation15 + $0x30] sm:$0xff]  ;;  %v1335_v53 = vld [vmem:[#allocation15 + $0x38] sm:$0xff] }
 0x326   : > { %v1094_v30 = vmul.f32 0.2, %v1080_v24  ;;  %vm1090_vm1 = vcmp.gt.f32.partialorder %v1080_v24, 0.0  ;;  %vm1088_vm2 = vcmp.gt.f32.partialorder %v1070_v25, 0.0  ;;  %v1092_v31 = vmul.f32 0.2, %v1070_v25 }
 0x327   : > { %vm1091_vm3 = vcmp.gt.f32.partialorder %v1085_v26, 0.0  ;;  %v1095_v32 = vmul.f32 0.2, %v1085_v26  ;;  %vm1089_vm4 = vcmp.gt.f32.partialorder %v1075_v27, 0.0  ;;  %v1093_v33 = vmul.f32 0.2, %v1075_v27  ;;  %3846 = vmatprep.subr.bf16.mxu1 %v5256_v52 }
 0x328   : > { %v1098_v34 = vsel %vm1090_vm1, %v1080_v24, %v1094_v30  ;;  %v1096_v35 = vsel %vm1088_vm2, %v1070_v25, %v1092_v31  ;;  %3848 = vmatpush3.bf16.msra.mxu1 %v5256_v52  ;;  %v5266_v9 = vpack.c.bf16 %v751_v7, %v750_v4  ;;  %v3905_v54 = vpack.c.bf16 %v1335_v53, %v1334_v51  ;;  %v1336_v1 = vld [vmem:[#allocation15 + $0x40] sm:$0xff]  ;;  %v1337_v3 = vld [vmem:[#allocation15 + $0x48] sm:$0xff]  ;;  %v1338_v7 = vld [vmem:[#allocation15 + $0x50] sm:$0xff] }
 0x329   : > { %v1102_v36 = vadd.f32 %v1098_v34, %v5244_v28  ;;  %v1100_v37 = vadd.f32 %v1096_v35, %v5246_v29  ;;  %v1099_v41 = vsel %vm1091_vm3, %v1085_v26, %v1095_v32  ;;  %v1097_v44 = vsel %vm1089_vm4, %v1075_v27, %v1093_v33  ;;  %3850 = vmatprep.subr.bf16.mxu1 %v5260_v0  ;;  %v1328_v34 = vld [vmem:[#allocation15] sm:$0xff]  ;;  %v1329_v35 = vld [vmem:[#allocation15 + $0x8] sm:$0xff] }
 0x32a   : > { %v1103_v45 = vadd.f32 %v1099_v41, %v5250_v39  ;;  %v1101_v49 = vadd.f32 %v1097_v44, %v5252_v42  ;;  %v1331_v41 = vld [vmem:[#allocation15 + $0x18] sm:$0xff]  ;;  %v3909_v4 = vpack.c.bf16 %v1337_v3, %v1336_v1  ;;  %v1345_v51 = vld [vmem:[#allocation17 + $0x8] sm:$0xff]  ;;  %v1360_v53 = vld [vmem:[#allocation18] sm:$0xff] }
 0x32b   : > { %1108 = vmax.xlane.f32.xlu1 %v1102_v36  ;;  %1104 = vmax.xlane.f32.xlu0 %v1100_v37  ;;  %v1361_v1 = vld [vmem:[#allocation18 + $0x8] sm:$0xff] }
 0x32c   : > { %3852 = vmatpush3.bf16.msra.mxu1 %v5260_v0  ;;  %v3957_v3 = vpack.c.bf16 %v1361_v1, %v1360_v53 }
 0x32d   : > { %3854 = vmatprep.subr.bf16.mxu1 %v5264_v5 }
 0x32f   : > { %1110 = vmax.xlane.f32.xlu1 %v1103_v45  ;;  %1106 = vmax.xlane.f32.xlu0 %v1101_v49 }
 0x330   : > { %3856 = vmatpush3.bf16.msra.mxu1 %v5264_v5 }
 0x331   : > { %3858 = vmatprep.subr.bf16.mxu1 %v5266_v9 }
 0x334   : > { %3860 = vmatpush3.bf16.msra.mxu1 %v5266_v9 }
 0x3b8   : > { %v1109_v14 = vpop.xlane.xlu1 %1108  ;;  %v1105_v15 = vpop.xlane.xlu0 %1104 }
 0x3b9   : > { %v1112_v16 = vsub.f32 %v1100_v37, %v1105_v15  ;;  %v1114_v17 = vsub.f32 %v1102_v36, %v1109_v14  ;;  %v1330_v36 = vld [vmem:[#allocation15 + $0x10] sm:$0xff]  ;;  %v3893_v37 = vpack.c.bf16 %v1329_v35, %v1328_v34  ;;  %v1339_v14 = vld [vmem:[#allocation15 + $0x58] sm:$0xff] }
 0x3ba   : > { %v3897_v44 = vpack.c.bf16 %v1331_v41, %v1330_v36  ;;  %v3913_v15 = vpack.c.bf16 %v1339_v14, %v1338_v7  ;;  %v1348_v7 = vld [vmem:[#allocation17 + $0x20] sm:$0xff]  ;;  %v1350_v14 = vld [vmem:[#allocation17 + $0x30] sm:$0xff] }
 0x3bb   : > { %v1116_v18 = vmul.f32 1.442695, %v1112_v16  ;;  %v1120_v25 = vmul.f32 1.442695, %v1114_v17  ;;  %3894 = vmatprep.subr.bf16.mxu1 %v3893_v37  ;;  %v1340_v16 = vld [vmem:[#allocation15 + $0x60] sm:$0xff]  ;;  %v1341_v17 = vld [vmem:[#allocation15 + $0x68] sm:$0xff] }
 0x3bc   : > { %v1111_v21 = vpop.xlane.xlu1 %1110  ;;  %v1107_v22 = vpop.xlane.xlu0 %1106 }
 0x3bd   : > { %v1113_v23 = vsub.f32 %v1101_v49, %v1107_v22  ;;  %4211 = vpow2.f32 %v1116_v18  ;;  %v1115_v24 = vsub.f32 %v1103_v45, %v1111_v21  ;;  %v1332_v45 = vld [vmem:[#allocation15 + $0x20] sm:$0xff]  ;;  %v1333_v49 = vld [vmem:[#allocation15 + $0x28] sm:$0xff]  ;;  %v3917_v18 = vpack.c.bf16 %v1341_v17, %v1340_v16 }
 0x3be   : > { %v3901_v50 = vpack.c.bf16 %v1333_v49, %v1332_v45  ;;  %v1343_v45 = vld [vmem:[#allocation15 + $0x78] sm:$0xff]  ;;  %v1352_v17 = vld [vmem:[#allocation17 + $0x40] sm:$0xff] }
 0x3bf   : > { %v1118_v26 = vmul.f32 1.442695, %v1113_v23  ;;  %v1122_v27 = vmul.f32 1.442695, %v1115_v24 }
 0x3c1   : > { %4213 = vpow2.f32 %v1118_v26 }
 0x3c2   : > { %4215 = vpow2.f32 %v1120_v25 }
 0x3c3   : > { %4217 = vpow2.f32 %v1122_v27 }
 0x3c7   : > { %v4212_v30 = vpop.eup %4211 }
 0x3c8   : > { %3507 = vmatprep.mubr.f32.mxu1 %v4212_v30 }
 0x3cb   : > { %v4214_v31 = vpop.eup %4213 }
 0x3cc   : > { %v4216_v32 = vpop.eup %4215  ;;  %3508 = vmatmul.mubr.f32.vlgmr.msra.gmra.mrb[4].mxu1 %v4214_v31 }
 0x3cd   : > { %3510 = vmatprep.mubr.f32.mxu1 %v4216_v32  ;;  %v4218_v33 = vpop.eup %4217  ;;  %3896 = vmatpush3.bf16.msra.mxu1 %v3893_v37 }
 0x3ce   : > { %3898 = vmatprep.subr.bf16.mxu1 %v3897_v44 }
 0x3d0   : > { %3511 = vmatmul.mubr.f32.gmra.mrb[6].mxu1 %v4218_v33 }
 0x3d1   : > { %3900 = vmatpush3.bf16.msra.mxu1 %v3897_v44  ;;  %v1342_v44 = vld [vmem:[#allocation15 + $0x70] sm:$0xff] }
 0x3d2   : > { %3902 = vmatprep.subr.bf16.mxu1 %v3901_v50  ;;  %v3921_v49 = vpack.c.bf16 %v1343_v45, %v1342_v44 }
 0x3d5   : > { %3904 = vmatpush3.bf16.msra.mxu1 %v3901_v50  ;;  %v1344_v50 = vld [vmem:[#allocation17] sm:$0xff] }
 0x3d6   : > { %3906 = vmatprep.subr.bf16.mxu1 %v3905_v54 }
 0x3d9   : > { %3908 = vmatpush3.bf16.msra.mxu1 %v3905_v54  ;;  %v3925_v54 = vpack.c.bf16 %v1345_v51, %v1344_v50  ;;  %v1362_v50 = vld [vmem:[#allocation18 + $0x10] sm:$0xff]  ;;  %v1363_v51 = vld [vmem:[#allocation18 + $0x18] sm:$0xff] }
 0x3da   : > { %3910 = vmatprep.subr.bf16.mxu1 %v3909_v4 }
 0x3db   : > { %3926 = vmatprep.subr.bf16.mxu0 %v3925_v54 }
 0x3dd   : > { %3912 = vmatpush3.bf16.msra.mxu1 %v3909_v4 }
 0x3de   : > { %3914 = vmatprep.subr.bf16.mxu1 %v3913_v15 }
 0x3e1   : > { %3916 = vmatpush3.bf16.msra.mxu1 %v3913_v15  ;;  %v1351_v15 = vld [vmem:[#allocation17 + $0x38] sm:$0xff] }
 0x3e2   : > { %3918 = vmatprep.subr.bf16.mxu1 %v3917_v18  ;;  %v3937_v16 = vpack.c.bf16 %v1351_v15, %v1350_v14 }
 0x3e5   : > { %3920 = vmatpush3.bf16.msra.mxu1 %v3917_v18  ;;  %v1353_v18 = vld [vmem:[#allocation17 + $0x48] sm:$0xff] }
 0x3e6   : > { %3922 = vmatprep.subr.bf16.mxu1 %v3921_v49 }
 0x3e9   : > { %3924 = vmatpush3.bf16.msra.mxu1 %v3921_v49 }
 0x3ea   : > { %3958 = vmatprep.subr.bf16.mxu1 %v3957_v3 }
 0x49f   : > { %v3509_v21 = vpop.f32.mrb[4].mxu1 }
 0x4a0   : > { %4219 = vrcp.f32 %v3509_v21  ;;  %v1190_v22 = vpop.f32.mrb[5].mxu1  ;;  %v3941_v21 = vpack.c.bf16 %v1353_v18, %v1352_v17  ;;  %v1366_v17 = vld [vmem:[#allocation18 + $0x30] sm:$0xff]  ;;  %v1367_v18 = vld [vmem:[#allocation18 + $0x38] sm:$0xff] }
 0x4a1   : > { %4221 = vrcp.f32 %v1190_v22  ;;  %v1354_v22 = vld [vmem:[#allocation17 + $0x50] sm:$0xff] }
 0x4a3   : > { %v3512_v23 = vpop.f32.mrb[6].mxu1 }
 0x4a4   : > { %4223 = vrcp.f32 %v3512_v23  ;;  %v1200_v24 = vpop.f32.mrb[7].mxu1  ;;  %v1355_v23 = vld [vmem:[#allocation17 + $0x58] sm:$0xff] }
 0x4a5   : > { %4225 = vrcp.f32 %v1200_v24  ;;  %v3945_v24 = vpack.c.bf16 %v1355_v23, %v1354_v22  ;;  %v1368_v22 = vld [vmem:[#allocation18 + $0x40] sm:$0xff]  ;;  %v1369_v23 = vld [vmem:[#allocation18 + $0x48] sm:$0xff] }
 0x4aa   : > { %v4220_v25 = vpop.eup %4219 }
 0x4ab   : > { %v4222_v26 = vpop.eup %4221  ;;  %v1214_v34 = vmul.f32 %v4220_v25, %v4214_v31  ;;  %v1347_v31 = vld [vmem:[#allocation17 + $0x18] sm:$0xff]  ;;  %v1356_v25 = vld [vmem:[#allocation17 + $0x60] sm:$0xff] }
 0x4ac   : > { %v1213_v27 = vmul.f32 %v4222_v26, %v4212_v30  ;;  %v1346_v30 = vld [vmem:[#allocation17 + $0x10] sm:$0xff]  ;;  %v1357_v26 = vld [vmem:[#allocation17 + $0x68] sm:$0xff] }
 0x4ad   : > { %v3929_v4 = vpack.c.bf16 %v1347_v31, %v1346_v30 }
 0x4ae   : > { %v4224_v35 = vpop.eup %4223  ;;  %3545 = vmatprep.mubr.f32.mxu0 %v1213_v27  ;;  %v3949_v27 = vpack.c.bf16 %v1357_v26, %v1356_v25  ;;  %v1370_v25 = vld [vmem:[#allocation18 + $0x50] sm:$0xff]  ;;  %v1371_v26 = vld [vmem:[#allocation18 + $0x58] sm:$0xff] }
 0x4af   : > { %v4226_v36 = vpop.eup %4225  ;;  %3546 = vmatmul.mubr.f32.vlgmr.msra.gmra.mrb[8].mxu0 %v1214_v34  ;;  %v1216_v41 = vmul.f32 %v4224_v35, %v4218_v33  ;;  %v1358_v34 = vld [vmem:[#allocation17 + $0x70] sm:$0xff]  ;;  %v1359_v35 = vld [vmem:[#allocation17 + $0x78] sm:$0xff] }
 0x4b0   : > { %v1215_v37 = vmul.f32 %v4226_v36, %v4216_v32  ;;  %v1349_v32 = vld [vmem:[#allocation17 + $0x28] sm:$0xff]  ;;  %3928 = vmatpush3.bf16.msra.mxu0 %v3925_v54  ;;  %v3953_v36 = vpack.c.bf16 %v1359_v35, %v1358_v34 }
 0x4b1   : > { %3930 = vmatprep.subr.bf16.mxu0 %v3929_v4  ;;  %v3933_v33 = vpack.c.bf16 %v1349_v32, %v1348_v7  ;;  %v1364_v32 = vld [vmem:[#allocation18 + $0x20] sm:$0xff]  ;;  %v1373_v34 = vld [vmem:[#allocation18 + $0x68] sm:$0xff] }
 0x4b2   : > { %3548 = vmatprep.mubr.f32.mxu0 %v1215_v37  ;;  %v3184_v37 = vld [vmem:[%s5717_s25] ss:$0 sm:$0xff] }
 0x4b3   : > { %3549 = vmatmul.mubr.f32.gmra.mrb[10].mxu0 %v1216_v41 }
 0x4b4   : > { %3932 = vmatpush3.bf16.msra.mxu0 %v3929_v4  ;;  %v3961_v4 = vpack.c.bf16 %v1363_v51, %v1362_v50 }
 0x4b5   : > { %3934 = vmatprep.subr.bf16.mxu0 %v3933_v33 }
 0x4b8   : > { %3936 = vmatpush3.bf16.msra.mxu0 %v3933_v33  ;;  %v1365_v33 = vld [vmem:[#allocation18 + $0x28] sm:$0xff] }
 0x4b9   : > { %3938 = vmatprep.subr.bf16.mxu0 %v3937_v16 }
 0x4bc   : > { %3940 = vmatpush3.bf16.msra.mxu0 %v3937_v16  ;;  %v3965_v16 = vpack.c.bf16 %v1365_v33, %v1364_v32 }
 0x4bd   : > { %3942 = vmatprep.subr.bf16.mxu0 %v3941_v21 }
 0x4c0   : > { %3944 = vmatpush3.bf16.msra.mxu0 %v3941_v21  ;;  %v3969_v21 = vpack.c.bf16 %v1367_v18, %v1366_v17 }
 0x4c1   : > { %3946 = vmatprep.subr.bf16.mxu0 %v3945_v24 }
 0x4c4   : > { %3948 = vmatpush3.bf16.msra.mxu0 %v3945_v24  ;;  %v3973_v24 = vpack.c.bf16 %v1369_v23, %v1368_v22 }
 0x4c5   : > { %3950 = vmatprep.subr.bf16.mxu0 %v3949_v27 }
 0x4c8   : > { %3952 = vmatpush3.bf16.msra.mxu0 %v3949_v27  ;;  %v1372_v27 = vld [vmem:[#allocation18 + $0x60] sm:$0xff] }
 0x4c9   : > { %3954 = vmatprep.subr.bf16.mxu0 %v3953_v36  ;;  %v3981_v35 = vpack.c.bf16 %v1373_v34, %v1372_v27 }
 0x4cc   : > { %3956 = vmatpush3.bf16.msra.mxu0 %v3953_v36  ;;  %v1374_v36 = vld [vmem:[#allocation18 + $0x70] sm:$0xff] }
 0x4cd   : > { %3990 = vmatprep.subr.bf16.mxu0 %v5216_v38 }
 0x582   : > { %v3547_v41 = vpop.f32.mrb[8].mxu0 }
 0x583   : > { %v1311_v44 = vadd.f32 %v3547_v41, %v3184_v37  ;;  %v1305_v45 = vpop.f32.mrb[9].mxu0 }
 0x584   : > { %v1306_v49 = vadd.f32 %v3184_v37, %v1305_v45 }
 0x585   : > { %v1325_v1 = vmax.f32 %v1311_v44, 0.0 }
 0x586   : > { %v1324_v53 = vmax.f32 %v1306_v49, 0.0  ;;  %v3550_v54 = vpop.f32.mrb[10].mxu0 }
 0x587   : > { %v1321_v30 = vadd.f32 %v3550_v54, %v3184_v37  ;;  %v1315_v31 = vpop.f32.mrb[11].mxu0 }
 0x588   : > { %v1316_v7 = vadd.f32 %v3184_v37, %v1315_v31  ;;  %3583 = vmatprep.mubr.f32.mxu1 %v1324_v53  ;;  %v1375_v37 = vld [vmem:[#allocation18 + $0x78] sm:$0xff] }
 0x589   : > { %3584 = vmatmul.mubr.f32.vlgmr.msra.gmra.mrb[8].mxu1 %v1325_v1  ;;  %v1327_v15 = vmax.f32 %v1321_v30, 0.0  ;;  %v3985_v41 = vpack.c.bf16 %v1375_v37, %v1374_v36 }
 0x58a   : > { %v1326_v14 = vmax.f32 %v1316_v7, 0.0  ;;  %3960 = vmatpush3.bf16.msra.mxu1 %v3957_v3  ;;  %v3977_v3 = vpack.c.bf16 %v1371_v26, %v1370_v25 }
 0x58b   : > { %3962 = vmatprep.subr.bf16.mxu1 %v3961_v4 }
 0x58c   : > { %3586 = vmatprep.mubr.f32.mxu1 %v1326_v14 }
 0x58d   : > { %3587 = vmatmul.mubr.f32.gmra.mrb[10].mxu1 %v1327_v15 }
 0x58e   : > { %3964 = vmatpush3.bf16.msra.mxu1 %v3961_v4 }
 0x58f   : > { %3966 = vmatprep.subr.bf16.mxu1 %v3965_v16 }
 0x592   : > { %3968 = vmatpush3.bf16.msra.mxu1 %v3965_v16 }
 0x593   : > { %3970 = vmatprep.subr.bf16.mxu1 %v3969_v21 }
 0x596   : > { %3972 = vmatpush3.bf16.msra.mxu1 %v3969_v21 }
 0x597   : > { %3974 = vmatprep.subr.bf16.mxu1 %v3973_v24 }
 0x59a   : > { %3976 = vmatpush3.bf16.msra.mxu1 %v3973_v24 }
 0x59b   : > { %3978 = vmatprep.subr.bf16.mxu1 %v3977_v3 }
 0x59e   : > { %3980 = vmatpush3.bf16.msra.mxu1 %v3977_v3 }
 0x59f   : > { %3982 = vmatprep.subr.bf16.mxu1 %v3981_v35 }
 0x5a2   : > { %3984 = vmatpush3.bf16.msra.mxu1 %v3981_v35 }
 0x5a3   : > { %3986 = vmatprep.subr.bf16.mxu1 %v3985_v41 }
 0x5a6   : > { %3988 = vmatpush3.bf16.msra.mxu1 %v3985_v41 }
 0x65c   : > { %v3585_v44 = vpop.f32.mrb[8].mxu1 }
 0x65d   : > { %v1443_v45 = vpop.f32.mrb[9].mxu1  ;;  %v1775_v49 = vmul.f32 %v3585_v44, %v5168_v55  ;;  %v1779_v50 = vmul.f32 %v3585_v44, %v5170_v56  ;;  %v1783_v51 = vmul.f32 %v3585_v44, %v5172_v57  ;;  %v1787_v53 = vmul.f32 %v3585_v44, %v5174_v58 }
 0x65e   : > { %3621 = vmatprep.mubr.f32.mxu0 %v1443_v45  ;;  %3659 = vmatprep.mubr.f32.mxu1 %v1443_v45  ;;  %v1774_v54 = vmul.f32 %v1443_v45, %v5176_v59  ;;  %v1778_v1 = vmul.f32 %v1443_v45, %v5178_v60  ;;  %v1782_v30 = vmul.f32 %v1443_v45, %v5180_v61 }
 0x65f   : > { %3622 = vmatmul.mubr.f32.vlgmr.msra.gmra.mrb[12].mxu0 %v3585_v44  ;;  %3660 = vmatmul.mubr.f32.vlgmr.msra.gmra.mrb[12].mxu1 %v3585_v44  ;;  %v1786_v31 = vmul.f32 %v1443_v45, %v5182_v63 }
 0x660   : > { %v3588_v4 = vpop.f32.mrb[10].mxu1  ;;  %v4021_v55 = vpack.c.bf16 %v1775_v49, %v1774_v54  ;;  %v4029_v7 = vpack.c.bf16 %v1779_v50, %v1778_v1  ;;  %v4037_v56 = vpack.c.bf16 %v1783_v51, %v1782_v30  ;;  %3992 = vmatpush3.bf16.msra.mxu0 %v5216_v38 }
 0x661   : > { %v1453_v57 = vpop.f32.mrb[11].mxu1  ;;  %v1777_v58 = vmul.f32 %v3588_v4, %v5189_v6  ;;  %v1781_v32 = vmul.f32 %v3588_v4, %v5192_v8  ;;  %v1785_v59 = vmul.f32 %v3588_v4, %v5195_v10  ;;  %v4045_v60 = vpack.c.bf16 %v1787_v53, %v1786_v31  ;;  %3994 = vmatprep.subr.bf16.mxu0 %v5218_v40 }
 0x662   : > { %3624 = vmatprep.mubr.f32.mxu0 %v1453_v57  ;;  %3662 = vmatprep.mubr.f32.mxu1 %v1453_v57  ;;  %v1776_v61 = vmul.f32 %v1453_v57, %v5197_v11  ;;  %v1780_v63 = vmul.f32 %v1453_v57, %v5199_v12  ;;  %v1784_v33 = vmul.f32 %v1453_v57, %v5201_v13 }
 0x663   : > { %4022 = vmatprep.subr.bf16.mxu1 %v4021_v55  ;;  %3625 = vmatmul.mubr.f32.gmra.mrb[14].mxu0 %v3588_v4  ;;  %v1788_v38 = vmul.f32 %v1453_v57, %v5204_v19  ;;  %v1789_v6 = vmul.f32 %v3588_v4, %v5206_v20 }
 0x664   : > { %3663 = vmatmul.mubr.f32.gmra.mrb[14].mxu1 %v3588_v4  ;;  %v4025_v8 = vpack.c.bf16 %v1777_v58, %v1776_v61  ;;  %v4033_v10 = vpack.c.bf16 %v1781_v32, %v1780_v63  ;;  %v4041_v14 = vpack.c.bf16 %v1785_v59, %v1784_v33  ;;  %3996 = vmatpush3.bf16.msra.mxu0 %v5218_v40 }
 0x665   : > { %4024 = vmatpush3.bf16.msra.mxu1 %v4021_v55  ;;  %v4049_v15 = vpack.c.bf16 %v1789_v6, %v1788_v38  ;;  %3998 = vmatprep.subr.bf16.mxu0 %v5223_v43 }
 0x666   : > { %4026 = vmatprep.subr.bf16.mxu1 %v4025_v8 }
 0x668   : > { %4000 = vmatpush3.bf16.msra.mxu0 %v5223_v43 }
 0x669   : > { %4028 = vmatpush3.bf16.msra.mxu1 %v4025_v8  ;;  %4002 = vmatprep.subr.bf16.mxu0 %v5227_v46 }
 0x66a   : > { %4030 = vmatprep.subr.bf16.mxu1 %v4029_v7 }
 0x66c   : > { %4004 = vmatpush3.bf16.msra.mxu0 %v5227_v46 }
 0x66d   : > { %4032 = vmatpush3.bf16.msra.mxu1 %v4029_v7  ;;  %4006 = vmatprep.subr.bf16.mxu0 %v5256_v52 }
 0x66e   : > { %4034 = vmatprep.subr.bf16.mxu1 %v4033_v10 }
 0x670   : > { %4008 = vmatpush3.bf16.msra.mxu0 %v5256_v52 }
 0x671   : > { %4036 = vmatpush3.bf16.msra.mxu1 %v4033_v10  ;;  %4010 = vmatprep.subr.bf16.mxu0 %v5260_v0 }
 0x672   : > { %4038 = vmatprep.subr.bf16.mxu1 %v4037_v56 }
 0x674   : > { %4012 = vmatpush3.bf16.msra.mxu0 %v5260_v0 }
 0x675   : > { %4040 = vmatpush3.bf16.msra.mxu1 %v4037_v56  ;;  %4014 = vmatprep.subr.bf16.mxu0 %v5264_v5 }
 0x676   : > { %4042 = vmatprep.subr.bf16.mxu1 %v4041_v14 }
 0x678   : > { %4016 = vmatpush3.bf16.msra.mxu0 %v5264_v5 }
 0x679   : > { %4044 = vmatpush3.bf16.msra.mxu1 %v4041_v14  ;;  %4018 = vmatprep.subr.bf16.mxu0 %v5266_v9 }
 0x67a   : > { %4046 = vmatprep.subr.bf16.mxu1 %v4045_v60 }
 0x67c   : > { %4020 = vmatpush3.bf16.msra.mxu0 %v5266_v9 }
 0x67d   : > { %4048 = vmatpush3.bf16.msra.mxu1 %v4045_v60 }
 0x67e   : > { %4050 = vmatprep.subr.bf16.mxu1 %v4049_v15 }
 0x681   : > { %4052 = vmatpush3.bf16.msra.mxu1 %v4049_v15 }
 0x732   : > { %v3623_v11 = vpop.f32.mrb[12].mxu0  ;;  %v3661_v12 = vpop.f32.mrb[12].mxu1 }
 0x733   : > { %v1548_v13 = vmul.f32 %v3623_v11, %v5232_v47  ;;  %v1528_v19 = vpop.f32.mrb[13].mxu0  ;;  %v1626_v20 = vpop.f32.mrb[13].mxu1 }
 0x734   : > { %v1547_v40 = vmul.f32 %v1528_v19, %v5234_v48 }
 0x736   : > { %v1551_v43 = vadd.f32 %v1548_v13, %v1547_v40  ;;  %v3626_v46 = vpop.f32.mrb[14].mxu0 }
 0x737   : > { %v3664_v52 = vpop.f32.mrb[14].mxu1  ;;  %v1538_v0 = vpop.f32.mrb[15].mxu0  ;;  %v1550_v9 = vmul.f32 %v3626_v46, %v5240_v2 }
 0x738   : > { %v1549_v5 = vmul.f32 %v1538_v0, %v5238_v62  ;;  %v1636_v16 = vpop.f32.mrb[15].mxu1 }
 0x73a   : > { %v1552_v17 = vadd.f32 %v1551_v43, %v1549_v5 }
 0x73c   : > { %v1553_v18 = vadd.f32 %v1552_v17, %v1550_v9 }
 0x73e   : > { %v1554_v21 = vrot.slane %v1553_v18, 4 }
 0x740   : > { %v1555_v22 = vadd.f32 %v1554_v21, %v1553_v18 }
 0x742   : > { %v1556_v23 = vrot.slane %v1555_v22, 2 }
 0x744   : > { %v1557_v24 = vadd.f32 %v1556_v23, %v1555_v22 }
 0x746   : > { %v1558_v47 = vrot.slane %v1557_v24, 1 }
 0x748   : > { %v1559_v25 = vadd.f32 %v1558_v47, %v1557_v24 }
 0x74a   : > { %v1637_v26 = vadd.f32 %v1636_v16, %v1559_v25  ;;  %v1632_v3 = vadd.f32 %v3661_v12, %v1559_v25  ;;  %v1627_v48 = vadd.f32 %v1626_v20, %v1559_v25  ;;  %v1642_v27 = vadd.f32 %v3664_v52, %v1559_v25  ;;  %v3185_v12 = vld [vmem:[%s5718_s0] ss:$0 sm:$0xff] }
 0x74c   : > { %v1651_v34 = vmul.f32 0.2, %v1637_v26  ;;  %vm1646_vm5 = vcmp.gt.f32.partialorder %v1632_v3, 0.0  ;;  %v1650_v35 = vmul.f32 0.2, %v1632_v3  ;;  %vm1645_vm6 = vcmp.gt.f32.partialorder %v1627_v48, 0.0 }
 0x74d   : > { %v1649_v62 = vmul.f32 0.2, %v1627_v48  ;;  %vm1648_vm7 = vcmp.gt.f32.partialorder %v1642_v27, 0.0  ;;  %v1652_v36 = vmul.f32 0.2, %v1642_v27  ;;  %vm1647_vm8 = vcmp.gt.f32.partialorder %v1637_v26, 0.0 }
 0x74e   : > { %v1654_v2 = vsel %vm1646_vm5, %v1632_v3, %v1650_v35  ;;  %v1655_v49 = vsel %vm1647_vm8, %v1637_v26, %v1651_v34 }
 0x74f   : > { %v1658_v37 = vadd.f32 %v1654_v2, %v5252_v42  ;;  %v1653_v41 = vsel %vm1645_vm6, %v1627_v48, %v1649_v62  ;;  %v1656_v45 = vsel %vm1648_vm7, %v1642_v27, %v1652_v36  ;;  %v1659_v51 = vadd.f32 %v1655_v49, %v5244_v28 }
 0x750   : > { %v1657_v44 = vadd.f32 %v1653_v41, %v5246_v29  ;;  %v1660_v50 = vadd.f32 %v1656_v45, %v5250_v39 }
 0x751   : > { %1663 = vmax.xlane.f32.xlu1 %v1658_v37 }
 0x752   : > { %1661 = vmax.xlane.f32.xlu0 %v1657_v44 }
 0x755   : > { %1667 = vmax.xlane.f32.xlu1 %v1660_v50 }
 0x756   : > { %1665 = vmax.xlane.f32.xlu0 %v1659_v51 }
 0x7de   : > { %v1664_v53 = vpop.xlane.xlu1 %1663 }
 0x7df   : > { %v1670_v54 = vsub.f32 %v1658_v37, %v1664_v53  ;;  %v1662_v1 = vpop.xlane.xlu0 %1661 }
 0x7e0   : > { %v1669_v30 = vsub.f32 %v1657_v44, %v1662_v1 }
 0x7e1   : > { %v1675_v31 = vmul.f32 1.442695, %v1670_v54 }
 0x7e2   : > { %v1673_v4 = vmul.f32 1.442695, %v1669_v30  ;;  %v1668_v42 = vpop.xlane.xlu1 %1667 }
 0x7e3   : > { %4227 = vpow2.f32 %v1675_v31  ;;  %v1672_v55 = vsub.f32 %v1660_v50, %v1668_v42  ;;  %v1666_v29 = vpop.xlane.xlu0 %1665 }
 0x7e4   : > { %4229 = vpow2.f32 %v1673_v4  ;;  %v1671_v7 = vsub.f32 %v1659_v51, %v1666_v29 }
 0x7e5   : > { %v1679_v56 = vmul.f32 1.442695, %v1672_v55 }
 0x7e6   : > { %v1677_v57 = vmul.f32 1.442695, %v1671_v7 }
 0x7e7   : > { %4231 = vpow2.f32 %v1679_v56 }
 0x7e8   : > { %4233 = vpow2.f32 %v1677_v57 }
 0x7ed   : > { %v4228_v39 = vpop.eup %4227 }
 0x7ee   : > { %v4230_v28 = vpop.eup %4229 }
 0x7ef   : > { %3697 = vmatprep.mubr.f32.mxu0 %v4230_v28 }
 0x7f0   : > { %3698 = vmatmul.mubr.f32.vlgmr.msra.gmra.mrb[16].mxu0 %v4228_v39 }
 0x7f1   : > { %v4232_v58 = vpop.eup %4231 }
 0x7f2   : > { %v4234_v32 = vpop.eup %4233 }
 0x7f3   : > { %3700 = vmatprep.mubr.f32.mxu0 %v4234_v32 }
 0x7f4   : > { %3701 = vmatmul.mubr.f32.gmra.mrb[18].mxu0 %v4232_v58 }
 0x8c3   : > { %v3699_v59 = vpop.f32.mrb[16].mxu0 }
 0x8c4   : > { %4235 = vrcp.f32 %v3699_v59  ;;  %v1747_v60 = vpop.f32.mrb[17].mxu0 }
 0x8c5   : > { %4237 = vrcp.f32 %v1747_v60 }
 0x8c7   : > { %v3702_v61 = vpop.f32.mrb[18].mxu0 }
 0x8c8   : > { %4239 = vrcp.f32 %v3702_v61  ;;  %v1757_v63 = vpop.f32.mrb[19].mxu0 }
 0x8c9   : > { %4241 = vrcp.f32 %v1757_v63 }
 0x8ce   : > { %v4236_v33 = vpop.eup %4235 }
 0x8cf   : > { %v4238_v38 = vpop.eup %4237  ;;  %v1771_v8 = vmul.f32 %v4236_v33, %v4228_v39 }
 0x8d0   : > { %v1770_v6 = vmul.f32 %v4238_v38, %v4230_v28 }
 0x8d2   : > { %v4240_v10 = vpop.eup %4239  ;;  %3735 = vmatprep.mubr.f32.mxu1 %v1770_v6 }
 0x8d3   : > { %v4242_v14 = vpop.eup %4241  ;;  %3736 = vmatmul.mubr.f32.vlgmr.msra.gmra.mrb[16].mxu1 %v1771_v8  ;;  %v1773_v11 = vmul.f32 %v4240_v10, %v4232_v58 }
 0x8d4   : > { %v1772_v15 = vmul.f32 %v4242_v14, %v4234_v32 }
 0x8d6   : > { %3738 = vmatprep.mubr.f32.mxu1 %v1772_v15 }
 0x8d7   : > { %3739 = vmatmul.mubr.f32.gmra.mrb[18].mxu1 %v1773_v11 }
 0x9a6   : > { %v3737_v13 = vpop.f32.mrb[16].mxu1 }
 0x9a7   : > { %v1868_v19 = vadd.f32 %v3737_v13, %v3185_v12  ;;  %v1862_v20 = vpop.f32.mrb[17].mxu1 }
 0x9a8   : > { %v1863_v40 = vadd.f32 %v3185_v12, %v1862_v20 }
 0x9a9   : > { %1882 = vst [vmem:[#allocation2 + $0x8] sm:$0xff] %v1868_v19 }
 0x9aa   : > { %1881 = vst [vmem:[#allocation2] sm:$0xff] %v1863_v40  ;;  %v3740_v43 = vpop.f32.mrb[18].mxu1 }
 0x9ab   : > { %v1878_v46 = vadd.f32 %v3740_v43, %v3185_v12  ;;  %v1872_v52 = vpop.f32.mrb[19].mxu1 }
 0x9ac   : > { %v1873_v0 = vadd.f32 %v3185_v12, %v1872_v52 }
 0x9ad   : > { %1884 = vst [vmem:[#allocation2 + $0x18] sm:$0xff] %v1878_v46 }
 0x9ae   : > { %1883 = vst [vmem:[#allocation2 + $0x10] sm:$0xff] %v1873_v0 }
 0x9af PF: > { %v1890_v5 = vld [vmem:[%s5131_s20 + $0x8] sm:$0xff]  ;;  %v1889_v16 = vld [vmem:[%s5131_s20] sm:$0xff]  ;;  %v4661_v21 = vmov 0   ;;  %v1907_v22 = vld [vmem:[%s5131_s20 + $0x90] sm:$0xff]  ;;  %s2968_s28 = sshll.u32 %s5148_s1, 4  ;;  %s5719_s2 = sld [smem:[#allocation41_spill]]  ;;  %s5600_s28 = int_to_ptr.vmem [resolvable:$true] %s2968_s28 }
 0x9b0   : > { %v1958_v9 = vunpack.c.l.s8.bf16 %v1890_v5  ;;  %v1975_v17 = vunpack.c.h.s8.bf16 %v1890_v5  ;;  %v1957_v18 = vunpack.c.l.s8.bf16 %v1889_v16  ;;  %2127 = vmatprep.mubr.bf16.mxu0 %v4661_v21  ;;  %2180 = vmatprep.mubr.bf16.mxu1 %v4661_v21  ;;  %v1892_v23 = vld [vmem:[%s5131_s20 + $0x18] sm:$0xff]  ;;  %v1891_v24 = vld [vmem:[%s5131_s20 + $0x10] sm:$0xff]  ;;  %v1974_v47 = vunpack.c.h.s8.bf16 %v1889_v16  ;;  %v1906_v27 = vld [vmem:[%s5131_s20 + $0x88] sm:$0xff]  ;;  %s4553_s26 = scalar_lea.vmem %s5600_s28, 8704  ;;  %p5721_p7 = scmp.ne.s32.totalorder %s5695_s8, 0 }
 0x9b1   : > { %v1960_v25 = vunpack.c.l.s8.bf16 %v1892_v23  ;;  %v1977_v26 = vunpack.c.h.s8.bf16 %v1892_v23  ;;  %v1959_v3 = vunpack.c.l.s8.bf16 %v1891_v24  ;;  %v1992_v48 = vunpack.c.l.s8.bf16 %v1907_v22  ;;  %v1909_v34 = vld [vmem:[%s5131_s20 + $0xa0] sm:$0xff]  ;;  %v1908_v2 = vld [vmem:[%s5131_s20 + $0x98] sm:$0xff]  ;;  %v1923_v51 = vld [vmem:[%s5131_s20 + $0x110] sm:$0xff]  ;;  %p4554_p6 = scmp.ne.s32.totalorder %s5600_s28, %s4553_s26  ;;  %s4662_s15 = smov [#allocation21]  }
 0x9b2   : > { %2095 = vmatprep.subr.bf16.mxu0 %v1958_v9  ;;  %v1976_v35 = vunpack.c.h.s8.bf16 %v1891_v24  ;;  %v1991_v62 = vunpack.c.l.s8.bf16 %v1906_v27  ;;  %v1994_v36 = vunpack.c.l.s8.bf16 %v1909_v34  ;;  %v2009_v37 = vunpack.c.h.s8.bf16 %v1907_v22  ;;  %v1924_v41 = vld [vmem:[%s5131_s20 + $0x118] sm:$0xff]  ;;  %v1926_v53 = vld [vmem:[%s5131_s20 + $0x128] sm:$0xff]  ;;  %v1925_v31 = vld [vmem:[%s5131_s20 + $0x120] sm:$0xff]  ;;  %s4557_s25 = sshll.u32 %s4662_s15, 4  ;;  %s4558_s25 = int_to_ptr.vmem [resolvable:$false] %s4557_s25 }
 0x9b3   : > { %2096 = vmatpush1.bf16.msra.mxu0 %v1957_v18  ;;  %2148 = vmatprep.subr.bf16.mxu1 %v1960_v25  ;;  %v1993_v44 = vunpack.c.l.s8.bf16 %v1908_v2  ;;  %v2008_v45 = vunpack.c.h.s8.bf16 %v1906_v27  ;;  %v2011_v49 = vunpack.c.h.s8.bf16 %v1909_v34  ;;  %v2026_v50 = vunpack.c.l.s8.bf16 %v1924_v41  ;;  %v1941_v42 = vld [vmem:[%s5131_s20 + $0x1a0] sm:$0xff]  ;;  %v1940_v57 = vld [vmem:[%s5131_s20 + $0x198] sm:$0xff]  ;;  %v1943_v39 = vld [vmem:[%s5131_s20 + $0x1b0] sm:$0xff]  ;;  %p4555_p3 = pnand %p4554_p6, %p5721_p7  ;;  %s4559_s19 = scalar_lea.vmem %s4558_s25, 17408 }
 0x9b4   : > { %2097 = vmatprep.subr.bf16.mxu0 %v1975_v17  ;;  %2149 = vmatpush1.bf16.msra.mxu1 %v1959_v3  ;;  %v2010_v54 = vunpack.c.h.s8.bf16 %v1908_v2  ;;  %v2025_v1 = vunpack.c.l.s8.bf16 %v1923_v51  ;;  %v2028_v30 = vunpack.c.l.s8.bf16 %v1926_v53  ;;  %v2043_v4 = vunpack.c.h.s8.bf16 %v1924_v41  ;;  %v1942_v59 = vld [vmem:[%s5131_s20 + $0x1a8] sm:$0xff]  ;;  %v1885_v38 = vld [vmem:[#allocation2] sm:$0xff]  ;;  %v1886_v6 = vld [vmem:[#allocation2 + $0x8] sm:$0xff]  ;;  %p4560_p8 = scmp.lt.s32.totalorder %s5600_s28, %s4558_s25  ;;  %p4561_p11 = scmp.lt.s32.totalorder %s4559_s19, %s4553_s26 }
 0x9b5   : > { %2150 = vmatprep.subr.bf16.mxu1 %v1977_v26  ;;  %v2027_v55 = vunpack.c.l.s8.bf16 %v1925_v31  ;;  %v2042_v29 = vunpack.c.h.s8.bf16 %v1923_v51  ;;  %v2045_v7 = vunpack.c.h.s8.bf16 %v1926_v53  ;;  %v2060_v56 = vunpack.c.l.s8.bf16 %v1941_v42  ;;  %v1894_v61 = vld [vmem:[%s5131_s20 + $0x28] sm:$0xff]  ;;  %v1893_v14 = vld [vmem:[%s5131_s20 + $0x20] sm:$0xff]  ;;  %v1896_v15 = vld [vmem:[%s5131_s20 + $0x38] sm:$0xff]  ;;  %p4556_p5 = pneg %p4555_p3 }
 0x9b6   : > { %v2044_v28 = vunpack.c.h.s8.bf16 %v1925_v31  ;;  %v2059_v58 = vunpack.c.l.s8.bf16 %v1940_v57  ;;  %v2062_v32 = vunpack.c.l.s8.bf16 %v1943_v39  ;;  %v2077_v60 = vunpack.c.h.s8.bf16 %v1941_v42  ;;  %v1895_v19 = vld [vmem:[%s5131_s20 + $0x30] sm:$0xff]  ;;  %v1887_v0 = vld [vmem:[#allocation2 + $0x10] sm:$0xff]  ;;  %v1888_v5 = vld [vmem:[#allocation2 + $0x18] sm:$0xff]  ;;  %p4562_p10 = por %p4561_p11, %p4560_p8 }
 0x9b7   : > { %2098 = vmatpush1.bf16.msra.mxu0 %v1974_v47  ;;  %v2061_v63 = vunpack.c.l.s8.bf16 %v1942_v59  ;;  %v2076_v33 = vunpack.c.h.s8.bf16 %v1940_v57  ;;  %v2079_v8 = vunpack.c.h.s8.bf16 %v1943_v39  ;;  %v1962_v10 = vunpack.c.l.s8.bf16 %v1894_v61  ;;  %v1911_v43 = vld [vmem:[%s5131_s20 + $0xb0] sm:$0xff]  ;;  %v1910_v17 = vld [vmem:[%s5131_s20 + $0xa8] sm:$0xff]  ;;  %v1913_v18 = vld [vmem:[%s5131_s20 + $0xc0] sm:$0xff] }
 0x9b8   : > { %2099 = vmatprep.subr.bf16.mxu0 %v1992_v48  ;;  %2151 = vmatpush1.bf16.msra.mxu1 %v1976_v35  ;;  %v5339_v11 = vpack.c.bf16 %v1886_v6, %v1885_v38  ;;  %v2078_v12 = vunpack.c.h.s8.bf16 %v1942_v59  ;;  %v1961_v13 = vunpack.c.l.s8.bf16 %v1893_v14  ;;  %v1979_v20 = vunpack.c.h.s8.bf16 %v1894_v61  ;;  %v1912_v25 = vld [vmem:[%s5131_s20 + $0xb8] sm:$0xff]  ;;  %v1899_v61 = vld [vmem:[%s5131_s20 + $0x50] sm:$0xff]  ;;  %p4563_p12 = pnand %p4562_p10, %p4556_p5 }
 0x9b9   : > { %2152 = vmatprep.subr.bf16.mxu1 %v1994_v36  ;;  %v1964_v40 = vunpack.c.l.s8.bf16 %v1896_v15  ;;  %v1963_v46 = vunpack.c.l.s8.bf16 %v1895_v19  ;;  %v1978_v52 = vunpack.c.h.s8.bf16 %v1893_v14  ;;  %v1981_v16 = vunpack.c.h.s8.bf16 %v1896_v15  ;;  %v1928_v3 = vld [vmem:[%s5131_s20 + $0x138] sm:$0xff]  ;;  %v1930_v36 = vld [vmem:[%s5131_s20 + $0x148] sm:$0xff]  ;;  %v1915_v38 = vld [vmem:[%s5131_s20 + $0xd0] sm:$0xff] }
 0x9ba   : > { %v1996_v9 = vunpack.c.l.s8.bf16 %v1911_v43  ;;  %v5348_v22 = vpack.c.bf16 %v1888_v5, %v1887_v0  ;;  %v1980_v23 = vunpack.c.h.s8.bf16 %v1895_v19  ;;  %v1995_v24 = vunpack.c.l.s8.bf16 %v1910_v17  ;;  %v1914_v15 = vld [vmem:[%s5131_s20 + $0xc8] sm:$0xff] }
 0x9bb   : > { %2100 = vmatpush1.bf16.msra.mxu0 %v1991_v62  ;;  %v1998_v47 = vunpack.c.l.s8.bf16 %v1913_v18  ;;  %v2013_v26 = vunpack.c.h.s8.bf16 %v1911_v43  ;;  %v1997_v48 = vunpack.c.l.s8.bf16 %v1912_v25  ;;  %v2012_v27 = vunpack.c.h.s8.bf16 %v1910_v17  ;;  %v1927_v62 = vld [vmem:[%s5131_s20 + $0x130] sm:$0xff]  ;;  %v1934_v17 = vld [vmem:[%s5131_s20 + $0x168] sm:$0xff] }
 0x9bc   : > { %2101 = vmatprep.subr.bf16.mxu0 %v2009_v37  ;;  %2153 = vmatpush1.bf16.msra.mxu1 %v1993_v44  ;;  %v2015_v34 = vunpack.c.h.s8.bf16 %v1913_v18  ;;  %v2030_v35 = vunpack.c.l.s8.bf16 %v1928_v3  ;;  %v2014_v2 = vunpack.c.h.s8.bf16 %v1912_v25  ;;  %v2029_v37 = vunpack.c.l.s8.bf16 %v1927_v62  ;;  %v1929_v44 = vld [vmem:[%s5131_s20 + $0x140] sm:$0xff] }
 0x9bd   : > { %2154 = vmatprep.subr.bf16.mxu1 %v2011_v49  ;;  %v2032_v41 = vunpack.c.l.s8.bf16 %v1930_v36  ;;  %v1945_v49 = vld [vmem:[%s5131_s20 + $0x1c0] sm:$0xff]  ;;  %v2046_v51 = vunpack.c.h.s8.bf16 %v1927_v62  ;;  %v2049_v53 = vunpack.c.h.s8.bf16 %v1930_v36  ;;  %v2048_v31 = vunpack.c.h.s8.bf16 %v1929_v44  ;;  %v1951_v62 = vld [vmem:[%s5131_s20 + $0x1f0] sm:$0xff] }
 0x9be   : > { %v1967_v6 = vunpack.c.l.s8.bf16 %v1899_v61  ;;  %v2000_v14 = vunpack.c.l.s8.bf16 %v1915_v38  ;;  %v1999_v19 = vunpack.c.l.s8.bf16 %v1914_v15  ;;  %v2017_v43 = vunpack.c.h.s8.bf16 %v1915_v38 }
 0x9bf   : > { %2102 = vmatpush1.bf16.msra.mxu0 %v2008_v45  ;;  %v2047_v45 = vunpack.c.h.s8.bf16 %v1928_v3  ;;  %v2016_v0 = vunpack.c.h.s8.bf16 %v1914_v15  ;;  %v1938_v15 = vld [vmem:[%s5131_s20 + $0x188] sm:$0xff] }
 0x9c0   : > { %2103 = vmatprep.subr.bf16.mxu0 %v2026_v50  ;;  %2155 = vmatpush1.bf16.msra.mxu1 %v2010_v54  ;;  %v2031_v50 = vunpack.c.l.s8.bf16 %v1929_v44  ;;  %v2064_v54 = vunpack.c.l.s8.bf16 %v1945_v49 }
 0x9c1   : > { %2156 = vmatprep.subr.bf16.mxu1 %v2028_v30  ;;  %v1947_v30 = vld [vmem:[%s5131_s20 + $0x1d0] sm:$0xff] }
 0x9c2   : > { %v2066_v42 = vunpack.c.l.s8.bf16 %v1947_v30  ;;  %v2083_v39 = vunpack.c.h.s8.bf16 %v1947_v30 }
 0x9c3   : > { %2104 = vmatpush1.bf16.msra.mxu0 %v2025_v1  ;;  %v1944_v1 = vld [vmem:[%s5131_s20 + $0x1b8] sm:$0xff] }
 0x9c4   : > { %2105 = vmatprep.subr.bf16.mxu0 %v2043_v4  ;;  %2157 = vmatpush1.bf16.msra.mxu1 %v2027_v55  ;;  %v2063_v4 = vunpack.c.l.s8.bf16 %v1944_v1  ;;  %v1946_v55 = vld [vmem:[%s5131_s20 + $0x1c8] sm:$0xff]  ;;  %v2080_v57 = vunpack.c.h.s8.bf16 %v1944_v1  ;;  %v1904_v1 = vld [vmem:[%s5131_s20 + $0x78] sm:$0xff] }
 0x9c5   : > { %2158 = vmatprep.subr.bf16.mxu1 %v2045_v7  ;;  %v1898_v7 = vld [vmem:[%s5131_s20 + $0x48] sm:$0xff]  ;;  %v2082_v59 = vunpack.c.h.s8.bf16 %v1946_v55 }
 0x9c7   : > { %2106 = vmatpush1.bf16.msra.mxu0 %v2042_v29  ;;  %v2081_v29 = vunpack.c.h.s8.bf16 %v1945_v49 }
 0x9c8   : > { %2107 = vmatprep.subr.bf16.mxu0 %v2060_v56  ;;  %2159 = vmatpush1.bf16.msra.mxu1 %v2044_v28  ;;  %v2065_v56 = vunpack.c.l.s8.bf16 %v1946_v55  ;;  %v1966_v28 = vunpack.c.l.s8.bf16 %v1898_v7  ;;  %v1972_v55 = vunpack.c.l.s8.bf16 %v1904_v1 }
 0x9c9   : > { %2160 = vmatprep.subr.bf16.mxu1 %v2062_v32  ;;  %v1900_v32 = vld [vmem:[%s5131_s20 + $0x58] sm:$0xff] }
 0x9cb   : > { %2108 = vmatpush1.bf16.msra.mxu0 %v2059_v58  ;;  %v1897_v58 = vld [vmem:[%s5131_s20 + $0x40] sm:$0xff] }
 0x9cc   : > { %2109 = vmatprep.subr.bf16.mxu0 %v2077_v60  ;;  %2161 = vmatpush1.bf16.msra.mxu1 %v2061_v63  ;;  %v1965_v60 = vunpack.c.l.s8.bf16 %v1897_v58  ;;  %v1983_v63 = vunpack.c.h.s8.bf16 %v1898_v7 }
 0x9cd   : > { %2162 = vmatprep.subr.bf16.mxu1 %v2079_v8  ;;  %v1982_v8 = vunpack.c.h.s8.bf16 %v1897_v58  ;;  %v1921_v58 = vld [vmem:[%s5131_s20 + $0x100] sm:$0xff] }
 0x9cf   : > { %2110 = vmatpush1.bf16.msra.mxu0 %v2076_v33  ;;  %v1968_v33 = vunpack.c.l.s8.bf16 %v1900_v32 }
 0x9d0   : > { %2201 = vmatprep.subr.bf16.mxu0 %v1962_v10  ;;  %2163 = vmatpush1.bf16.msra.mxu1 %v2078_v12  ;;  %v1985_v10 = vunpack.c.h.s8.bf16 %v1900_v32  ;;  %v1917_v12 = vld [vmem:[%s5131_s20 + $0xe0] sm:$0xff] }
 0x9d1   : > { %2254 = vmatprep.subr.bf16.mxu1 %v1964_v40  ;;  %v1916_v40 = vld [vmem:[%s5131_s20 + $0xd8] sm:$0xff]  ;;  %v2019_v5 = vunpack.c.h.s8.bf16 %v1917_v12 }
 0x9d2   : > { %2128 = vmatmul.mubr.bf16.vlgmr.msra.gmra.mrb[0].mxu0 %v5339_v11  ;;  %v2018_v18 = vunpack.c.h.s8.bf16 %v1916_v40 }
 0x9d3   : > { %2202 = vmatpush1.bf16.msra.mxu0 %v1961_v13  ;;  %2137 = vmatprep.mubr.bf16.mxu0 %v4661_v21  ;;  %v1984_v13 = vunpack.c.h.s8.bf16 %v1899_v61  ;;  %v1920_v61 = vld [vmem:[%s5131_s20 + $0xf8] sm:$0xff] }
 0x9d4   : > { %2203 = vmatprep.subr.bf16.mxu0 %v1979_v20  ;;  %2181 = vmatmul.mubr.bf16.vlgmr.msra.gmra.mrb[0].mxu1 %v5339_v11  ;;  %v2002_v20 = vunpack.c.l.s8.bf16 %v1917_v12  ;;  %v2005_v38 = vunpack.c.l.s8.bf16 %v1920_v61  ;;  %v2022_v12 = vunpack.c.h.s8.bf16 %v1920_v61 }
 0x9d5   : > { %2255 = vmatpush1.bf16.msra.mxu1 %v1963_v46  ;;  %2190 = vmatprep.mubr.bf16.mxu1 %v4661_v21  ;;  %v1932_v46 = vld [vmem:[%s5131_s20 + $0x158] sm:$0xff] }
 0x9d6   : > { %2256 = vmatprep.subr.bf16.mxu1 %v1981_v16  ;;  %v2034_v16 = vunpack.c.l.s8.bf16 %v1932_v46  ;;  %v2051_v25 = vunpack.c.h.s8.bf16 %v1932_v46 }
 0x9d7   : > { %2204 = vmatpush1.bf16.msra.mxu0 %v1978_v52  ;;  %v2001_v52 = vunpack.c.l.s8.bf16 %v1916_v40 }
 0x9d8   : > { %2205 = vmatprep.subr.bf16.mxu0 %v1996_v9  ;;  %v1931_v9 = vld [vmem:[%s5131_s20 + $0x150] sm:$0xff] }
 0x9d9   : > { %2257 = vmatpush1.bf16.msra.mxu1 %v1980_v23  ;;  %v2033_v23 = vunpack.c.l.s8.bf16 %v1931_v9 }
 0x9da   : > { %2138 = vmatmul.mubr.bf16.gmra.mrb[4].mxu0 %v5348_v22  ;;  %2258 = vmatprep.subr.bf16.mxu1 %v1998_v47  ;;  %v1933_v47 = vld [vmem:[%s5131_s20 + $0x160] sm:$0xff] }
 0x9db   : > { %2206 = vmatpush1.bf16.msra.mxu0 %v1995_v24  ;;  %2233 = vmatprep.mubr.bf16.mxu0 %v4661_v21  ;;  %v2036_v24 = vunpack.c.l.s8.bf16 %v1934_v17  ;;  %v2035_v3 = vunpack.c.l.s8.bf16 %v1933_v47  ;;  %v2052_v36 = vunpack.c.h.s8.bf16 %v1933_v47 }
 0x9dc   : > { %2207 = vmatprep.subr.bf16.mxu0 %v2013_v26  ;;  %2191 = vmatmul.mubr.bf16.gmra.mrb[4].mxu1 %v5348_v22  ;;  %v1949_v26 = vld [vmem:[%s5131_s20 + $0x1e0] sm:$0xff] }
 0x9dd   : > { %2259 = vmatpush1.bf16.msra.mxu1 %v1997_v48  ;;  %2286 = vmatprep.mubr.bf16.mxu1 %v4661_v21  ;;  %v2050_v48 = vunpack.c.h.s8.bf16 %v1931_v9  ;;  %v2085_v44 = vunpack.c.h.s8.bf16 %v1949_v26  ;;  %v1955_v9 = vld [vmem:[%s5131_s20 + $0x210] sm:$0xff] }
 0x9de   : > { %2260 = vmatprep.subr.bf16.mxu1 %v2015_v34  ;;  %v2068_v34 = vunpack.c.l.s8.bf16 %v1949_v26 }
 0x9df   : > { %2208 = vmatpush1.bf16.msra.mxu0 %v2012_v27  ;;  %v2053_v27 = vunpack.c.h.s8.bf16 %v1934_v17 }
 0x9e0   : > { %2209 = vmatprep.subr.bf16.mxu0 %v2030_v35  ;;  %v1948_v35 = vld [vmem:[%s5131_s20 + $0x1d8] sm:$0xff] }
 0x9e1   : > { %2261 = vmatpush1.bf16.msra.mxu1 %v2014_v2  ;;  %v2067_v2 = vunpack.c.l.s8.bf16 %v1948_v35 }
 0x9e2   : > { %2262 = vmatprep.subr.bf16.mxu1 %v2032_v41  ;;  %v1950_v41 = vld [vmem:[%s5131_s20 + $0x1e8] sm:$0xff] }
 0x9e3   : > { %2210 = vmatpush1.bf16.msra.mxu0 %v2029_v37  ;;  %v2070_v37 = vunpack.c.l.s8.bf16 %v1951_v62  ;;  %v2069_v49 = vunpack.c.l.s8.bf16 %v1950_v41  ;;  %v2086_v30 = vunpack.c.h.s8.bf16 %v1950_v41 }
 0x9e4   : > { %2211 = vmatprep.subr.bf16.mxu0 %v2047_v45  ;;  %v1902_v45 = vld [vmem:[%s5131_s20 + $0x68] sm:$0xff] }
 0x9e5   : > { %2263 = vmatpush1.bf16.msra.mxu1 %v2031_v50  ;;  %v2084_v50 = vunpack.c.h.s8.bf16 %v1948_v35 }
 0x9e6   : > { %2264 = vmatprep.subr.bf16.mxu1 %v2049_v53  ;;  %v1970_v53 = vunpack.c.l.s8.bf16 %v1902_v45 }
 0x9e7   : > { %2212 = vmatpush1.bf16.msra.mxu0 %v2046_v51  ;;  %v2087_v51 = vunpack.c.h.s8.bf16 %v1951_v62  ;;  %v1922_v62 = vld [vmem:[%s5131_s20 + $0x108] sm:$0xff] }
 0x9e8   : > { %2213 = vmatprep.subr.bf16.mxu0 %v2064_v54  ;;  %v1901_v54 = vld [vmem:[%s5131_s20 + $0x60] sm:$0xff] }
 0x9e9   : > { %2265 = vmatpush1.bf16.msra.mxu1 %v2048_v31  ;;  %v1969_v31 = vunpack.c.l.s8.bf16 %v1901_v54 }
 0x9ea   : > { %2266 = vmatprep.subr.bf16.mxu1 %v2066_v42  ;;  %v1987_v42 = vunpack.c.h.s8.bf16 %v1902_v45  ;;  %v1956_v45 = vld [vmem:[%s5131_s20 + $0x218] sm:$0xff] }
 0x9eb   : > { %2214 = vmatpush1.bf16.msra.mxu0 %v2063_v4  ;;  %v1903_v4 = vld [vmem:[%s5131_s20 + $0x70] sm:$0xff] }
 0x9ec   : > { %2215 = vmatprep.subr.bf16.mxu0 %v2081_v29  ;;  %v1919_v29 = vld [vmem:[%s5131_s20 + $0xf0] sm:$0xff]  ;;  %v1971_v7 = vunpack.c.l.s8.bf16 %v1903_v4  ;;  %v1988_v32 = vunpack.c.h.s8.bf16 %v1903_v4 }
 0x9ed   : > { %2267 = vmatpush1.bf16.msra.mxu1 %v2065_v56  ;;  %v1986_v56 = vunpack.c.h.s8.bf16 %v1901_v54 }
 0x9ee   : > { %2268 = vmatprep.subr.bf16.mxu1 %v2083_v39  ;;  %v2004_v39 = vunpack.c.l.s8.bf16 %v1919_v29 }
 0x9ef   : > { %2216 = vmatpush1.bf16.msra.mxu0 %v2080_v57  ;;  %v1989_v57 = vunpack.c.h.s8.bf16 %v1904_v1  ;;  %v5436_v1 = vld [vmem:[%s5146_s30] sm:$0xff] }
 0x9f0   : > { %2307 = vmatprep.subr.bf16.mxu0 %v1966_v28  ;;  %v1918_v28 = vld [vmem:[%s5131_s20 + $0xe8] sm:$0xff] }
 0x9f1   : > { %2269 = vmatpush1.bf16.msra.mxu1 %v2082_v59  ;;  %v2003_v59 = vunpack.c.l.s8.bf16 %v1918_v28 }
 0x9f2   : > { %2234 = vmatmul.mubr.bf16.vlgmr.msra.gmra.mrb[8].mxu0 %v5339_v11  ;;  %2360 = vmatprep.subr.bf16.mxu1 %v1968_v33  ;;  %v1936_v33 = vld [vmem:[%s5131_s20 + $0x178] sm:$0xff] }
 0x9f3   : > { %2308 = vmatpush1.bf16.msra.mxu0 %v1965_v60  ;;  %2243 = vmatprep.mubr.bf16.mxu0 %v4661_v21  ;;  %v2006_v60 = vunpack.c.l.s8.bf16 %v1921_v58  ;;  %v2055_v40 = vunpack.c.h.s8.bf16 %v1936_v33 }
 0x9f4   : > { %2309 = vmatprep.subr.bf16.mxu0 %v1983_v63  ;;  %2287 = vmatmul.mubr.bf16.vlgmr.msra.gmra.mrb[8].mxu1 %v5339_v11  ;;  %v2021_v63 = vunpack.c.h.s8.bf16 %v1919_v29 }
 0x9f5   : > { %2361 = vmatpush1.bf16.msra.mxu1 %v1967_v6  ;;  %2296 = vmatprep.mubr.bf16.mxu1 %v4661_v21  ;;  %v2020_v6 = vunpack.c.h.s8.bf16 %v1918_v28 }
 0x9f6   : > { %2362 = vmatprep.subr.bf16.mxu1 %v1985_v10  ;;  %v2038_v10 = vunpack.c.l.s8.bf16 %v1936_v33 }
 0x9f7   : > { %2310 = vmatpush1.bf16.msra.mxu0 %v1982_v8  ;;  %v2023_v8 = vunpack.c.h.s8.bf16 %v1921_v58 }
 0x9f8   : > { %2311 = vmatprep.subr.bf16.mxu0 %v2000_v14  ;;  %v1935_v14 = vld [vmem:[%s5131_s20 + $0x170] sm:$0xff] }
 0x9f9   : > { %2363 = vmatpush1.bf16.msra.mxu1 %v1984_v13  ;;  %v2037_v13 = vunpack.c.l.s8.bf16 %v1935_v14 }
 0x9fa   : > { %2244 = vmatmul.mubr.bf16.gmra.mrb[12].mxu0 %v5348_v22  ;;  %2364 = vmatprep.subr.bf16.mxu1 %v2002_v20  ;;  %v1937_v20 = vld [vmem:[%s5131_s20 + $0x180] sm:$0xff] }
 0x9fb   : > { %2312 = vmatpush1.bf16.msra.mxu0 %v1999_v19  ;;  %2339 = vmatprep.mubr.bf16.mxu0 %v4661_v21  ;;  %v2040_v19 = vunpack.c.l.s8.bf16 %v1938_v15  ;;  %v2039_v46 = vunpack.c.l.s8.bf16 %v1937_v20  ;;  %v2056_v17 = vunpack.c.h.s8.bf16 %v1937_v20 }
 0x9fc   : > { %2313 = vmatprep.subr.bf16.mxu0 %v2017_v43  ;;  %2297 = vmatmul.mubr.bf16.gmra.mrb[12].mxu1 %v5348_v22  ;;  %v1953_v43 = vld [vmem:[%s5131_s20 + $0x200] sm:$0xff] }
 0x9fd   : > { %2365 = vmatpush1.bf16.msra.mxu1 %v2001_v52  ;;  %2392 = vmatprep.mubr.bf16.mxu1 %v4661_v21  ;;  %v2054_v52 = vunpack.c.h.s8.bf16 %v1935_v14  ;;  %v2089_v47 = vunpack.c.h.s8.bf16 %v1953_v43 }
 0x9fe   : > { %2366 = vmatprep.subr.bf16.mxu1 %v2019_v5  ;;  %v2072_v5 = vunpack.c.l.s8.bf16 %v1953_v43 }
 0x9ff   : > { %2314 = vmatpush1.bf16.msra.mxu0 %v2016_v0  ;;  %v2057_v0 = vunpack.c.h.s8.bf16 %v1938_v15 }
 0xa00   : > { %2315 = vmatprep.subr.bf16.mxu0 %v2034_v16  ;;  %v1952_v16 = vld [vmem:[%s5131_s20 + $0x1f8] sm:$0xff] }
 0xa01   : > { %2367 = vmatpush1.bf16.msra.mxu1 %v2018_v18  ;;  %v2071_v18 = vunpack.c.l.s8.bf16 %v1952_v16 }
 0xa02   : > { %2368 = vmatprep.subr.bf16.mxu1 %v2036_v24  ;;  %v1954_v24 = vld [vmem:[%s5131_s20 + $0x208] sm:$0xff] }
 0xa03   : > { %2316 = vmatpush1.bf16.msra.mxu0 %v2033_v23  ;;  %v2074_v23 = vunpack.c.l.s8.bf16 %v1955_v9  ;;  %v2073_v26 = vunpack.c.l.s8.bf16 %v1954_v24 }
 0xa04   : > { %2317 = vmatprep.subr.bf16.mxu0 %v2051_v25  ;;  %v1905_v25 = vld [vmem:[%s5131_s20 + $0x80] sm:$0xff] }
 0xa05   : > { %2369 = vmatpush1.bf16.msra.mxu1 %v2035_v3  ;;  %v2088_v3 = vunpack.c.h.s8.bf16 %v1952_v16  ;;  %v1990_v35 = vunpack.c.h.s8.bf16 %v1905_v25 }
 0xa06   : > { %2370 = vmatprep.subr.bf16.mxu1 %v2053_v27  ;;  %v1973_v27 = vunpack.c.l.s8.bf16 %v1905_v25 }
 0xa07   : > { %2318 = vmatpush1.bf16.msra.mxu0 %v2050_v48  ;;  %v2091_v48 = vunpack.c.h.s8.bf16 %v1955_v9 }
 0xa08   : > { %2319 = vmatprep.subr.bf16.mxu0 %v2068_v34  ;;  %v2090_v34 = vunpack.c.h.s8.bf16 %v1954_v24 }
 0xa09   : > { %2371 = vmatpush1.bf16.msra.mxu1 %v2052_v36  ;;  %v2007_v36 = vunpack.c.l.s8.bf16 %v1922_v62 }
 0xa0a   : > { %2372 = vmatprep.subr.bf16.mxu1 %v2070_v37  ;;  %v1939_v37 = vld [vmem:[%s5131_s20 + $0x190] sm:$0xff]  ;;  %s3192_s20 = smul.u32 2176, %s4772_s27  ;;  %s5720_s27 = sand.u32 1, %s4635_s22  }
 0xa0b   : > { %2320 = vmatpush1.bf16.msra.mxu0 %v2067_v2  ;;  %v2024_v2 = vunpack.c.h.s8.bf16 %v1922_v62  ;;  %v2041_v41 = vunpack.c.l.s8.bf16 %v1939_v37  ;;  %s5607_s17 = scalar_lea.sflag [#allocation5], %s5720_s27 }
 0xa0c   : > { %2321 = vmatprep.subr.bf16.mxu0 %v2085_v44  ;;  %v2058_v44 = vunpack.c.h.s8.bf16 %v1939_v37 }
 0xa0d   : > { %2373 = vmatpush1.bf16.msra.mxu1 %v2069_v49  ;;  %v2092_v49 = vunpack.c.h.s8.bf16 %v1956_v45 }
 0xa0e   : > { %2374 = vmatprep.subr.bf16.mxu1 %v2087_v51 }
 0xa0f   : > { %2322 = vmatpush1.bf16.msra.mxu0 %v2084_v50 }
 0xa10   : > { %2413 = vmatprep.subr.bf16.mxu0 %v1970_v53  ;;  %v5430_v53 = vld [vmem:[%s5141_s3] sm:$0xff] }
 0xa11   : > { %2375 = vmatpush1.bf16.msra.mxu1 %v2086_v30 }
 0xa12   : > { %2340 = vmatmul.mubr.bf16.vlgmr.msra.gmra.mrb[16].mxu0 %v5339_v11  ;;  %2466 = vmatprep.subr.bf16.mxu1 %v1972_v55 }
 0xa13   : > { %2414 = vmatpush1.bf16.msra.mxu0 %v1969_v31  ;;  %2349 = vmatprep.mubr.bf16.mxu0 %v4661_v21 }
 0xa14   : > { %2415 = vmatprep.subr.bf16.mxu0 %v1987_v42  ;;  %2393 = vmatmul.mubr.bf16.vlgmr.msra.gmra.mrb[16].mxu1 %v5339_v11 }
 0xa15   : > { %2467 = vmatpush1.bf16.msra.mxu1 %v1971_v7  ;;  %2402 = vmatprep.mubr.bf16.mxu1 %v4661_v21 }
 0xa16   : > { %2468 = vmatprep.subr.bf16.mxu1 %v1989_v57 }
 0xa17   : > { %2416 = vmatpush1.bf16.msra.mxu0 %v1986_v56 }
 0xa18   : > { %2417 = vmatprep.subr.bf16.mxu0 %v2004_v39 }
 0xa19   : > { %2469 = vmatpush1.bf16.msra.mxu1 %v1988_v32 }
 0xa1a   : > { %2350 = vmatmul.mubr.bf16.gmra.mrb[20].mxu0 %v5348_v22  ;;  %2470 = vmatprep.subr.bf16.mxu1 %v2006_v60 }
 0xa1b   : > { %2418 = vmatpush1.bf16.msra.mxu0 %v2003_v59  ;;  %2445 = vmatprep.mubr.bf16.mxu0 %v4661_v21 }
 0xa1c   : > { %2419 = vmatprep.subr.bf16.mxu0 %v2021_v63  ;;  %2403 = vmatmul.mubr.bf16.gmra.mrb[20].mxu1 %v5348_v22 }
 0xa1d   : > { %2471 = vmatpush1.bf16.msra.mxu1 %v2005_v38  ;;  %2498 = vmatprep.mubr.bf16.mxu1 %v4661_v21 }
 0xa1e   : > { %2472 = vmatprep.subr.bf16.mxu1 %v2023_v8 }
 0xa1f   : > { %2420 = vmatpush1.bf16.msra.mxu0 %v2020_v6 }
 0xa20   : > { %2421 = vmatprep.subr.bf16.mxu0 %v2038_v10 }
 0xa21   : > { %2473 = vmatpush1.bf16.msra.mxu1 %v2022_v12 }
 0xa22   : > { %2474 = vmatprep.subr.bf16.mxu1 %v2040_v19 }
 0xa23   : > { %2422 = vmatpush1.bf16.msra.mxu0 %v2037_v13 }
 0xa24   : > { %2423 = vmatprep.subr.bf16.mxu0 %v2055_v40 }
 0xa25   : > { %2475 = vmatpush1.bf16.msra.mxu1 %v2039_v46 }
 0xa26   : > { %2476 = vmatprep.subr.bf16.mxu1 %v2057_v0 }
 0xa27   : > { %2424 = vmatpush1.bf16.msra.mxu0 %v2054_v52 }
 0xa28   : > { %2425 = vmatprep.subr.bf16.mxu0 %v2072_v5 }
 0xa29   : > { %2477 = vmatpush1.bf16.msra.mxu1 %v2056_v17 }
 0xa2a   : > { %2478 = vmatprep.subr.bf16.mxu1 %v2074_v23 }
 0xa2b   : > { %2426 = vmatpush1.bf16.msra.mxu0 %v2071_v18 }
 0xa2c   : > { %2427 = vmatprep.subr.bf16.mxu0 %v2089_v47 }
 0xa2d   : > { %2479 = vmatpush1.bf16.msra.mxu1 %v2073_v26 }
 0xa2e   : > { %2480 = vmatprep.subr.bf16.mxu1 %v2091_v48 }
 0xa2f   : > { %2428 = vmatpush1.bf16.msra.mxu0 %v2088_v3 }
 0xa30   : > { %3741 = vmatprep.subr.bf16.mxu0 %v1973_v27 }
 0xa31   : > { %2481 = vmatpush1.bf16.msra.mxu1 %v2090_v34 }
 0xa32   : > { %2446 = vmatmul.mubr.bf16.vlgmr.msra.gmra.mrb[24].mxu0 %v5339_v11 }
 0xa33   : > { %3742 = vmatpush3.bf16.msra.mxu0 %v1973_v27  ;;  %2455 = vmatprep.mubr.bf16.mxu0 %v4661_v21 }
 0xa34   : > { %3743 = vmatprep.subr.bf16.mxu0 %v1990_v35  ;;  %2499 = vmatmul.mubr.bf16.vlgmr.msra.gmra.mrb[24].mxu1 %v5339_v11 }
 0xa35   : > { %2508 = vmatprep.mubr.bf16.mxu1 %v4661_v21  ;;  %v2075_v21 = vunpack.c.l.s8.bf16 %v1956_v45 }
 0xa37   : > { %3744 = vmatpush3.bf16.msra.mxu0 %v1990_v35 }
 0xa38   : > { %3745 = vmatprep.subr.bf16.mxu0 %v2007_v36 }
 0xa3a   : > { %2456 = vmatmul.mubr.bf16.gmra.mrb[28].mxu0 %v5348_v22 }
 0xa3b   : > { %3746 = vmatpush3.bf16.msra.mxu0 %v2007_v36  ;;  %3757 = vmatprep.mubr.bf16.mxu0 %v5339_v11  ;;  %v2574_v11 = vlaneseq }
 0xa3c   : > { %3747 = vmatprep.subr.bf16.mxu0 %v2024_v2  ;;  %2509 = vmatmul.mubr.bf16.gmra.mrb[28].mxu1 %v5348_v22 }
 0xa3d   : > { %v5424_v50 = vshrl.u32 %v2574_v11, 7 }
 0xa3f   : > { %3748 = vmatpush3.bf16.msra.mxu0 %v2024_v2  ;;  %v5427_v51 = vsub.s32 0, %v5424_v50  ;;  %v5433_v54 = vsub.s32 1, %v5424_v50  ;;  %v5439_v30 = vsub.s32 2, %v5424_v50  ;;  %v5477_v11 = vsub.s32 4, %v5424_v50 }
 0xa40   : > { %3749 = vmatprep.subr.bf16.mxu0 %v2041_v41 }
 0xa41   : > { %v2577_v31 = vrot.slane %v5430_v53, %v5427_v51  ;;  %v2581_v4 = vrot.slane %v5430_v53, %v5433_v54  ;;  %v2736_v42 = vrot.slane %v5436_v1, %v5427_v51  ;;  %v2740_v29 = vrot.slane %v5436_v1, %v5433_v54 }
 0xa42   : > { %v2585_v7 = vrot.slane %v5430_v53, %v5439_v30  ;;  %v2744_v32 = vrot.slane %v5436_v1, %v5439_v30 }
 0xa43   : > { %3750 = vmatpush3.bf16.msra.mxu0 %v2041_v41 }
 0xa44   : > { %3751 = vmatprep.subr.bf16.mxu0 %v2058_v44 }
 0xa47   : > { %3752 = vmatpush3.bf16.msra.mxu0 %v2058_v44 }
 0xa48   : > { %3753 = vmatprep.subr.bf16.mxu0 %v2075_v21 }
 0xa4b   : > { %3754 = vmatpush3.bf16.msra.mxu0 %v2075_v21 }
 0xa4c   : > { %3755 = vmatprep.subr.bf16.mxu0 %v2092_v49 }
 0xa4f   : > { %3756 = vmatpush3.bf16.msra.mxu0 %v2092_v49 }
 0xa52   : > { %3758 = vmatmul.mubr.bf16.vlgmr.msra.gmra.mrb[32].mxu0 %v5348_v22  ;;  %v5444_v22 = vsub.s32 3, %v5424_v50 }
 0xa54   : > { %v2589_v39 = vrot.slane %v5430_v53, %v5444_v22  ;;  %v2748_v33 = vrot.slane %v5436_v1, %v5444_v22 }
 0xaa5   : > { %v2129_v55 = vpop.f32.mrb[0].mxu0 }
 0xaa6   : > { %v2659_v56 = vmul.f32 %v2577_v31, %v2129_v55  ;;  %v2131_v57 = vpop.f32.mrb[1].mxu0  ;;  %v5488_v55 = vsub.s32 7, %v5424_v50 }
 0xaa7   : > { %v2660_v28 = vmul.f32 %v2581_v4, %v2131_v57  ;;  %v2133_v58 = vpop.f32.mrb[2].mxu0  ;;  %v2182_v63 = vpop.f32.mrb[0].mxu1 }
 0xaa8   : > { %v2818_v59 = vadd.f32 %v2736_v42, %v2659_v56  ;;  %v2676_v60 = vmul.f32 %v2577_v31, %v2133_v58  ;;  %v2135_v61 = vpop.f32.mrb[3].mxu0  ;;  %v2661_v8 = vmul.f32 %v2585_v7, %v2182_v63  ;;  %v2184_v10 = vpop.f32.mrb[1].mxu1 }
 0xaa9   : > { %v2819_v38 = vadd.f32 %v2740_v29, %v2660_v28  ;;  %v2677_v6 = vmul.f32 %v2581_v4, %v2135_v61  ;;  %v2662_v15 = vmul.f32 %v2589_v39, %v2184_v10  ;;  %v2186_v12 = vpop.f32.mrb[2].mxu1 }
 0xaaa   : > { %2886 = vst [vmem:[%s5148_s1] sm:$0xff] %v2818_v59  ;;  %v2835_v14 = vadd.f32 %v2736_v42, %v2676_v60  ;;  %v2820_v19 = vadd.f32 %v2744_v32, %v2661_v8  ;;  %v2678_v20 = vmul.f32 %v2585_v7, %v2186_v12  ;;  %v2188_v40 = vpop.f32.mrb[3].mxu1 }
 0xaab   : > { %2887 = vst [vmem:[%s5148_s1 + $0x8] sm:$0xff] %v2819_v38  ;;  %v2836_v13 = vadd.f32 %v2740_v29, %v2677_v6  ;;  %v2821_v43 = vadd.f32 %v2748_v33, %v2662_v15  ;;  %v2679_v46 = vmul.f32 %v2589_v39, %v2188_v40  ;;  %v2764_v6 = vrot.slane %v5436_v1, %v5488_v55 }
 0xaac   : > { %2903 = vst [vmem:[%s5148_s1 + $0x88] sm:$0xff] %v2835_v14  ;;  %2888 = vst [vmem:[%s5148_s1 + $0x10] sm:$0xff] %v2820_v19  ;;  %v2837_v0 = vadd.f32 %v2744_v32, %v2678_v20 }
 0xaad   : > { %2904 = vst [vmem:[%s5148_s1 + $0x90] sm:$0xff] %v2836_v13  ;;  %v2139_v52 = vpop.f32.mrb[4].mxu0  ;;  %2889 = vst [vmem:[%s5148_s1 + $0x18] sm:$0xff] %v2821_v43  ;;  %v2838_v9 = vadd.f32 %v2748_v33, %v2679_v46 }
 0xaae   : > { %v2693_v5 = vmul.f32 %v2577_v31, %v2139_v52  ;;  %v2141_v16 = vpop.f32.mrb[5].mxu0  ;;  %2905 = vst [vmem:[%s5148_s1 + $0x98] sm:$0xff] %v2837_v0 }
 0xaaf   : > { %v2694_v17 = vmul.f32 %v2581_v4, %v2141_v16  ;;  %v2143_v18 = vpop.f32.mrb[6].mxu0  ;;  %2906 = vst [vmem:[%s5148_s1 + $0xa0] sm:$0xff] %v2838_v9  ;;  %v2192_v25 = vpop.f32.mrb[4].mxu1 }
 0xab0   : > { %v2852_v23 = vadd.f32 %v2736_v42, %v2693_v5  ;;  %v2710_v24 = vmul.f32 %v2577_v31, %v2143_v18  ;;  %v2145_v47 = vpop.f32.mrb[7].mxu0  ;;  %v2695_v48 = vmul.f32 %v2585_v7, %v2192_v25  ;;  %v2194_v27 = vpop.f32.mrb[5].mxu1  ;;  %v5480_v31 = vsub.s32 5, %v5424_v50 }
 0xab1   : > { %v2853_v26 = vadd.f32 %v2740_v29, %v2694_v17  ;;  %v2711_v3 = vmul.f32 %v2581_v4, %v2145_v47  ;;  %v2696_v35 = vmul.f32 %v2589_v39, %v2194_v27  ;;  %v2196_v62 = vpop.f32.mrb[6].mxu1  ;;  %v5483_v4 = vsub.s32 6, %v5424_v50 }
 0xab2   : > { %2920 = vst [vmem:[%s5148_s1 + $0x110] sm:$0xff] %v2852_v23  ;;  %v2869_v34 = vadd.f32 %v2736_v42, %v2710_v24  ;;  %v2854_v2 = vadd.f32 %v2744_v32, %v2695_v48  ;;  %v2712_v37 = vmul.f32 %v2585_v7, %v2196_v62  ;;  %v2198_v41 = vpop.f32.mrb[7].mxu1  ;;  %v2593_v42 = vrot.slane %v5430_v53, %v5477_v11 }
 0xab3   : > { %2921 = vst [vmem:[%s5148_s1 + $0x118] sm:$0xff] %v2853_v26  ;;  %v2870_v36 = vadd.f32 %v2740_v29, %v2711_v3  ;;  %v2855_v44 = vadd.f32 %v2748_v33, %v2696_v35  ;;  %v2713_v45 = vmul.f32 %v2589_v39, %v2198_v41  ;;  %v2597_v29 = vrot.slane %v5430_v53, %v5480_v31 }
 0xab4   : > { %2937 = vst [vmem:[%s5148_s1 + $0x198] sm:$0xff] %v2869_v34  ;;  %2922 = vst [vmem:[%s5148_s1 + $0x120] sm:$0xff] %v2854_v2  ;;  %v2871_v21 = vadd.f32 %v2744_v32, %v2712_v37  ;;  %v2752_v7 = vrot.slane %v5436_v1, %v5477_v11  ;;  %v2756_v57 = vrot.slane %v5436_v1, %v5480_v31 }
 0xab5   : > { %2938 = vst [vmem:[%s5148_s1 + $0x1a0] sm:$0xff] %v2870_v36  ;;  %2923 = vst [vmem:[%s5148_s1 + $0x128] sm:$0xff] %v2855_v44  ;;  %v2872_v49 = vadd.f32 %v2748_v33, %v2713_v45  ;;  %v2601_v39 = vrot.slane %v5430_v53, %v5483_v4  ;;  %v2605_v50 = vrot.slane %v5430_v53, %v5488_v55 }
 0xab6   : > { %2939 = vst [vmem:[%s5148_s1 + $0x1a8] sm:$0xff] %v2871_v21  ;;  %v2760_v60 = vrot.slane %v5436_v1, %v5483_v4 }
 0xab7   : > { %2940 = vst [vmem:[%s5148_s1 + $0x1b0] sm:$0xff] %v2872_v49 }
 0xac5   : > { %v2235_v56 = vpop.f32.mrb[8].mxu0 }
 0xac6   : > { %v2663_v28 = vmul.f32 %v2593_v42, %v2235_v56  ;;  %v2237_v58 = vpop.f32.mrb[9].mxu0 }
 0xac7   : > { %v2664_v32 = vmul.f32 %v2597_v29, %v2237_v58  ;;  %v2239_v59 = vpop.f32.mrb[10].mxu0  ;;  %v2288_v38 = vpop.f32.mrb[8].mxu1 }
 0xac8   : > { %v2822_v61 = vadd.f32 %v2752_v7, %v2663_v28  ;;  %v2680_v63 = vmul.f32 %v2593_v42, %v2239_v59  ;;  %v2241_v33 = vpop.f32.mrb[11].mxu0  ;;  %v2665_v14 = vmul.f32 %v2601_v39, %v2288_v38  ;;  %v2290_v53 = vpop.f32.mrb[9].mxu1 }
 0xac9   : > { %v2823_v8 = vadd.f32 %v2756_v57, %v2664_v32  ;;  %v2681_v10 = vmul.f32 %v2597_v29, %v2241_v33  ;;  %v2666_v12 = vmul.f32 %v2605_v50, %v2290_v53  ;;  %v2292_v13 = vpop.f32.mrb[10].mxu1 }
 0xaca   : > { %2890 = vst [vmem:[%s5148_s1 + $0x20] sm:$0xff] %v2822_v61  ;;  %v2839_v15 = vadd.f32 %v2752_v7, %v2680_v63  ;;  %v2824_v20 = vadd.f32 %v2760_v60, %v2665_v14  ;;  %v2682_v40 = vmul.f32 %v2601_v39, %v2292_v13  ;;  %v2294_v43 = vpop.f32.mrb[11].mxu1 }
 0xacb   : > { %2891 = vst [vmem:[%s5148_s1 + $0x28] sm:$0xff] %v2823_v8  ;;  %v2840_v19 = vadd.f32 %v2756_v57, %v2681_v10  ;;  %v2825_v46 = vadd.f32 %v2764_v6, %v2666_v12  ;;  %v2683_v1 = vmul.f32 %v2605_v50, %v2294_v43 }
 0xacc   : > { %2907 = vst [vmem:[%s5148_s1 + $0xa8] sm:$0xff] %v2839_v15  ;;  %2892 = vst [vmem:[%s5148_s1 + $0x30] sm:$0xff] %v2824_v20  ;;  %v2841_v0 = vadd.f32 %v2760_v60, %v2682_v40 }
 0xacd   : > { %2908 = vst [vmem:[%s5148_s1 + $0xb0] sm:$0xff] %v2840_v19  ;;  %v2245_v52 = vpop.f32.mrb[12].mxu0  ;;  %2893 = vst [vmem:[%s5148_s1 + $0x38] sm:$0xff] %v2825_v46  ;;  %v2842_v9 = vadd.f32 %v2764_v6, %v2683_v1 }
 0xace   : > { %v2697_v5 = vmul.f32 %v2593_v42, %v2245_v52  ;;  %v2247_v16 = vpop.f32.mrb[13].mxu0  ;;  %2909 = vst [vmem:[%s5148_s1 + $0xb8] sm:$0xff] %v2841_v0 }
 0xacf   : > { %v2698_v17 = vmul.f32 %v2597_v29, %v2247_v16  ;;  %v2249_v18 = vpop.f32.mrb[14].mxu0  ;;  %2910 = vst [vmem:[%s5148_s1 + $0xc0] sm:$0xff] %v2842_v9  ;;  %v2298_v25 = vpop.f32.mrb[12].mxu1 }
 0xad0   : > { %v2856_v23 = vadd.f32 %v2752_v7, %v2697_v5  ;;  %v2714_v24 = vmul.f32 %v2593_v42, %v2249_v18  ;;  %v2251_v47 = vpop.f32.mrb[15].mxu0  ;;  %v2699_v48 = vmul.f32 %v2601_v39, %v2298_v25  ;;  %v2300_v27 = vpop.f32.mrb[13].mxu1  ;;  %v5521_v42 = vld [vmem:[%s5141_s3 + $0x8] sm:$0xff] }
 0xad1   : > { %v2857_v26 = vadd.f32 %v2756_v57, %v2698_v17  ;;  %v2715_v3 = vmul.f32 %v2597_v29, %v2251_v47  ;;  %v2700_v35 = vmul.f32 %v2605_v50, %v2300_v27  ;;  %v2302_v62 = vpop.f32.mrb[14].mxu1  ;;  %v5524_v29 = vld [vmem:[%s5146_s30 + $0x8] sm:$0xff]  ;;  %v2613_v56 = vrot.slane %v5521_v42, %v5433_v54 }
 0xad2   : > { %2924 = vst [vmem:[%s5148_s1 + $0x130] sm:$0xff] %v2856_v23  ;;  %v2873_v34 = vadd.f32 %v2752_v7, %v2714_v24  ;;  %v2858_v2 = vadd.f32 %v2760_v60, %v2699_v48  ;;  %v2716_v37 = vmul.f32 %v2601_v39, %v2302_v62  ;;  %v2304_v41 = vpop.f32.mrb[15].mxu1  ;;  %v2609_v7 = vrot.slane %v5521_v42, %v5427_v51 }
 0xad3   : > { %2925 = vst [vmem:[%s5148_s1 + $0x138] sm:$0xff] %v2857_v26  ;;  %v2874_v36 = vadd.f32 %v2756_v57, %v2715_v3  ;;  %v2859_v44 = vadd.f32 %v2764_v6, %v2700_v35  ;;  %v2717_v45 = vmul.f32 %v2605_v50, %v2304_v41  ;;  %v2768_v57 = vrot.slane %v5524_v29, %v5427_v51 }
 0xad4   : > { %2941 = vst [vmem:[%s5148_s1 + $0x1b8] sm:$0xff] %v2873_v34  ;;  %2926 = vst [vmem:[%s5148_s1 + $0x140] sm:$0xff] %v2858_v2  ;;  %v2875_v21 = vadd.f32 %v2760_v60, %v2716_v37  ;;  %v2772_v28 = vrot.slane %v5524_v29, %v5433_v54  ;;  %v2617_v58 = vrot.slane %v5521_v42, %v5439_v30 }
 0xad5   : > { %2942 = vst [vmem:[%s5148_s1 + $0x1c0] sm:$0xff] %v2874_v36  ;;  %2927 = vst [vmem:[%s5148_s1 + $0x148] sm:$0xff] %v2859_v44  ;;  %v2876_v49 = vadd.f32 %v2764_v6, %v2717_v45  ;;  %v2621_v59 = vrot.slane %v5521_v42, %v5444_v22  ;;  %v2776_v63 = vrot.slane %v5524_v29, %v5439_v30 }
 0xad6   : > { %2943 = vst [vmem:[%s5148_s1 + $0x1c8] sm:$0xff] %v2875_v21  ;;  %v2780_v6 = vrot.slane %v5524_v29, %v5444_v22  ;;  %v2625_v21 = vrot.slane %v5521_v42, %v5477_v11 }
 0xad7   : > { %2944 = vst [vmem:[%s5148_s1 + $0x1d0] sm:$0xff] %v2876_v49  ;;  %v2629_v49 = vrot.slane %v5521_v42, %v5480_v31 }
 0xae5   : > { %v2341_v39 = vpop.f32.mrb[16].mxu0 }
 0xae6   : > { %v2667_v50 = vmul.f32 %v2609_v7, %v2341_v39  ;;  %v2343_v32 = vpop.f32.mrb[17].mxu0  ;;  %v2633_v39 = vrot.slane %v5521_v42, %v5483_v4 }
 0xae7   : > { %v2668_v60 = vmul.f32 %v2613_v56, %v2343_v32  ;;  %v2345_v61 = vpop.f32.mrb[18].mxu0  ;;  %v2394_v54 = vpop.f32.mrb[16].mxu1 }
 0xae8   : > { %v2826_v51 = vadd.f32 %v2768_v57, %v2667_v50  ;;  %v2684_v33 = vmul.f32 %v2609_v7, %v2345_v61  ;;  %v2347_v38 = vpop.f32.mrb[19].mxu0  ;;  %v2669_v14 = vmul.f32 %v2617_v58, %v2394_v54  ;;  %v2396_v53 = vpop.f32.mrb[17].mxu1  ;;  %v2637_v50 = vrot.slane %v5521_v42, %v5488_v55 }
 0xae9   : > { %v2827_v8 = vadd.f32 %v2772_v28, %v2668_v60  ;;  %v2685_v10 = vmul.f32 %v2613_v56, %v2347_v38  ;;  %v2670_v12 = vmul.f32 %v2621_v59, %v2396_v53  ;;  %v2398_v13 = vpop.f32.mrb[18].mxu1  ;;  %v2792_v60 = vrot.slane %v5524_v29, %v5483_v4 }
 0xaea   : > { %2894 = vst [vmem:[%s5148_s1 + $0x40] sm:$0xff] %v2826_v51  ;;  %v2843_v15 = vadd.f32 %v2768_v57, %v2684_v33  ;;  %v2828_v19 = vadd.f32 %v2776_v63, %v2669_v14  ;;  %v2686_v20 = vmul.f32 %v2617_v58, %v2398_v13  ;;  %v2400_v40 = vpop.f32.mrb[19].mxu1  ;;  %v2796_v51 = vrot.slane %v5524_v29, %v5488_v55 }
 0xaeb   : > { %2895 = vst [vmem:[%s5148_s1 + $0x48] sm:$0xff] %v2827_v8  ;;  %v2844_v30 = vadd.f32 %v2772_v28, %v2685_v10  ;;  %v2829_v43 = vadd.f32 %v2780_v6, %v2670_v12  ;;  %v2687_v22 = vmul.f32 %v2621_v59, %v2400_v40 }
 0xaec   : > { %2911 = vst [vmem:[%s5148_s1 + $0xc8] sm:$0xff] %v2843_v15  ;;  %2896 = vst [vmem:[%s5148_s1 + $0x50] sm:$0xff] %v2828_v19  ;;  %v2845_v1 = vadd.f32 %v2776_v63, %v2686_v20 }
 0xaed   : > { %2912 = vst [vmem:[%s5148_s1 + $0xd0] sm:$0xff] %v2844_v30  ;;  %v2351_v46 = vpop.f32.mrb[20].mxu0  ;;  %2897 = vst [vmem:[%s5148_s1 + $0x58] sm:$0xff] %v2829_v43  ;;  %v2846_v5 = vadd.f32 %v2780_v6, %v2687_v22 }
 0xaee   : > { %v2701_v52 = vmul.f32 %v2609_v7, %v2351_v46  ;;  %v2353_v0 = vpop.f32.mrb[21].mxu0  ;;  %2913 = vst [vmem:[%s5148_s1 + $0xd8] sm:$0xff] %v2845_v1 }
 0xaef   : > { %v2702_v16 = vmul.f32 %v2613_v56, %v2353_v0  ;;  %v2355_v9 = vpop.f32.mrb[22].mxu0  ;;  %2914 = vst [vmem:[%s5148_s1 + $0xe0] sm:$0xff] %v2846_v5  ;;  %v2404_v24 = vpop.f32.mrb[20].mxu1 }
 0xaf0   : > { %v2860_v17 = vadd.f32 %v2768_v57, %v2701_v52  ;;  %v2718_v18 = vmul.f32 %v2609_v7, %v2355_v9  ;;  %v2357_v23 = vpop.f32.mrb[23].mxu0  ;;  %v2703_v26 = vmul.f32 %v2617_v58, %v2404_v24  ;;  %v2406_v3 = vpop.f32.mrb[21].mxu1  ;;  %v2784_v7 = vrot.slane %v5524_v29, %v5477_v11 }
 0xaf1   : > { %v2861_v47 = vadd.f32 %v2772_v28, %v2702_v16  ;;  %v2719_v25 = vmul.f32 %v2613_v56, %v2357_v23  ;;  %v2704_v27 = vmul.f32 %v2621_v59, %v2406_v3  ;;  %v2408_v34 = vpop.f32.mrb[22].mxu1 }
 0xaf2   : > { %2928 = vst [vmem:[%s5148_s1 + $0x150] sm:$0xff] %v2860_v17  ;;  %v2877_v48 = vadd.f32 %v2768_v57, %v2718_v18  ;;  %v2862_v62 = vadd.f32 %v2776_v63, %v2703_v26  ;;  %v2720_v36 = vmul.f32 %v2617_v58, %v2408_v34  ;;  %v2410_v2 = vpop.f32.mrb[23].mxu1  ;;  %v2788_v57 = vrot.slane %v5524_v29, %v5480_v31 }
 0xaf3   : > { %2929 = vst [vmem:[%s5148_s1 + $0x158] sm:$0xff] %v2861_v47  ;;  %v2878_v35 = vadd.f32 %v2772_v28, %v2719_v25  ;;  %v2863_v37 = vadd.f32 %v2780_v6, %v2704_v27  ;;  %v2721_v41 = vmul.f32 %v2621_v59, %v2410_v2 }
 0xaf4   : > { %2945 = vst [vmem:[%s5148_s1 + $0x1d8] sm:$0xff] %v2877_v48  ;;  %2930 = vst [vmem:[%s5148_s1 + $0x160] sm:$0xff] %v2862_v62  ;;  %v2879_v44 = vadd.f32 %v2776_v63, %v2720_v36  ;;  %v3187_v36 = vld [vmem:[%s5146_s30 + $0x10] ss:$0 sm:$0xff]  ;;  %s5597_s30 = scalar_lea.hbm %s5719_s2, %s3192_s20 }
 0xaf5   : > { %2946 = vst [vmem:[%s5148_s1 + $0x1e0] sm:$0xff] %v2878_v35  ;;  %2931 = vst [vmem:[%s5148_s1 + $0x168] sm:$0xff] %v2863_v37  ;;  %v2880_v45 = vadd.f32 %v2780_v6, %v2721_v41  ;;  %v3186_v35 = vld [vmem:[%s5141_s3 + $0x10] ss:$0 sm:$0xff] }
 0xaf6   : > { %2947 = vst [vmem:[%s5148_s1 + $0x1e8] sm:$0xff] %v2879_v44 }
 0xaf7   : > { %2948 = vst [vmem:[%s5148_s1 + $0x1f0] sm:$0xff] %v2880_v45 }
 0xb05   : > { %v2447_v56 = vpop.f32.mrb[24].mxu0 }
 0xb06   : > { %v2671_v28 = vmul.f32 %v2625_v21, %v2447_v56  ;;  %v2449_v58 = vpop.f32.mrb[25].mxu0 }
 0xb07   : > { %v2672_v32 = vmul.f32 %v2629_v49, %v2449_v58  ;;  %v2451_v59 = vpop.f32.mrb[26].mxu0  ;;  %v2500_v31 = vpop.f32.mrb[24].mxu1 }
 0xb08   : > { %v2830_v11 = vadd.f32 %v2784_v7, %v2671_v28  ;;  %v2688_v61 = vmul.f32 %v2625_v21, %v2451_v59  ;;  %v2453_v63 = vpop.f32.mrb[27].mxu0  ;;  %v2673_v54 = vmul.f32 %v2633_v39, %v2500_v31  ;;  %v2502_v42 = vpop.f32.mrb[25].mxu1 }
 0xb09   : > { %v2831_v33 = vadd.f32 %v2788_v57, %v2672_v32  ;;  %v2689_v38 = vmul.f32 %v2629_v49, %v2453_v63  ;;  %v2674_v8 = vmul.f32 %v2637_v50, %v2502_v42  ;;  %v2504_v10 = vpop.f32.mrb[26].mxu1 }
 0xb0a   : > { %2898 = vst [vmem:[%s5148_s1 + $0x60] sm:$0xff] %v2830_v11  ;;  %v2847_v6 = vadd.f32 %v2784_v7, %v2688_v61  ;;  %v2832_v14 = vadd.f32 %v2792_v60, %v2673_v54  ;;  %v2690_v53 = vmul.f32 %v2633_v39, %v2504_v10  ;;  %v2506_v15 = vpop.f32.mrb[27].mxu1 }
 0xb0b   : > { %2899 = vst [vmem:[%s5148_s1 + $0x68] sm:$0xff] %v2831_v33  ;;  %v2848_v4 = vadd.f32 %v2788_v57, %v2689_v38  ;;  %v2833_v12 = vadd.f32 %v2796_v51, %v2674_v8  ;;  %v2691_v55 = vmul.f32 %v2637_v50, %v2506_v15 }
 0xb0c   : > { %2915 = vst [vmem:[%s5148_s1 + $0xe8] sm:$0xff] %v2847_v6  ;;  %2900 = vst [vmem:[%s5148_s1 + $0x70] sm:$0xff] %v2832_v14  ;;  %v2849_v13 = vadd.f32 %v2792_v60, %v2690_v53 }
 0xb0d   : > { %2916 = vst [vmem:[%s5148_s1 + $0xf0] sm:$0xff] %v2848_v4  ;;  %v2457_v29 = vpop.f32.mrb[28].mxu0  ;;  %2901 = vst [vmem:[%s5148_s1 + $0x78] sm:$0xff] %v2833_v12  ;;  %v2850_v20 = vadd.f32 %v2796_v51, %v2691_v55 }
 0xb0e   : > { %v2705_v30 = vmul.f32 %v2625_v21, %v2457_v29  ;;  %v2459_v19 = vpop.f32.mrb[29].mxu0  ;;  %2917 = vst [vmem:[%s5148_s1 + $0xf8] sm:$0xff] %v2849_v13 }
 0xb0f   : > { %v2706_v40 = vmul.f32 %v2629_v49, %v2459_v19  ;;  %v2461_v43 = vpop.f32.mrb[30].mxu0  ;;  %2918 = vst [vmem:[%s5148_s1 + $0x100] sm:$0xff] %v2850_v20  ;;  %v2510_v52 = vpop.f32.mrb[28].mxu1 }
 0xb10   : > { %v2864_v22 = vadd.f32 %v2784_v7, %v2705_v30  ;;  %v2722_v46 = vmul.f32 %v2625_v21, %v2461_v43  ;;  %v2463_v1 = vpop.f32.mrb[31].mxu0  ;;  %v2707_v16 = vmul.f32 %v2633_v39, %v2510_v52  ;;  %v2512_v9 = vpop.f32.mrb[29].mxu1 }
 0xb11   : > { %v2865_v0 = vadd.f32 %v2788_v57, %v2706_v40  ;;  %v2723_v5 = vmul.f32 %v2629_v49, %v2463_v1  ;;  %v2708_v18 = vmul.f32 %v2637_v50, %v2512_v9  ;;  %v2514_v23 = vpop.f32.mrb[30].mxu1 }
 0xb12   : > { %2932 = vst [vmem:[%s5148_s1 + $0x170] sm:$0xff] %v2864_v22  ;;  %v2881_v17 = vadd.f32 %v2784_v7, %v2722_v46  ;;  %v2866_v47 = vadd.f32 %v2792_v60, %v2707_v16  ;;  %v2724_v25 = vmul.f32 %v2633_v39, %v2514_v23  ;;  %v2516_v26 = vpop.f32.mrb[31].mxu1 }
 0xb13   : > { %2933 = vst [vmem:[%s5148_s1 + $0x178] sm:$0xff] %v2865_v0  ;;  %v2882_v24 = vadd.f32 %v2788_v57, %v2723_v5  ;;  %v2867_v3 = vadd.f32 %v2796_v51, %v2708_v18  ;;  %v2725_v48 = vmul.f32 %v2637_v50, %v2516_v26 }
 0xb14   : > { %2949 = vst [vmem:[%s5148_s1 + $0x1f8] sm:$0xff] %v2881_v17  ;;  %2934 = vst [vmem:[%s5148_s1 + $0x180] sm:$0xff] %v2866_v47  ;;  %v2883_v27 = vadd.f32 %v2792_v60, %v2724_v25 }
 0xb15   : > { %2950 = vst [vmem:[%s5148_s1 + $0x200] sm:$0xff] %v2882_v24  ;;  %2935 = vst [vmem:[%s5148_s1 + $0x188] sm:$0xff] %v2867_v3  ;;  %v2884_v34 = vadd.f32 %v2796_v51, %v2725_v48 }
 0xb16   : > { %2951 = vst [vmem:[%s5148_s1 + $0x208] sm:$0xff] %v2883_v27 }
 0xb17   : > { %2952 = vst [vmem:[%s5148_s1 + $0x210] sm:$0xff] %v2884_v34 }
 0xb25   : > { %v3759_v62 = vpop.f32.mrb[32].mxu0 }
 0xb26   : > { %v2709_v2 = vmul.f32 %v3759_v62, %v3186_v35  ;;  %v2553_v37 = vpop.f32.mrb[33].mxu0 }
 0xb27   : > { %v2675_v41 = vmul.f32 %v3186_v35, %v2553_v37  ;;  %v3760_v44 = vpop.f32.mrb[34].mxu0 }
 0xb28   : > { %v2868_v45 = vadd.f32 %v3187_v36, %v2709_v2  ;;  %v2726_v21 = vmul.f32 %v3760_v44, %v3186_v35  ;;  %v2556_v49 = vpop.f32.mrb[35].mxu0 }
 0xb29   : > { %v2834_v7 = vadd.f32 %v3187_v36, %v2675_v41  ;;  %v2692_v56 = vmul.f32 %v3186_v35, %v2556_v49 }
 0xb2a   : > { %2936 = vst [vmem:[%s5148_s1 + $0x190] sm:$0xff] %v2868_v45  ;;  %v2885_v57 = vadd.f32 %v3187_v36, %v2726_v21 }
 0xb2b   : > { %2902 = vst [vmem:[%s5148_s1 + $0x80] sm:$0xff] %v2834_v7  ;;  %v2851_v39 = vadd.f32 %v3187_v36, %v2692_v56 }
 0xb2c   : > { %2953 = vst [vmem:[%s5148_s1 + $0x218] sm:$0xff] %v2885_v57 }
 0xb2d   : > { %2919 = vst [vmem:[%s5148_s1 + $0x108] sm:$0xff] %v2851_v39 }
 0xb2e   : > { %4566 = shalt.err (!%p4563_p12)
}
 0xb2f   : > { %s4567_s1 = scalar_lea.hbm %s5597_s30, 8704  ;;  %s4571_s20 = scalar_lea.hbm %s5719_s2, 17408 }
 0xb30   : > { %p4568_p1 = scmp.ne.s32.totalorder %s5597_s30, %s4567_s1  ;;  %p4572_p2 = scmp.lt.u32.totalorder %s5597_s30, %s5719_s2 }
 0xb31   : > { %p4573_p9 = scmp.lt.u32.totalorder %s4571_s20, %s4567_s1  ;;  %p4575_p6 = scmp.lt.u32.totalorder %s4567_s1, %s5597_s30 }
 0xb32   : > { %p4569_p13 = pnand %p4568_p1, %p5721_p7 }
 0xb33   : > { %p4574_p4 = por %p4573_p9, %p4572_p2 }
 0xb34   : > { %p4570_p0 = pneg %p4569_p13 }
 0xb35   : > { %p4576_p3 = por %p4575_p6, %p4574_p4 }
 0xb37   : > { %p4577_p5 = pnand %p4576_p3, %p4570_p0 }
 0xb39   : > { %4580 = shalt.err (!%p4577_p5)
}
 0xb3a   : > { %s4663_s27 = smov 2176   ;;  %s4664_s26 = smov 4352  }
 0xb3b   : > { %s4665_s15 = smov 136  }
 0xb3c   : > { %4097 = dma.vmem_to_hbm [thread:$0]  (%p5721_p7), %s5600_s28, 8704, %s5597_s30, %s5607_s17, %s4663_s27, %s4664_s26, %s4665_s15  }
 0xb3d PF: > { %s2983_s25 = sand.u32 1, %s4631_s21   ;;  %p5722_p8 = scmp.ne.s32.totalorder %s5696_s18, 0 }
 0xb3e   : > { %p5723_p11 = scmp.ge.s32.totalorder %s4643_s24, 2  ;;  %s2984_s19 = scalar_lea.sflag [#allocation5], %s2983_s25 }
 0xb40   : > { %p4135_p10 = pnand %p5723_p11, %p5722_p8 }
 0xb42   : > { %4626 = dma.done.wait (!%p4135_p10), %s2984_s19, 8704  }
 0xb43   : > { %4628 = vsyncadd (!%p4135_p10), %s2984_s19, 4294958592  ;;  %p32_p12 = scmp.ge.s32.totalorder %s5030_s29, 4   ;;  %s5724_s21 = smov %s4635_s22 }
 0xb44   : > { %s5725_s22 = smov %s4639_s23  ;;  %s5726_s23 = smov %s5041_s14 }
 0xb45   : > { %s5727_s24 = smov %s5030_s29  ;;  %34 = sbr.rel (!%p32_p12) target bundleno = 21 (0x15), region = 178 }
 0xb4c   :  { %2989 = vsyncpa [#allocation4], 1 }
 0xb4d   :  { %2991 = vsyncpa [#allocation4 + $0x1], 1 }
 0xb4e   :  { %2992 = vsyncpa [#allocation7], 1 }
 0xb4f   :  { %2993 = vsyncpa [#allocation10], 1 }
 0xb50   :  { %2994 = vsyncpa [#allocation13], 1 }
 0xb51   :  { %2995 = vsyncpa [#allocation16], 1 }
 0xb52   :  { %2996 = vsyncpa [#allocation19], 1 }
 0xb53   :  { %2997 = vsyncpa [#allocation5], 1 }
 0xb54   :  { %2999 = vsyncpa [#allocation5 + $0x1], 1 }

</bundles_post_ra>
